<compile_context>
chip_gen: v7x
topology: tpu7x:2x2x1
jax: 0.10.0
libtpu: 0.0.40
codegen_flags: <defaults>
</compile_context>

<pallas_src>
import jax
import jax.numpy as jnp
from jax.experimental import pallas as pl
from jax.experimental.pallas import tpu as pltpu

_NEG_SLOPE = 0.2
_EPS = 1e-5
_CHANS = [3, 8, 16, 32, 64, 64]      # channel chain of the five conv blocks
_K0_PAD = 32                         # layer-0 patch rows: 9*3=27, padded to 32


def _out_hw(h, w):
    """Conv2d(k=3, stride=2, padding=1) output spatial size."""
    return (h - 1) // 2 + 1, (w - 1) // 2 + 1


# ----------------------------------------------------------------------------
# In-kernel building blocks
# ----------------------------------------------------------------------------
def _leaky(y):
    return jnp.maximum(y, _NEG_SLOPE * y)


def _instance_norm(y, g_ref, be_ref):
    """Per-channel normalization over the spatial (lane) axis, affine."""
    inv_p = 1.0 / y.shape[1]
    mean = jnp.sum(y, axis=1, keepdims=True) * inv_p
    var = jnp.sum(y * y, axis=1, keepdims=True) * inv_p - mean * mean
    var = jnp.maximum(var, 0.0)                       # guard against cancellation
    y = (y - mean) * jax.lax.rsqrt(var + _EPS)
    return y * g_ref[...] + be_ref[...]


def _conv_block(act, s_ref, wc_ref, b_ref, patch_ref):
    """3x3 / stride-2 / pad-1 conv + bias + LeakyReLU(0.2) for ONE sample.

    act       : (C_in, P_in)      f32 value   (spatial on lanes)
    s_ref     : (9, P_in, P_out)  bf16 ref    0/1 im2col selection per tap
    wc_ref    : (C_out, 9*C_in)   bf16 ref    tap-major fused weights
    b_ref     : (C_out, 1)        f32 ref
    patch_ref : (9*C_in, P_out)   f32 VMEM scratch
    returns   : (C_out, P_out)    f32 value
    """
    c_in = act.shape[0]
    act_bf = act.astype(jnp.bfloat16)
    for t in range(9):                                # static unroll over taps
        patch_ref[t * c_in:(t + 1) * c_in, :] = jnp.dot(
            act_bf, s_ref[t], preferred_element_type=jnp.float32)
    # One deep-K matmul instead of nine shallow per-tap matmuls.
    y = jnp.dot(wc_ref[...], patch_ref[...].astype(jnp.bfloat16),
                preferred_element_type=jnp.float32)
    return _leaky(y + b_ref[...])


def _backbone_kernel(p0_ref,
                     wc0, b0, g0, be0,
                     s1, wc1, b1, g1, be1,
                     s2, wc2, b2, g2, be2,
                     s3, wc3, b3, g3, be3,
                     s4, wc4, b4,
                     o_ref,
                     pt1, pt2, pt3, pt4):
    # Layer 0: im2col already done in the wrapper -> single fused matmul.
    y = jnp.dot(wc0[...], p0_ref[0], preferred_element_type=jnp.float32)   # (8, P1)
    y = _instance_norm(_leaky(y + b0[...]), g0, be0)

    y = _instance_norm(_conv_block(y, s1, wc1, b1, pt1), g1, be1)          # (16, P2)
    y = _instance_norm(_conv_block(y, s2, wc2, b2, pt2), g2, be2)          # (32, P3)
    y = _instance_norm(_conv_block(y, s3, wc3, b3, pt3), g3, be3)          # (64, P4)
    y = _conv_block(y, s4, wc4, b4, pt4)                                   # (64, P5)

    # TODO(synk): Dropout(p=0.5) is eval-mode identity (no RNG mask applied).
    # AdaptiveAvgPool2d(1): mean over the spatial (lane) axis.
    o_ref[...] = jnp.mean(y, axis=1, keepdims=True)[None]                  # (1, 64, 1)


# ----------------------------------------------------------------------------
# Host-side constant operands (built once; N-independent)
# ----------------------------------------------------------------------------
def _selection_matrices(h_in, w_in):
    """(9, P_in, P_out) 0/1 im2col gather matrices for k=3, stride=2, pad=1."""
    h_out, w_out = _out_hw(h_in, w_in)
    p_in = h_in * w_in
    ho = jnp.arange(h_out)[:, None]
    wo = jnp.arange(w_out)[None, :]
    taps = []
    for di in range(3):
        for dj in range(3):
            h = 2 * ho + di - 1
            w = 2 * wo + dj - 1
            valid = (h >= 0) & (h < h_in) & (w >= 0) & (w < w_in)
            src = jnp.where(valid, h * w_in + w, p_in)      # p_in sentinel -> zero row
            one_hot = jax.nn.one_hot(src.reshape(-1), p_in, dtype=jnp.float32)
            taps.append(one_hot.T)                          # (p_in, p_out)
    return jnp.stack(taps, axis=0).astype(jnp.bfloat16)


def _fused_tap_weights(w, k_pad=None):
    """(C_out, C_in, 3, 3) -> (C_out, 9*C_in) bf16, column index = t*C_in + ci."""
    c_out, c_in = w.shape[0], w.shape[1]
    wt = jnp.transpose(w.reshape(c_out, c_in, 9), (0, 2, 1)).reshape(c_out, 9 * c_in)
    if k_pad is not None and k_pad > 9 * c_in:
        wt = jnp.pad(wt, ((0, 0), (0, k_pad - 9 * c_in)))
    return wt.astype(jnp.bfloat16)


def _col(v):
    return v.reshape(-1, 1).astype(jnp.float32)


def build_operands(params, h, w):
    """Constant kernel operands in kernel-argument order."""
    ops = []
    h_i, w_i = h, w
    for l, (wt, b, g, be) in enumerate(params):
        if l == 0:
            ops.append(_fused_tap_weights(wt, k_pad=_K0_PAD))    # gather done in wrapper
        else:
            ops.append(_selection_matrices(h_i, w_i))
            ops.append(_fused_tap_weights(wt))
        ops.append(_col(b))
        if g is not None:
            ops.append(_col(g))
            ops.append(_col(be))
        h_i, w_i = _out_hw(h_i, w_i)
    return ops


def _im2col_layer0(x, h_out, w_out):
    """(N, 3, H, W) f32 -> (N, 32, h_out*w_out) bf16 tap-major layer-0 patches."""
    n, c = x.shape[0], x.shape[1]
    xp = jnp.pad(x, ((0, 0), (0, 0), (1, 1), (1, 1)))
    taps = []
    for di in range(3):
        for dj in range(3):
            taps.append(xp[:, :, di:di + 2 * h_out:2, dj:dj + 2 * w_out:2])
    p = jnp.stack(taps, axis=1).reshape(n, 9 * c, h_out * w_out)   # rows = t*3 + ci
    p = jnp.pad(p, ((0, 0), (0, _K0_PAD - 9 * c), (0, 0)))
    return p.astype(jnp.bfloat16)


# ----------------------------------------------------------------------------
# Forward pass: one pallas_call, grid over batch ("parallel" for v7x megacore)
# ----------------------------------------------------------------------------
def small_backbone_forward(x_nchw, operands):
    n, _, h, w = x_nchw.shape
    h1, w1 = _out_hw(h, w)
    h2, w2 = _out_hw(h1, w1)
    h3, w3 = _out_hw(h2, w2)
    h4, w4 = _out_hw(h3, w3)
    h5, w5 = _out_hw(h4, w4)
    p1, p2, p3, p4, p5 = h1 * w1, h2 * w2, h3 * w3, h4 * w4, h5 * w5

    # Layer-0 im2col in plain JAX (tiny input) -> replaces the 4.5 MiB S0 operand.
    patches0 = _im2col_layer0(x_nchw.astype(jnp.float32), h1, w1)

    in_specs = [pl.BlockSpec((1, _K0_PAD, p1), lambda i: (i, 0, 0))]
    for op in operands:   # grid-invariant weights / selection matrices
        in_specs.append(pl.BlockSpec(op.shape, lambda i, nd=op.ndim: (0,) * nd))

    out = pl.pallas_call(
        _backbone_kernel,
        grid=(n,),
        out_shape=jax.ShapeDtypeStruct((n, 64, 1), jnp.float32),
        in_specs=in_specs,
        out_specs=pl.BlockSpec((1, 64, 1), lambda i: (i, 0, 0)),
        scratch_shapes=[
            pltpu.VMEM((9 * 8, p2), jnp.float32),    # layer-1 patches
            pltpu.VMEM((9 * 16, p3), jnp.float32),   # layer-2 patches
            pltpu.VMEM((9 * 32, p4), jnp.float32),   # layer-3 patches
            pltpu.VMEM((9 * 64, p5), jnp.float32),   # layer-4 patches
        ],
        compiler_params=pltpu.CompilerParams(
            dimension_semantics=("parallel",)),
    )(patches0, *operands)
    return out.reshape(n, 64, 1, 1)                  # NCHW, like PyTorch


# ----------------------------------------------------------------------------
# Parameter init (deterministic, matches nn.Module shapes)
# ----------------------------------------------------------------------------
def init_params(key):
    norm_flags = [True, True, True, True, False]
    params = []
    for i in range(5):
        cin, cout = _CHANS[i], _CHANS[i + 1]
        key, kw, kb, kg, kbe = jax.random.split(key, 5)
        w = jax.random.normal(kw, (cout, cin, 3, 3), jnp.float32) / jnp.sqrt(cin * 9.0)
        b = 0.05 * jax.random.normal(kb, (cout,), jnp.float32)
        if norm_flags[i]:
            g = 1.0 + 0.1 * jax.random.normal(kg, (cout,), jnp.float32)
            be = 0.1 * jax.random.normal(kbe, (cout,), jnp.float32)
        else:
            g, be = None, None
        params.append((w, b, g, be))
    return params


# ----------------------------------------------------------------------------
if __name__ == "__main__":
    key = jax.random.PRNGKey(0)
    key, kx = jax.random.split(key)
    # Input matches Conv2d(3, ...): NCHW with 3 channels; 32x32 -> final 1x1.
    N, H, W = 2, 32, 32
    x = jax.random.normal(kx, (N, 3, H, W), jnp.float32)

    params = init_params(key)
    operands = build_operands(params, h=H, w=W)      # constants, built once

    forward = jax.jit(small_backbone_forward)
    out = jax.block_until_ready(forward(x, operands))

    assert out.shape == (N, 64, 1, 1), out.shape
    assert out.dtype == jnp.float32
    assert bool(jnp.all(jnp.isfinite(out)))
    print("KERNEL_OK")
</pallas_src>

<mosaic_0001>
module attributes {stable_mosaic.version = 11 : i64} {
  func.func @_backbone_kernel(%arg0: i32, %arg1: memref<1x32x256xbf16, #tpu.memory_space<vmem>>, %arg2: memref<8x32xbf16, #tpu.memory_space<vmem>>, %arg3: memref<8x1xf32, #tpu.memory_space<vmem>>, %arg4: memref<8x1xf32, #tpu.memory_space<vmem>>, %arg5: memref<8x1xf32, #tpu.memory_space<vmem>>, %arg6: memref<9x256x64xbf16, #tpu.memory_space<vmem>>, %arg7: memref<16x72xbf16, #tpu.memory_space<vmem>>, %arg8: memref<16x1xf32, #tpu.memory_space<vmem>>, %arg9: memref<16x1xf32, #tpu.memory_space<vmem>>, %arg10: memref<16x1xf32, #tpu.memory_space<vmem>>, %arg11: memref<9x64x16xbf16, #tpu.memory_space<vmem>>, %arg12: memref<32x144xbf16, #tpu.memory_space<vmem>>, %arg13: memref<32x1xf32, #tpu.memory_space<vmem>>, %arg14: memref<32x1xf32, #tpu.memory_space<vmem>>, %arg15: memref<32x1xf32, #tpu.memory_space<vmem>>, %arg16: memref<9x16x4xbf16, #tpu.memory_space<vmem>>, %arg17: memref<64x288xbf16, #tpu.memory_space<vmem>>, %arg18: memref<64x1xf32, #tpu.memory_space<vmem>>, %arg19: memref<64x1xf32, #tpu.memory_space<vmem>>, %arg20: memref<64x1xf32, #tpu.memory_space<vmem>>, %arg21: memref<9x4x1xbf16, #tpu.memory_space<vmem>>, %arg22: memref<64x576xbf16, #tpu.memory_space<vmem>>, %arg23: memref<64x1xf32, #tpu.memory_space<vmem>>, %arg24: memref<1x64x1xf32, #tpu.memory_space<vmem>>, %arg25: memref<72x64xf32, #tpu.memory_space<vmem>>, %arg26: memref<144x16xf32, #tpu.memory_space<vmem>>, %arg27: memref<288x4xf32, #tpu.memory_space<vmem>>, %arg28: memref<576x1xf32, #tpu.memory_space<vmem>>) attributes {dimension_semantics = [#tpu.dimension_semantics<parallel>], iteration_bounds = array<i64: 2>, scalar_prefetch = 0 : i64, scratch_operands = 4 : i64, tpu.core_type = #tpu.core_type<tc>, window_params = [{transform_indices = @transform_0, window_bounds = array<i64: 1, 32, 256>}, {pipeline_mode = #tpu.pipeline_mode<synchronous>, transform_indices = @transform_1, window_bounds = array<i64: 8, 32>}, {pipeline_mode = #tpu.pipeline_mode<synchronous>, transform_indices = @transform_2, window_bounds = array<i64: 8, 1>}, {pipeline_mode = #tpu.pipeline_mode<synchronous>, transform_indices = @transform_3, window_bounds = array<i64: 8, 1>}, {pipeline_mode = #tpu.pipeline_mode<synchronous>, transform_indices = @transform_4, window_bounds = array<i64: 8, 1>}, {pipeline_mode = #tpu.pipeline_mode<synchronous>, transform_indices = @transform_5, window_bounds = array<i64: 9, 256, 64>}, {pipeline_mode = #tpu.pipeline_mode<synchronous>, transform_indices = @transform_6, window_bounds = array<i64: 16, 72>}, {pipeline_mode = #tpu.pipeline_mode<synchronous>, transform_indices = @transform_7, window_bounds = array<i64: 16, 1>}, {pipeline_mode = #tpu.pipeline_mode<synchronous>, transform_indices = @transform_8, window_bounds = array<i64: 16, 1>}, {pipeline_mode = #tpu.pipeline_mode<synchronous>, transform_indices = @transform_9, window_bounds = array<i64: 16, 1>}, {pipeline_mode = #tpu.pipeline_mode<synchronous>, transform_indices = @transform_10, window_bounds = array<i64: 9, 64, 16>}, {pipeline_mode = #tpu.pipeline_mode<synchronous>, transform_indices = @transform_11, window_bounds = array<i64: 32, 144>}, {pipeline_mode = #tpu.pipeline_mode<synchronous>, transform_indices = @transform_12, window_bounds = array<i64: 32, 1>}, {pipeline_mode = #tpu.pipeline_mode<synchronous>, transform_indices = @transform_13, window_bounds = array<i64: 32, 1>}, {pipeline_mode = #tpu.pipeline_mode<synchronous>, transform_indices = @transform_14, window_bounds = array<i64: 32, 1>}, {pipeline_mode = #tpu.pipeline_mode<synchronous>, transform_indices = @transform_15, window_bounds = array<i64: 9, 16, 4>}, {pipeline_mode = #tpu.pipeline_mode<synchronous>, transform_indices = @transform_16, window_bounds = array<i64: 64, 288>}, {pipeline_mode = #tpu.pipeline_mode<synchronous>, transform_indices = @transform_17, window_bounds = array<i64: 64, 1>}, {pipeline_mode = #tpu.pipeline_mode<synchronous>, transform_indices = @transform_18, window_bounds = array<i64: 64, 1>}, {pipeline_mode = #tpu.pipeline_mode<synchronous>, transform_indices = @transform_19, window_bounds = array<i64: 64, 1>}, {pipeline_mode = #tpu.pipeline_mode<synchronous>, transform_indices = @transform_20, window_bounds = array<i64: 9, 4, 1>}, {pipeline_mode = #tpu.pipeline_mode<synchronous>, transform_indices = @transform_21, window_bounds = array<i64: 64, 576>}, {pipeline_mode = #tpu.pipeline_mode<synchronous>, transform_indices = @transform_22, window_bounds = array<i64: 64, 1>}, {transform_indices = @transform_23, window_bounds = array<i64: 1, 64, 1>}]} {
    %c0 = arith.constant 0 : index
    %c0_0 = arith.constant 0 : index
    %0 = vector.load %arg2[%c0, %c0_0] : memref<8x32xbf16, #tpu.memory_space<vmem>>, vector<8x32xbf16>
    %c0_1 = arith.constant 0 : index
    %c0_2 = arith.constant 0 : index
    %c0_3 = arith.constant 0 : index
    %1 = vector.load %arg1[%c0_1, %c0_2, %c0_3] : memref<1x32x256xbf16, #tpu.memory_space<vmem>>, vector<1x32x256xbf16>
    %2 = vector.shape_cast %1 : vector<1x32x256xbf16> to vector<32x256xbf16>
    %cst = arith.constant dense<0.000000e+00> : vector<8x256xf32>
    %3 = tpu.matmul %0, %2, %cst {dimension_numbers = #tpu.dot_dimension_numbers<[1], [0], [0], [1], [0, 0, 1, 1], [], []>} : vector<8x32xbf16>, vector<32x256xbf16>, vector<8x256xf32> -> vector<8x256xf32>
    %c0_4 = arith.constant 0 : index
    %c0_5 = arith.constant 0 : index
    %4 = vector.load %arg3[%c0_4, %c0_5] : memref<8x1xf32, #tpu.memory_space<vmem>>, vector<8x1xf32>
    %5 = vector.broadcast %4 : vector<8x1xf32> to vector<8x256xf32>
    %6 = arith.addf %3, %5 : vector<8x256xf32>
    %cst_6 = arith.constant 2.000000e-01 : f32
    %7 = vector.broadcast %cst_6 : f32 to vector<8x256xf32>
    %8 = arith.mulf %7, %6 : vector<8x256xf32>
    %9 = arith.maximumf %6, %8 : vector<8x256xf32>
    %cst_7 = arith.constant dense<0.000000e+00> : vector<8xf32>
    %10 = vector.multi_reduction <add>, %9, %cst_7 [1] : vector<8x256xf32> to vector<8xf32>
    %11 = vector.shape_cast %10 : vector<8xf32> to vector<8x1xf32>
    %cst_8 = arith.constant 3.906250e-03 : f32
    %12 = vector.broadcast %cst_8 : f32 to vector<8x1xf32>
    %13 = arith.mulf %11, %12 : vector<8x1xf32>
    %14 = arith.mulf %9, %9 : vector<8x256xf32>
    %cst_9 = arith.constant dense<0.000000e+00> : vector<8xf32>
    %15 = vector.multi_reduction <add>, %14, %cst_9 [1] : vector<8x256xf32> to vector<8xf32>
    %16 = vector.shape_cast %15 : vector<8xf32> to vector<8x1xf32>
    %cst_10 = arith.constant 3.906250e-03 : f32
    %17 = vector.broadcast %cst_10 : f32 to vector<8x1xf32>
    %18 = arith.mulf %16, %17 : vector<8x1xf32>
    %19 = arith.mulf %13, %13 : vector<8x1xf32>
    %20 = arith.subf %18, %19 : vector<8x1xf32>
    %cst_11 = arith.constant 0.000000e+00 : f32
    %21 = vector.broadcast %cst_11 : f32 to vector<8x1xf32>
    %22 = arith.maximumf %20, %21 : vector<8x1xf32>
    %23 = vector.broadcast %13 : vector<8x1xf32> to vector<8x256xf32>
    %24 = arith.subf %9, %23 : vector<8x256xf32>
    %cst_12 = arith.constant 9.99999974E-6 : f32
    %25 = vector.broadcast %cst_12 : f32 to vector<8x1xf32>
    %26 = arith.addf %22, %25 : vector<8x1xf32>
    %27 = math.rsqrt %26 : vector<8x1xf32>
    %28 = vector.broadcast %27 : vector<8x1xf32> to vector<8x256xf32>
    %29 = arith.mulf %24, %28 : vector<8x256xf32>
    %c0_13 = arith.constant 0 : index
    %c0_14 = arith.constant 0 : index
    %30 = vector.load %arg4[%c0_13, %c0_14] : memref<8x1xf32, #tpu.memory_space<vmem>>, vector<8x1xf32>
    %31 = vector.broadcast %30 : vector<8x1xf32> to vector<8x256xf32>
    %32 = arith.mulf %29, %31 : vector<8x256xf32>
    %c0_15 = arith.constant 0 : index
    %c0_16 = arith.constant 0 : index
    %33 = vector.load %arg5[%c0_15, %c0_16] : memref<8x1xf32, #tpu.memory_space<vmem>>, vector<8x1xf32>
    %34 = vector.broadcast %33 : vector<8x1xf32> to vector<8x256xf32>
    %35 = arith.addf %32, %34 : vector<8x256xf32>
    %36 = arith.truncf %35 : vector<8x256xf32> to vector<8x256xbf16>
    %c0_17 = arith.constant 0 : index
    %c0_18 = arith.constant 0 : index
    %c0_19 = arith.constant 0 : index
    %37 = vector.load %arg6[%c0_17, %c0_18, %c0_19] : memref<9x256x64xbf16, #tpu.memory_space<vmem>>, vector<1x256x64xbf16>
    %38 = vector.shape_cast %37 : vector<1x256x64xbf16> to vector<256x64xbf16>
    %cst_20 = arith.constant dense<0.000000e+00> : vector<8x64xf32>
    %39 = tpu.matmul %36, %38, %cst_20 {dimension_numbers = #tpu.dot_dimension_numbers<[1], [0], [0], [1], [0, 0, 1, 1], [], []>} : vector<8x256xbf16>, vector<256x64xbf16>, vector<8x64xf32> -> vector<8x64xf32>
    %c0_21 = arith.constant 0 : index
    %c0_22 = arith.constant 0 : index
    %40 = vector.load %arg25[%c0_21, %c0_22] : memref<72x64xf32, #tpu.memory_space<vmem>>, vector<8x64xf32>
    tpu.vector_store %arg25[%c0_21, %c0_22], %39 {strides = array<i32>} : memref<72x64xf32, #tpu.memory_space<vmem>>, vector<8x64xf32>,
    %c1 = arith.constant 1 : index
    %c0_23 = arith.constant 0 : index
    %c0_24 = arith.constant 0 : index
    %41 = vector.load %arg6[%c1, %c0_23, %c0_24] : memref<9x256x64xbf16, #tpu.memory_space<vmem>>, vector<1x256x64xbf16>
    %42 = vector.shape_cast %41 : vector<1x256x64xbf16> to vector<256x64xbf16>
    %cst_25 = arith.constant dense<0.000000e+00> : vector<8x64xf32>
    %43 = tpu.matmul %36, %42, %cst_25 {dimension_numbers = #tpu.dot_dimension_numbers<[1], [0], [0], [1], [0, 0, 1, 1], [], []>} : vector<8x256xbf16>, vector<256x64xbf16>, vector<8x64xf32> -> vector<8x64xf32>
    %c8 = arith.constant 8 : index
    %c0_26 = arith.constant 0 : index
    %44 = vector.load %arg25[%c8, %c0_26] : memref<72x64xf32, #tpu.memory_space<vmem>>, vector<8x64xf32>
    tpu.vector_store %arg25[%c8, %c0_26], %43 {strides = array<i32>} : memref<72x64xf32, #tpu.memory_space<vmem>>, vector<8x64xf32>,
    %c2 = arith.constant 2 : index
    %c0_27 = arith.constant 0 : index
    %c0_28 = arith.constant 0 : index
    %45 = vector.load %arg6[%c2, %c0_27, %c0_28] : memref<9x256x64xbf16, #tpu.memory_space<vmem>>, vector<1x256x64xbf16>
    %46 = vector.shape_cast %45 : vector<1x256x64xbf16> to vector<256x64xbf16>
    %cst_29 = arith.constant dense<0.000000e+00> : vector<8x64xf32>
    %47 = tpu.matmul %36, %46, %cst_29 {dimension_numbers = #tpu.dot_dimension_numbers<[1], [0], [0], [1], [0, 0, 1, 1], [], []>} : vector<8x256xbf16>, vector<256x64xbf16>, vector<8x64xf32> -> vector<8x64xf32>
    %c16 = arith.constant 16 : index
    %c0_30 = arith.constant 0 : index
    %48 = vector.load %arg25[%c16, %c0_30] : memref<72x64xf32, #tpu.memory_space<vmem>>, vector<8x64xf32>
    tpu.vector_store %arg25[%c16, %c0_30], %47 {strides = array<i32>} : memref<72x64xf32, #tpu.memory_space<vmem>>, vector<8x64xf32>,
    %c3 = arith.constant 3 : index
    %c0_31 = arith.constant 0 : index
    %c0_32 = arith.constant 0 : index
    %49 = vector.load %arg6[%c3, %c0_31, %c0_32] : memref<9x256x64xbf16, #tpu.memory_space<vmem>>, vector<1x256x64xbf16>
    %50 = vector.shape_cast %49 : vector<1x256x64xbf16> to vector<256x64xbf16>
    %cst_33 = arith.constant dense<0.000000e+00> : vector<8x64xf32>
    %51 = tpu.matmul %36, %50, %cst_33 {dimension_numbers = #tpu.dot_dimension_numbers<[1], [0], [0], [1], [0, 0, 1, 1], [], []>} : vector<8x256xbf16>, vector<256x64xbf16>, vector<8x64xf32> -> vector<8x64xf32>
    %c24 = arith.constant 24 : index
    %c0_34 = arith.constant 0 : index
    %52 = vector.load %arg25[%c24, %c0_34] : memref<72x64xf32, #tpu.memory_space<vmem>>, vector<8x64xf32>
    tpu.vector_store %arg25[%c24, %c0_34], %51 {strides = array<i32>} : memref<72x64xf32, #tpu.memory_space<vmem>>, vector<8x64xf32>,
    %c4 = arith.constant 4 : index
    %c0_35 = arith.constant 0 : index
    %c0_36 = arith.constant 0 : index
    %53 = vector.load %arg6[%c4, %c0_35, %c0_36] : memref<9x256x64xbf16, #tpu.memory_space<vmem>>, vector<1x256x64xbf16>
    %54 = vector.shape_cast %53 : vector<1x256x64xbf16> to vector<256x64xbf16>
    %cst_37 = arith.constant dense<0.000000e+00> : vector<8x64xf32>
    %55 = tpu.matmul %36, %54, %cst_37 {dimension_numbers = #tpu.dot_dimension_numbers<[1], [0], [0], [1], [0, 0, 1, 1], [], []>} : vector<8x256xbf16>, vector<256x64xbf16>, vector<8x64xf32> -> vector<8x64xf32>
    %c32 = arith.constant 32 : index
    %c0_38 = arith.constant 0 : index
    %56 = vector.load %arg25[%c32, %c0_38] : memref<72x64xf32, #tpu.memory_space<vmem>>, vector<8x64xf32>
    tpu.vector_store %arg25[%c32, %c0_38], %55 {strides = array<i32>} : memref<72x64xf32, #tpu.memory_space<vmem>>, vector<8x64xf32>,
    %c5 = arith.constant 5 : index
    %c0_39 = arith.constant 0 : index
    %c0_40 = arith.constant 0 : index
    %57 = vector.load %arg6[%c5, %c0_39, %c0_40] : memref<9x256x64xbf16, #tpu.memory_space<vmem>>, vector<1x256x64xbf16>
    %58 = vector.shape_cast %57 : vector<1x256x64xbf16> to vector<256x64xbf16>
    %cst_41 = arith.constant dense<0.000000e+00> : vector<8x64xf32>
    %59 = tpu.matmul %36, %58, %cst_41 {dimension_numbers = #tpu.dot_dimension_numbers<[1], [0], [0], [1], [0, 0, 1, 1], [], []>} : vector<8x256xbf16>, vector<256x64xbf16>, vector<8x64xf32> -> vector<8x64xf32>
    %c40 = arith.constant 40 : index
    %c0_42 = arith.constant 0 : index
    %60 = vector.load %arg25[%c40, %c0_42] : memref<72x64xf32, #tpu.memory_space<vmem>>, vector<8x64xf32>
    tpu.vector_store %arg25[%c40, %c0_42], %59 {strides = array<i32>} : memref<72x64xf32, #tpu.memory_space<vmem>>, vector<8x64xf32>,
    %c6 = arith.constant 6 : index
    %c0_43 = arith.constant 0 : index
    %c0_44 = arith.constant 0 : index
    %61 = vector.load %arg6[%c6, %c0_43, %c0_44] : memref<9x256x64xbf16, #tpu.memory_space<vmem>>, vector<1x256x64xbf16>
    %62 = vector.shape_cast %61 : vector<1x256x64xbf16> to vector<256x64xbf16>
    %cst_45 = arith.constant dense<0.000000e+00> : vector<8x64xf32>
    %63 = tpu.matmul %36, %62, %cst_45 {dimension_numbers = #tpu.dot_dimension_numbers<[1], [0], [0], [1], [0, 0, 1, 1], [], []>} : vector<8x256xbf16>, vector<256x64xbf16>, vector<8x64xf32> -> vector<8x64xf32>
    %c48 = arith.constant 48 : index
    %c0_46 = arith.constant 0 : index
    %64 = vector.load %arg25[%c48, %c0_46] : memref<72x64xf32, #tpu.memory_space<vmem>>, vector<8x64xf32>
    tpu.vector_store %arg25[%c48, %c0_46], %63 {strides = array<i32>} : memref<72x64xf32, #tpu.memory_space<vmem>>, vector<8x64xf32>,
    %c7 = arith.constant 7 : index
    %c0_47 = arith.constant 0 : index
    %c0_48 = arith.constant 0 : index
    %65 = vector.load %arg6[%c7, %c0_47, %c0_48] : memref<9x256x64xbf16, #tpu.memory_space<vmem>>, vector<1x256x64xbf16>
    %66 = vector.shape_cast %65 : vector<1x256x64xbf16> to vector<256x64xbf16>
    %cst_49 = arith.constant dense<0.000000e+00> : vector<8x64xf32>
    %67 = tpu.matmul %36, %66, %cst_49 {dimension_numbers = #tpu.dot_dimension_numbers<[1], [0], [0], [1], [0, 0, 1, 1], [], []>} : vector<8x256xbf16>, vector<256x64xbf16>, vector<8x64xf32> -> vector<8x64xf32>
    %c56 = arith.constant 56 : index
    %c0_50 = arith.constant 0 : index
    %68 = vector.load %arg25[%c56, %c0_50] : memref<72x64xf32, #tpu.memory_space<vmem>>, vector<8x64xf32>
    tpu.vector_store %arg25[%c56, %c0_50], %67 {strides = array<i32>} : memref<72x64xf32, #tpu.memory_space<vmem>>, vector<8x64xf32>,
    %c8_51 = arith.constant 8 : index
    %c0_52 = arith.constant 0 : index
    %c0_53 = arith.constant 0 : index
    %69 = vector.load %arg6[%c8_51, %c0_52, %c0_53] : memref<9x256x64xbf16, #tpu.memory_space<vmem>>, vector<1x256x64xbf16>
    %70 = vector.shape_cast %69 : vector<1x256x64xbf16> to vector<256x64xbf16>
    %cst_54 = arith.constant dense<0.000000e+00> : vector<8x64xf32>
    %71 = tpu.matmul %36, %70, %cst_54 {dimension_numbers = #tpu.dot_dimension_numbers<[1], [0], [0], [1], [0, 0, 1, 1], [], []>} : vector<8x256xbf16>, vector<256x64xbf16>, vector<8x64xf32> -> vector<8x64xf32>
    %c64 = arith.constant 64 : index
    %c0_55 = arith.constant 0 : index
    %72 = vector.load %arg25[%c64, %c0_55] : memref<72x64xf32, #tpu.memory_space<vmem>>, vector<8x64xf32>
    tpu.vector_store %arg25[%c64, %c0_55], %71 {strides = array<i32>} : memref<72x64xf32, #tpu.memory_space<vmem>>, vector<8x64xf32>,
    %c0_56 = arith.constant 0 : index
    %c0_57 = arith.constant 0 : index
    %73 = vector.load %arg7[%c0_56, %c0_57] : memref<16x72xbf16, #tpu.memory_space<vmem>>, vector<16x72xbf16>
    %c0_58 = arith.constant 0 : index
    %c0_59 = arith.constant 0 : index
    %74 = vector.load %arg25[%c0_58, %c0_59] : memref<72x64xf32, #tpu.memory_space<vmem>>, vector<72x64xf32>
    %75 = arith.truncf %74 : vector<72x64xf32> to vector<72x64xbf16>
    %cst_60 = arith.constant dense<0.000000e+00> : vector<16x64xf32>
    %76 = tpu.matmul %73, %75, %cst_60 {dimension_numbers = #tpu.dot_dimension_numbers<[1], [0], [0], [1], [0, 0, 1, 1], [], []>} : vector<16x72xbf16>, vector<72x64xbf16>, vector<16x64xf32> -> vector<16x64xf32>
    %c0_61 = arith.constant 0 : index
    %c0_62 = arith.constant 0 : index
    %77 = vector.load %arg8[%c0_61, %c0_62] : memref<16x1xf32, #tpu.memory_space<vmem>>, vector<16x1xf32>
    %78 = vector.broadcast %77 : vector<16x1xf32> to vector<16x64xf32>
    %79 = arith.addf %76, %78 : vector<16x64xf32>
    %cst_63 = arith.constant 2.000000e-01 : f32
    %80 = vector.broadcast %cst_63 : f32 to vector<16x64xf32>
    %81 = arith.mulf %80, %79 : vector<16x64xf32>
    %82 = arith.maximumf %79, %81 : vector<16x64xf32>
    %cst_64 = arith.constant dense<0.000000e+00> : vector<16xf32>
    %83 = vector.multi_reduction <add>, %82, %cst_64 [1] : vector<16x64xf32> to vector<16xf32>
    %84 = vector.shape_cast %83 : vector<16xf32> to vector<16x1xf32>
    %cst_65 = arith.constant 1.562500e-02 : f32
    %85 = vector.broadcast %cst_65 : f32 to vector<16x1xf32>
    %86 = arith.mulf %84, %85 : vector<16x1xf32>
    %87 = arith.mulf %82, %82 : vector<16x64xf32>
    %cst_66 = arith.constant dense<0.000000e+00> : vector<16xf32>
    %88 = vector.multi_reduction <add>, %87, %cst_66 [1] : vector<16x64xf32> to vector<16xf32>
    %89 = vector.shape_cast %88 : vector<16xf32> to vector<16x1xf32>
    %cst_67 = arith.constant 1.562500e-02 : f32
    %90 = vector.broadcast %cst_67 : f32 to vector<16x1xf32>
    %91 = arith.mulf %89, %90 : vector<16x1xf32>
    %92 = arith.mulf %86, %86 : vector<16x1xf32>
    %93 = arith.subf %91, %92 : vector<16x1xf32>
    %cst_68 = arith.constant 0.000000e+00 : f32
    %94 = vector.broadcast %cst_68 : f32 to vector<16x1xf32>
    %95 = arith.maximumf %93, %94 : vector<16x1xf32>
    %96 = vector.broadcast %86 : vector<16x1xf32> to vector<16x64xf32>
    %97 = arith.subf %82, %96 : vector<16x64xf32>
    %cst_69 = arith.constant 9.99999974E-6 : f32
    %98 = vector.broadcast %cst_69 : f32 to vector<16x1xf32>
    %99 = arith.addf %95, %98 : vector<16x1xf32>
    %100 = math.rsqrt %99 : vector<16x1xf32>
    %101 = vector.broadcast %100 : vector<16x1xf32> to vector<16x64xf32>
    %102 = arith.mulf %97, %101 : vector<16x64xf32>
    %c0_70 = arith.constant 0 : index
    %c0_71 = arith.constant 0 : index
    %103 = vector.load %arg9[%c0_70, %c0_71] : memref<16x1xf32, #tpu.memory_space<vmem>>, vector<16x1xf32>
    %104 = vector.broadcast %103 : vector<16x1xf32> to vector<16x64xf32>
    %105 = arith.mulf %102, %104 : vector<16x64xf32>
    %c0_72 = arith.constant 0 : index
    %c0_73 = arith.constant 0 : index
    %106 = vector.load %arg10[%c0_72, %c0_73] : memref<16x1xf32, #tpu.memory_space<vmem>>, vector<16x1xf32>
    %107 = vector.broadcast %106 : vector<16x1xf32> to vector<16x64xf32>
    %108 = arith.addf %105, %107 : vector<16x64xf32>
    %109 = arith.truncf %108 : vector<16x64xf32> to vector<16x64xbf16>
    %c0_74 = arith.constant 0 : index
    %c0_75 = arith.constant 0 : index
    %c0_76 = arith.constant 0 : index
    %110 = vector.load %arg11[%c0_74, %c0_75, %c0_76] : memref<9x64x16xbf16, #tpu.memory_space<vmem>>, vector<1x64x16xbf16>
    %111 = vector.shape_cast %110 : vector<1x64x16xbf16> to vector<64x16xbf16>
    %cst_77 = arith.constant dense<0.000000e+00> : vector<16x16xf32>
    %112 = tpu.matmul %109, %111, %cst_77 {dimension_numbers = #tpu.dot_dimension_numbers<[1], [0], [0], [1], [0, 0, 1, 1], [], []>} : vector<16x64xbf16>, vector<64x16xbf16>, vector<16x16xf32> -> vector<16x16xf32>
    %c0_78 = arith.constant 0 : index
    %c0_79 = arith.constant 0 : index
    %113 = vector.load %arg26[%c0_78, %c0_79] : memref<144x16xf32, #tpu.memory_space<vmem>>, vector<16x16xf32>
    tpu.vector_store %arg26[%c0_78, %c0_79], %112 {strides = array<i32>} : memref<144x16xf32, #tpu.memory_space<vmem>>, vector<16x16xf32>,
    %c1_80 = arith.constant 1 : index
    %c0_81 = arith.constant 0 : index
    %c0_82 = arith.constant 0 : index
    %114 = vector.load %arg11[%c1_80, %c0_81, %c0_82] : memref<9x64x16xbf16, #tpu.memory_space<vmem>>, vector<1x64x16xbf16>
    %115 = vector.shape_cast %114 : vector<1x64x16xbf16> to vector<64x16xbf16>
    %cst_83 = arith.constant dense<0.000000e+00> : vector<16x16xf32>
    %116 = tpu.matmul %109, %115, %cst_83 {dimension_numbers = #tpu.dot_dimension_numbers<[1], [0], [0], [1], [0, 0, 1, 1], [], []>} : vector<16x64xbf16>, vector<64x16xbf16>, vector<16x16xf32> -> vector<16x16xf32>
    %c16_84 = arith.constant 16 : index
    %c0_85 = arith.constant 0 : index
    %117 = vector.load %arg26[%c16_84, %c0_85] : memref<144x16xf32, #tpu.memory_space<vmem>>, vector<16x16xf32>
    tpu.vector_store %arg26[%c16_84, %c0_85], %116 {strides = array<i32>} : memref<144x16xf32, #tpu.memory_space<vmem>>, vector<16x16xf32>,
    %c2_86 = arith.constant 2 : index
    %c0_87 = arith.constant 0 : index
    %c0_88 = arith.constant 0 : index
    %118 = vector.load %arg11[%c2_86, %c0_87, %c0_88] : memref<9x64x16xbf16, #tpu.memory_space<vmem>>, vector<1x64x16xbf16>
    %119 = vector.shape_cast %118 : vector<1x64x16xbf16> to vector<64x16xbf16>
    %cst_89 = arith.constant dense<0.000000e+00> : vector<16x16xf32>
    %120 = tpu.matmul %109, %119, %cst_89 {dimension_numbers = #tpu.dot_dimension_numbers<[1], [0], [0], [1], [0, 0, 1, 1], [], []>} : vector<16x64xbf16>, vector<64x16xbf16>, vector<16x16xf32> -> vector<16x16xf32>
    %c32_90 = arith.constant 32 : index
    %c0_91 = arith.constant 0 : index
    %121 = vector.load %arg26[%c32_90, %c0_91] : memref<144x16xf32, #tpu.memory_space<vmem>>, vector<16x16xf32>
    tpu.vector_store %arg26[%c32_90, %c0_91], %120 {strides = array<i32>} : memref<144x16xf32, #tpu.memory_space<vmem>>, vector<16x16xf32>,
    %c3_92 = arith.constant 3 : index
    %c0_93 = arith.constant 0 : index
    %c0_94 = arith.constant 0 : index
    %122 = vector.load %arg11[%c3_92, %c0_93, %c0_94] : memref<9x64x16xbf16, #tpu.memory_space<vmem>>, vector<1x64x16xbf16>
    %123 = vector.shape_cast %122 : vector<1x64x16xbf16> to vector<64x16xbf16>
    %cst_95 = arith.constant dense<0.000000e+00> : vector<16x16xf32>
    %124 = tpu.matmul %109, %123, %cst_95 {dimension_numbers = #tpu.dot_dimension_numbers<[1], [0], [0], [1], [0, 0, 1, 1], [], []>} : vector<16x64xbf16>, vector<64x16xbf16>, vector<16x16xf32> -> vector<16x16xf32>
    %c48_96 = arith.constant 48 : index
    %c0_97 = arith.constant 0 : index
    %125 = vector.load %arg26[%c48_96, %c0_97] : memref<144x16xf32, #tpu.memory_space<vmem>>, vector<16x16xf32>
    tpu.vector_store %arg26[%c48_96, %c0_97], %124 {strides = array<i32>} : memref<144x16xf32, #tpu.memory_space<vmem>>, vector<16x16xf32>,
    %c4_98 = arith.constant 4 : index
    %c0_99 = arith.constant 0 : index
    %c0_100 = arith.constant 0 : index
    %126 = vector.load %arg11[%c4_98, %c0_99, %c0_100] : memref<9x64x16xbf16, #tpu.memory_space<vmem>>, vector<1x64x16xbf16>
    %127 = vector.shape_cast %126 : vector<1x64x16xbf16> to vector<64x16xbf16>
    %cst_101 = arith.constant dense<0.000000e+00> : vector<16x16xf32>
    %128 = tpu.matmul %109, %127, %cst_101 {dimension_numbers = #tpu.dot_dimension_numbers<[1], [0], [0], [1], [0, 0, 1, 1], [], []>} : vector<16x64xbf16>, vector<64x16xbf16>, vector<16x16xf32> -> vector<16x16xf32>
    %c64_102 = arith.constant 64 : index
    %c0_103 = arith.constant 0 : index
    %129 = vector.load %arg26[%c64_102, %c0_103] : memref<144x16xf32, #tpu.memory_space<vmem>>, vector<16x16xf32>
    tpu.vector_store %arg26[%c64_102, %c0_103], %128 {strides = array<i32>} : memref<144x16xf32, #tpu.memory_space<vmem>>, vector<16x16xf32>,
    %c5_104 = arith.constant 5 : index
    %c0_105 = arith.constant 0 : index
    %c0_106 = arith.constant 0 : index
    %130 = vector.load %arg11[%c5_104, %c0_105, %c0_106] : memref<9x64x16xbf16, #tpu.memory_space<vmem>>, vector<1x64x16xbf16>
    %131 = vector.shape_cast %130 : vector<1x64x16xbf16> to vector<64x16xbf16>
    %cst_107 = arith.constant dense<0.000000e+00> : vector<16x16xf32>
    %132 = tpu.matmul %109, %131, %cst_107 {dimension_numbers = #tpu.dot_dimension_numbers<[1], [0], [0], [1], [0, 0, 1, 1], [], []>} : vector<16x64xbf16>, vector<64x16xbf16>, vector<16x16xf32> -> vector<16x16xf32>
    %c80 = arith.constant 80 : index
    %c0_108 = arith.constant 0 : index
    %133 = vector.load %arg26[%c80, %c0_108] : memref<144x16xf32, #tpu.memory_space<vmem>>, vector<16x16xf32>
    tpu.vector_store %arg26[%c80, %c0_108], %132 {strides = array<i32>} : memref<144x16xf32, #tpu.memory_space<vmem>>, vector<16x16xf32>,
    %c6_109 = arith.constant 6 : index
    %c0_110 = arith.constant 0 : index
    %c0_111 = arith.constant 0 : index
    %134 = vector.load %arg11[%c6_109, %c0_110, %c0_111] : memref<9x64x16xbf16, #tpu.memory_space<vmem>>, vector<1x64x16xbf16>
    %135 = vector.shape_cast %134 : vector<1x64x16xbf16> to vector<64x16xbf16>
    %cst_112 = arith.constant dense<0.000000e+00> : vector<16x16xf32>
    %136 = tpu.matmul %109, %135, %cst_112 {dimension_numbers = #tpu.dot_dimension_numbers<[1], [0], [0], [1], [0, 0, 1, 1], [], []>} : vector<16x64xbf16>, vector<64x16xbf16>, vector<16x16xf32> -> vector<16x16xf32>
    %c96 = arith.constant 96 : index
    %c0_113 = arith.constant 0 : index
    %137 = vector.load %arg26[%c96, %c0_113] : memref<144x16xf32, #tpu.memory_space<vmem>>, vector<16x16xf32>
    tpu.vector_store %arg26[%c96, %c0_113], %136 {strides = array<i32>} : memref<144x16xf32, #tpu.memory_space<vmem>>, vector<16x16xf32>,
    %c7_114 = arith.constant 7 : index
    %c0_115 = arith.constant 0 : index
    %c0_116 = arith.constant 0 : index
    %138 = vector.load %arg11[%c7_114, %c0_115, %c0_116] : memref<9x64x16xbf16, #tpu.memory_space<vmem>>, vector<1x64x16xbf16>
    %139 = vector.shape_cast %138 : vector<1x64x16xbf16> to vector<64x16xbf16>
    %cst_117 = arith.constant dense<0.000000e+00> : vector<16x16xf32>
    %140 = tpu.matmul %109, %139, %cst_117 {dimension_numbers = #tpu.dot_dimension_numbers<[1], [0], [0], [1], [0, 0, 1, 1], [], []>} : vector<16x64xbf16>, vector<64x16xbf16>, vector<16x16xf32> -> vector<16x16xf32>
    %c112 = arith.constant 112 : index
    %c0_118 = arith.constant 0 : index
    %141 = vector.load %arg26[%c112, %c0_118] : memref<144x16xf32, #tpu.memory_space<vmem>>, vector<16x16xf32>
    tpu.vector_store %arg26[%c112, %c0_118], %140 {strides = array<i32>} : memref<144x16xf32, #tpu.memory_space<vmem>>, vector<16x16xf32>,
    %c8_119 = arith.constant 8 : index
    %c0_120 = arith.constant 0 : index
    %c0_121 = arith.constant 0 : index
    %142 = vector.load %arg11[%c8_119, %c0_120, %c0_121] : memref<9x64x16xbf16, #tpu.memory_space<vmem>>, vector<1x64x16xbf16>
    %143 = vector.shape_cast %142 : vector<1x64x16xbf16> to vector<64x16xbf16>
    %cst_122 = arith.constant dense<0.000000e+00> : vector<16x16xf32>
    %144 = tpu.matmul %109, %143, %cst_122 {dimension_numbers = #tpu.dot_dimension_numbers<[1], [0], [0], [1], [0, 0, 1, 1], [], []>} : vector<16x64xbf16>, vector<64x16xbf16>, vector<16x16xf32> -> vector<16x16xf32>
    %c128 = arith.constant 128 : index
    %c0_123 = arith.constant 0 : index
    %145 = vector.load %arg26[%c128, %c0_123] : memref<144x16xf32, #tpu.memory_space<vmem>>, vector<16x16xf32>
    tpu.vector_store %arg26[%c128, %c0_123], %144 {strides = array<i32>} : memref<144x16xf32, #tpu.memory_space<vmem>>, vector<16x16xf32>,
    %c0_124 = arith.constant 0 : index
    %c0_125 = arith.constant 0 : index
    %146 = vector.load %arg12[%c0_124, %c0_125] : memref<32x144xbf16, #tpu.memory_space<vmem>>, vector<32x144xbf16>
    %c0_126 = arith.constant 0 : index
    %c0_127 = arith.constant 0 : index
    %147 = vector.load %arg26[%c0_126, %c0_127] : memref<144x16xf32, #tpu.memory_space<vmem>>, vector<144x16xf32>
    %148 = arith.truncf %147 : vector<144x16xf32> to vector<144x16xbf16>
    %cst_128 = arith.constant dense<0.000000e+00> : vector<32x16xf32>
    %149 = tpu.matmul %146, %148, %cst_128 {dimension_numbers = #tpu.dot_dimension_numbers<[1], [0], [0], [1], [0, 0, 1, 1], [], []>} : vector<32x144xbf16>, vector<144x16xbf16>, vector<32x16xf32> -> vector<32x16xf32>
    %c0_129 = arith.constant 0 : index
    %c0_130 = arith.constant 0 : index
    %150 = vector.load %arg13[%c0_129, %c0_130] : memref<32x1xf32, #tpu.memory_space<vmem>>, vector<32x1xf32>
    %151 = vector.broadcast %150 : vector<32x1xf32> to vector<32x16xf32>
    %152 = arith.addf %149, %151 : vector<32x16xf32>
    %cst_131 = arith.constant 2.000000e-01 : f32
    %153 = vector.broadcast %cst_131 : f32 to vector<32x16xf32>
    %154 = arith.mulf %153, %152 : vector<32x16xf32>
    %155 = arith.maximumf %152, %154 : vector<32x16xf32>
    %cst_132 = arith.constant dense<0.000000e+00> : vector<32xf32>
    %156 = vector.multi_reduction <add>, %155, %cst_132 [1] : vector<32x16xf32> to vector<32xf32>
    %157 = vector.shape_cast %156 : vector<32xf32> to vector<32x1xf32>
    %cst_133 = arith.constant 6.250000e-02 : f32
    %158 = vector.broadcast %cst_133 : f32 to vector<32x1xf32>
    %159 = arith.mulf %157, %158 : vector<32x1xf32>
    %160 = arith.mulf %155, %155 : vector<32x16xf32>
    %cst_134 = arith.constant dense<0.000000e+00> : vector<32xf32>
    %161 = vector.multi_reduction <add>, %160, %cst_134 [1] : vector<32x16xf32> to vector<32xf32>
    %162 = vector.shape_cast %161 : vector<32xf32> to vector<32x1xf32>
    %cst_135 = arith.constant 6.250000e-02 : f32
    %163 = vector.broadcast %cst_135 : f32 to vector<32x1xf32>
    %164 = arith.mulf %162, %163 : vector<32x1xf32>
    %165 = arith.mulf %159, %159 : vector<32x1xf32>
    %166 = arith.subf %164, %165 : vector<32x1xf32>
    %cst_136 = arith.constant 0.000000e+00 : f32
    %167 = vector.broadcast %cst_136 : f32 to vector<32x1xf32>
    %168 = arith.maximumf %166, %167 : vector<32x1xf32>
    %169 = vector.broadcast %159 : vector<32x1xf32> to vector<32x16xf32>
    %170 = arith.subf %155, %169 : vector<32x16xf32>
    %cst_137 = arith.constant 9.99999974E-6 : f32
    %171 = vector.broadcast %cst_137 : f32 to vector<32x1xf32>
    %172 = arith.addf %168, %171 : vector<32x1xf32>
    %173 = math.rsqrt %172 : vector<32x1xf32>
    %174 = vector.broadcast %173 : vector<32x1xf32> to vector<32x16xf32>
    %175 = arith.mulf %170, %174 : vector<32x16xf32>
    %c0_138 = arith.constant 0 : index
    %c0_139 = arith.constant 0 : index
    %176 = vector.load %arg14[%c0_138, %c0_139] : memref<32x1xf32, #tpu.memory_space<vmem>>, vector<32x1xf32>
    %177 = vector.broadcast %176 : vector<32x1xf32> to vector<32x16xf32>
    %178 = arith.mulf %175, %177 : vector<32x16xf32>
    %c0_140 = arith.constant 0 : index
    %c0_141 = arith.constant 0 : index
    %179 = vector.load %arg15[%c0_140, %c0_141] : memref<32x1xf32, #tpu.memory_space<vmem>>, vector<32x1xf32>
    %180 = vector.broadcast %179 : vector<32x1xf32> to vector<32x16xf32>
    %181 = arith.addf %178, %180 : vector<32x16xf32>
    %182 = arith.truncf %181 : vector<32x16xf32> to vector<32x16xbf16>
    %c0_142 = arith.constant 0 : index
    %c0_143 = arith.constant 0 : index
    %c0_144 = arith.constant 0 : index
    %183 = vector.load %arg16[%c0_142, %c0_143, %c0_144] : memref<9x16x4xbf16, #tpu.memory_space<vmem>>, vector<1x16x4xbf16>
    %184 = vector.shape_cast %183 : vector<1x16x4xbf16> to vector<16x4xbf16>
    %cst_145 = arith.constant dense<0.000000e+00> : vector<32x4xf32>
    %185 = tpu.matmul %182, %184, %cst_145 {dimension_numbers = #tpu.dot_dimension_numbers<[1], [0], [0], [1], [0, 0, 1, 1], [], []>} : vector<32x16xbf16>, vector<16x4xbf16>, vector<32x4xf32> -> vector<32x4xf32>
    %c0_146 = arith.constant 0 : index
    %c0_147 = arith.constant 0 : index
    %186 = vector.load %arg27[%c0_146, %c0_147] : memref<288x4xf32, #tpu.memory_space<vmem>>, vector<32x4xf32>
    tpu.vector_store %arg27[%c0_146, %c0_147], %185 {strides = array<i32>} : memref<288x4xf32, #tpu.memory_space<vmem>>, vector<32x4xf32>,
    %c1_148 = arith.constant 1 : index
    %c0_149 = arith.constant 0 : index
    %c0_150 = arith.constant 0 : index
    %187 = vector.load %arg16[%c1_148, %c0_149, %c0_150] : memref<9x16x4xbf16, #tpu.memory_space<vmem>>, vector<1x16x4xbf16>
    %188 = vector.shape_cast %187 : vector<1x16x4xbf16> to vector<16x4xbf16>
    %cst_151 = arith.constant dense<0.000000e+00> : vector<32x4xf32>
    %189 = tpu.matmul %182, %188, %cst_151 {dimension_numbers = #tpu.dot_dimension_numbers<[1], [0], [0], [1], [0, 0, 1, 1], [], []>} : vector<32x16xbf16>, vector<16x4xbf16>, vector<32x4xf32> -> vector<32x4xf32>
    %c32_152 = arith.constant 32 : index
    %c0_153 = arith.constant 0 : index
    %190 = vector.load %arg27[%c32_152, %c0_153] : memref<288x4xf32, #tpu.memory_space<vmem>>, vector<32x4xf32>
    tpu.vector_store %arg27[%c32_152, %c0_153], %189 {strides = array<i32>} : memref<288x4xf32, #tpu.memory_space<vmem>>, vector<32x4xf32>,
    %c2_154 = arith.constant 2 : index
    %c0_155 = arith.constant 0 : index
    %c0_156 = arith.constant 0 : index
    %191 = vector.load %arg16[%c2_154, %c0_155, %c0_156] : memref<9x16x4xbf16, #tpu.memory_space<vmem>>, vector<1x16x4xbf16>
    %192 = vector.shape_cast %191 : vector<1x16x4xbf16> to vector<16x4xbf16>
    %cst_157 = arith.constant dense<0.000000e+00> : vector<32x4xf32>
    %193 = tpu.matmul %182, %192, %cst_157 {dimension_numbers = #tpu.dot_dimension_numbers<[1], [0], [0], [1], [0, 0, 1, 1], [], []>} : vector<32x16xbf16>, vector<16x4xbf16>, vector<32x4xf32> -> vector<32x4xf32>
    %c64_158 = arith.constant 64 : index
    %c0_159 = arith.constant 0 : index
    %194 = vector.load %arg27[%c64_158, %c0_159] : memref<288x4xf32, #tpu.memory_space<vmem>>, vector<32x4xf32>
    tpu.vector_store %arg27[%c64_158, %c0_159], %193 {strides = array<i32>} : memref<288x4xf32, #tpu.memory_space<vmem>>, vector<32x4xf32>,
    %c3_160 = arith.constant 3 : index
    %c0_161 = arith.constant 0 : index
    %c0_162 = arith.constant 0 : index
    %195 = vector.load %arg16[%c3_160, %c0_161, %c0_162] : memref<9x16x4xbf16, #tpu.memory_space<vmem>>, vector<1x16x4xbf16>
    %196 = vector.shape_cast %195 : vector<1x16x4xbf16> to vector<16x4xbf16>
    %cst_163 = arith.constant dense<0.000000e+00> : vector<32x4xf32>
    %197 = tpu.matmul %182, %196, %cst_163 {dimension_numbers = #tpu.dot_dimension_numbers<[1], [0], [0], [1], [0, 0, 1, 1], [], []>} : vector<32x16xbf16>, vector<16x4xbf16>, vector<32x4xf32> -> vector<32x4xf32>
    %c96_164 = arith.constant 96 : index
    %c0_165 = arith.constant 0 : index
    %198 = vector.load %arg27[%c96_164, %c0_165] : memref<288x4xf32, #tpu.memory_space<vmem>>, vector<32x4xf32>
    tpu.vector_store %arg27[%c96_164, %c0_165], %197 {strides = array<i32>} : memref<288x4xf32, #tpu.memory_space<vmem>>, vector<32x4xf32>,
    %c4_166 = arith.constant 4 : index
    %c0_167 = arith.constant 0 : index
    %c0_168 = arith.constant 0 : index
    %199 = vector.load %arg16[%c4_166, %c0_167, %c0_168] : memref<9x16x4xbf16, #tpu.memory_space<vmem>>, vector<1x16x4xbf16>
    %200 = vector.shape_cast %199 : vector<1x16x4xbf16> to vector<16x4xbf16>
    %cst_169 = arith.constant dense<0.000000e+00> : vector<32x4xf32>
    %201 = tpu.matmul %182, %200, %cst_169 {dimension_numbers = #tpu.dot_dimension_numbers<[1], [0], [0], [1], [0, 0, 1, 1], [], []>} : vector<32x16xbf16>, vector<16x4xbf16>, vector<32x4xf32> -> vector<32x4xf32>
    %c128_170 = arith.constant 128 : index
    %c0_171 = arith.constant 0 : index
    %202 = vector.load %arg27[%c128_170, %c0_171] : memref<288x4xf32, #tpu.memory_space<vmem>>, vector<32x4xf32>
    tpu.vector_store %arg27[%c128_170, %c0_171], %201 {strides = array<i32>} : memref<288x4xf32, #tpu.memory_space<vmem>>, vector<32x4xf32>,
    %c5_172 = arith.constant 5 : index
    %c0_173 = arith.constant 0 : index
    %c0_174 = arith.constant 0 : index
    %203 = vector.load %arg16[%c5_172, %c0_173, %c0_174] : memref<9x16x4xbf16, #tpu.memory_space<vmem>>, vector<1x16x4xbf16>
    %204 = vector.shape_cast %203 : vector<1x16x4xbf16> to vector<16x4xbf16>
    %cst_175 = arith.constant dense<0.000000e+00> : vector<32x4xf32>
    %205 = tpu.matmul %182, %204, %cst_175 {dimension_numbers = #tpu.dot_dimension_numbers<[1], [0], [0], [1], [0, 0, 1, 1], [], []>} : vector<32x16xbf16>, vector<16x4xbf16>, vector<32x4xf32> -> vector<32x4xf32>
    %c160 = arith.constant 160 : index
    %c0_176 = arith.constant 0 : index
    %206 = vector.load %arg27[%c160, %c0_176] : memref<288x4xf32, #tpu.memory_space<vmem>>, vector<32x4xf32>
    tpu.vector_store %arg27[%c160, %c0_176], %205 {strides = array<i32>} : memref<288x4xf32, #tpu.memory_space<vmem>>, vector<32x4xf32>,
    %c6_177 = arith.constant 6 : index
    %c0_178 = arith.constant 0 : index
    %c0_179 = arith.constant 0 : index
    %207 = vector.load %arg16[%c6_177, %c0_178, %c0_179] : memref<9x16x4xbf16, #tpu.memory_space<vmem>>, vector<1x16x4xbf16>
    %208 = vector.shape_cast %207 : vector<1x16x4xbf16> to vector<16x4xbf16>
    %cst_180 = arith.constant dense<0.000000e+00> : vector<32x4xf32>
    %209 = tpu.matmul %182, %208, %cst_180 {dimension_numbers = #tpu.dot_dimension_numbers<[1], [0], [0], [1], [0, 0, 1, 1], [], []>} : vector<32x16xbf16>, vector<16x4xbf16>, vector<32x4xf32> -> vector<32x4xf32>
    %c192 = arith.constant 192 : index
    %c0_181 = arith.constant 0 : index
    %210 = vector.load %arg27[%c192, %c0_181] : memref<288x4xf32, #tpu.memory_space<vmem>>, vector<32x4xf32>
    tpu.vector_store %arg27[%c192, %c0_181], %209 {strides = array<i32>} : memref<288x4xf32, #tpu.memory_space<vmem>>, vector<32x4xf32>,
    %c7_182 = arith.constant 7 : index
    %c0_183 = arith.constant 0 : index
    %c0_184 = arith.constant 0 : index
    %211 = vector.load %arg16[%c7_182, %c0_183, %c0_184] : memref<9x16x4xbf16, #tpu.memory_space<vmem>>, vector<1x16x4xbf16>
    %212 = vector.shape_cast %211 : vector<1x16x4xbf16> to vector<16x4xbf16>
    %cst_185 = arith.constant dense<0.000000e+00> : vector<32x4xf32>
    %213 = tpu.matmul %182, %212, %cst_185 {dimension_numbers = #tpu.dot_dimension_numbers<[1], [0], [0], [1], [0, 0, 1, 1], [], []>} : vector<32x16xbf16>, vector<16x4xbf16>, vector<32x4xf32> -> vector<32x4xf32>
    %c224 = arith.constant 224 : index
    %c0_186 = arith.constant 0 : index
    %214 = vector.load %arg27[%c224, %c0_186] : memref<288x4xf32, #tpu.memory_space<vmem>>, vector<32x4xf32>
    tpu.vector_store %arg27[%c224, %c0_186], %213 {strides = array<i32>} : memref<288x4xf32, #tpu.memory_space<vmem>>, vector<32x4xf32>,
    %c8_187 = arith.constant 8 : index
    %c0_188 = arith.constant 0 : index
    %c0_189 = arith.constant 0 : index
    %215 = vector.load %arg16[%c8_187, %c0_188, %c0_189] : memref<9x16x4xbf16, #tpu.memory_space<vmem>>, vector<1x16x4xbf16>
    %216 = vector.shape_cast %215 : vector<1x16x4xbf16> to vector<16x4xbf16>
    %cst_190 = arith.constant dense<0.000000e+00> : vector<32x4xf32>
    %217 = tpu.matmul %182, %216, %cst_190 {dimension_numbers = #tpu.dot_dimension_numbers<[1], [0], [0], [1], [0, 0, 1, 1], [], []>} : vector<32x16xbf16>, vector<16x4xbf16>, vector<32x4xf32> -> vector<32x4xf32>
    %c256 = arith.constant 256 : index
    %c0_191 = arith.constant 0 : index
    %218 = vector.load %arg27[%c256, %c0_191] : memref<288x4xf32, #tpu.memory_space<vmem>>, vector<32x4xf32>
    tpu.vector_store %arg27[%c256, %c0_191], %217 {strides = array<i32>} : memref<288x4xf32, #tpu.memory_space<vmem>>, vector<32x4xf32>,
    %c0_192 = arith.constant 0 : index
    %c0_193 = arith.constant 0 : index
    %219 = vector.load %arg17[%c0_192, %c0_193] : memref<64x288xbf16, #tpu.memory_space<vmem>>, vector<64x288xbf16>
    %c0_194 = arith.constant 0 : index
    %c0_195 = arith.constant 0 : index
    %220 = vector.load %arg27[%c0_194, %c0_195] : memref<288x4xf32, #tpu.memory_space<vmem>>, vector<288x4xf32>
    %221 = arith.truncf %220 : vector<288x4xf32> to vector<288x4xbf16>
    %cst_196 = arith.constant dense<0.000000e+00> : vector<64x4xf32>
    %222 = tpu.matmul %219, %221, %cst_196 {dimension_numbers = #tpu.dot_dimension_numbers<[1], [0], [0], [1], [0, 0, 1, 1], [], []>} : vector<64x288xbf16>, vector<288x4xbf16>, vector<64x4xf32> -> vector<64x4xf32>
    %c0_197 = arith.constant 0 : index
    %c0_198 = arith.constant 0 : index
    %223 = vector.load %arg18[%c0_197, %c0_198] : memref<64x1xf32, #tpu.memory_space<vmem>>, vector<64x1xf32>
    %224 = vector.broadcast %223 : vector<64x1xf32> to vector<64x4xf32>
    %225 = arith.addf %222, %224 : vector<64x4xf32>
    %cst_199 = arith.constant 2.000000e-01 : f32
    %226 = vector.broadcast %cst_199 : f32 to vector<64x4xf32>
    %227 = arith.mulf %226, %225 : vector<64x4xf32>
    %228 = arith.maximumf %225, %227 : vector<64x4xf32>
    %cst_200 = arith.constant dense<0.000000e+00> : vector<64xf32>
    %229 = vector.multi_reduction <add>, %228, %cst_200 [1] : vector<64x4xf32> to vector<64xf32>
    %230 = vector.shape_cast %229 : vector<64xf32> to vector<64x1xf32>
    %cst_201 = arith.constant 2.500000e-01 : f32
    %231 = vector.broadcast %cst_201 : f32 to vector<64x1xf32>
    %232 = arith.mulf %230, %231 : vector<64x1xf32>
    %233 = arith.mulf %228, %228 : vector<64x4xf32>
    %cst_202 = arith.constant dense<0.000000e+00> : vector<64xf32>
    %234 = vector.multi_reduction <add>, %233, %cst_202 [1] : vector<64x4xf32> to vector<64xf32>
    %235 = vector.shape_cast %234 : vector<64xf32> to vector<64x1xf32>
    %cst_203 = arith.constant 2.500000e-01 : f32
    %236 = vector.broadcast %cst_203 : f32 to vector<64x1xf32>
    %237 = arith.mulf %235, %236 : vector<64x1xf32>
    %238 = arith.mulf %232, %232 : vector<64x1xf32>
    %239 = arith.subf %237, %238 : vector<64x1xf32>
    %cst_204 = arith.constant 0.000000e+00 : f32
    %240 = vector.broadcast %cst_204 : f32 to vector<64x1xf32>
    %241 = arith.maximumf %239, %240 : vector<64x1xf32>
    %242 = vector.broadcast %232 : vector<64x1xf32> to vector<64x4xf32>
    %243 = arith.subf %228, %242 : vector<64x4xf32>
    %cst_205 = arith.constant 9.99999974E-6 : f32
    %244 = vector.broadcast %cst_205 : f32 to vector<64x1xf32>
    %245 = arith.addf %241, %244 : vector<64x1xf32>
    %246 = math.rsqrt %245 : vector<64x1xf32>
    %247 = vector.broadcast %246 : vector<64x1xf32> to vector<64x4xf32>
    %248 = arith.mulf %243, %247 : vector<64x4xf32>
    %c0_206 = arith.constant 0 : index
    %c0_207 = arith.constant 0 : index
    %249 = vector.load %arg19[%c0_206, %c0_207] : memref<64x1xf32, #tpu.memory_space<vmem>>, vector<64x1xf32>
    %250 = vector.broadcast %249 : vector<64x1xf32> to vector<64x4xf32>
    %251 = arith.mulf %248, %250 : vector<64x4xf32>
    %c0_208 = arith.constant 0 : index
    %c0_209 = arith.constant 0 : index
    %252 = vector.load %arg20[%c0_208, %c0_209] : memref<64x1xf32, #tpu.memory_space<vmem>>, vector<64x1xf32>
    %253 = vector.broadcast %252 : vector<64x1xf32> to vector<64x4xf32>
    %254 = arith.addf %251, %253 : vector<64x4xf32>
    %255 = arith.truncf %254 : vector<64x4xf32> to vector<64x4xbf16>
    %c0_210 = arith.constant 0 : index
    %c0_211 = arith.constant 0 : index
    %c0_212 = arith.constant 0 : index
    %256 = vector.load %arg21[%c0_210, %c0_211, %c0_212] : memref<9x4x1xbf16, #tpu.memory_space<vmem>>, vector<1x4x1xbf16>
    %257 = vector.shape_cast %256 : vector<1x4x1xbf16> to vector<4x1xbf16>
    %cst_213 = arith.constant dense<0.000000e+00> : vector<64x1xf32>
    %258 = tpu.matmul %255, %257, %cst_213 {dimension_numbers = #tpu.dot_dimension_numbers<[1], [0], [0], [1], [0, 0, 1, 1], [], []>} : vector<64x4xbf16>, vector<4x1xbf16>, vector<64x1xf32> -> vector<64x1xf32>
    %c0_214 = arith.constant 0 : index
    %c0_215 = arith.constant 0 : index
    %259 = vector.load %arg28[%c0_214, %c0_215] : memref<576x1xf32, #tpu.memory_space<vmem>>, vector<64x1xf32>
    tpu.vector_store %arg28[%c0_214, %c0_215], %258 {strides = array<i32>} : memref<576x1xf32, #tpu.memory_space<vmem>>, vector<64x1xf32>,
    %c1_216 = arith.constant 1 : index
    %c0_217 = arith.constant 0 : index
    %c0_218 = arith.constant 0 : index
    %260 = vector.load %arg21[%c1_216, %c0_217, %c0_218] : memref<9x4x1xbf16, #tpu.memory_space<vmem>>, vector<1x4x1xbf16>
    %261 = vector.shape_cast %260 : vector<1x4x1xbf16> to vector<4x1xbf16>
    %cst_219 = arith.constant dense<0.000000e+00> : vector<64x1xf32>
    %262 = tpu.matmul %255, %261, %cst_219 {dimension_numbers = #tpu.dot_dimension_numbers<[1], [0], [0], [1], [0, 0, 1, 1], [], []>} : vector<64x4xbf16>, vector<4x1xbf16>, vector<64x1xf32> -> vector<64x1xf32>
    %c64_220 = arith.constant 64 : index
    %c0_221 = arith.constant 0 : index
    %263 = vector.load %arg28[%c64_220, %c0_221] : memref<576x1xf32, #tpu.memory_space<vmem>>, vector<64x1xf32>
    tpu.vector_store %arg28[%c64_220, %c0_221], %262 {strides = array<i32>} : memref<576x1xf32, #tpu.memory_space<vmem>>, vector<64x1xf32>,
    %c2_222 = arith.constant 2 : index
    %c0_223 = arith.constant 0 : index
    %c0_224 = arith.constant 0 : index
    %264 = vector.load %arg21[%c2_222, %c0_223, %c0_224] : memref<9x4x1xbf16, #tpu.memory_space<vmem>>, vector<1x4x1xbf16>
    %265 = vector.shape_cast %264 : vector<1x4x1xbf16> to vector<4x1xbf16>
    %cst_225 = arith.constant dense<0.000000e+00> : vector<64x1xf32>
    %266 = tpu.matmul %255, %265, %cst_225 {dimension_numbers = #tpu.dot_dimension_numbers<[1], [0], [0], [1], [0, 0, 1, 1], [], []>} : vector<64x4xbf16>, vector<4x1xbf16>, vector<64x1xf32> -> vector<64x1xf32>
    %c128_226 = arith.constant 128 : index
    %c0_227 = arith.constant 0 : index
    %267 = vector.load %arg28[%c128_226, %c0_227] : memref<576x1xf32, #tpu.memory_space<vmem>>, vector<64x1xf32>
    tpu.vector_store %arg28[%c128_226, %c0_227], %266 {strides = array<i32>} : memref<576x1xf32, #tpu.memory_space<vmem>>, vector<64x1xf32>,
    %c3_228 = arith.constant 3 : index
    %c0_229 = arith.constant 0 : index
    %c0_230 = arith.constant 0 : index
    %268 = vector.load %arg21[%c3_228, %c0_229, %c0_230] : memref<9x4x1xbf16, #tpu.memory_space<vmem>>, vector<1x4x1xbf16>
    %269 = vector.shape_cast %268 : vector<1x4x1xbf16> to vector<4x1xbf16>
    %cst_231 = arith.constant dense<0.000000e+00> : vector<64x1xf32>
    %270 = tpu.matmul %255, %269, %cst_231 {dimension_numbers = #tpu.dot_dimension_numbers<[1], [0], [0], [1], [0, 0, 1, 1], [], []>} : vector<64x4xbf16>, vector<4x1xbf16>, vector<64x1xf32> -> vector<64x1xf32>
    %c192_232 = arith.constant 192 : index
    %c0_233 = arith.constant 0 : index
    %271 = vector.load %arg28[%c192_232, %c0_233] : memref<576x1xf32, #tpu.memory_space<vmem>>, vector<64x1xf32>
    tpu.vector_store %arg28[%c192_232, %c0_233], %270 {strides = array<i32>} : memref<576x1xf32, #tpu.memory_space<vmem>>, vector<64x1xf32>,
    %c4_234 = arith.constant 4 : index
    %c0_235 = arith.constant 0 : index
    %c0_236 = arith.constant 0 : index
    %272 = vector.load %arg21[%c4_234, %c0_235, %c0_236] : memref<9x4x1xbf16, #tpu.memory_space<vmem>>, vector<1x4x1xbf16>
    %273 = vector.shape_cast %272 : vector<1x4x1xbf16> to vector<4x1xbf16>
    %cst_237 = arith.constant dense<0.000000e+00> : vector<64x1xf32>
    %274 = tpu.matmul %255, %273, %cst_237 {dimension_numbers = #tpu.dot_dimension_numbers<[1], [0], [0], [1], [0, 0, 1, 1], [], []>} : vector<64x4xbf16>, vector<4x1xbf16>, vector<64x1xf32> -> vector<64x1xf32>
    %c256_238 = arith.constant 256 : index
    %c0_239 = arith.constant 0 : index
    %275 = vector.load %arg28[%c256_238, %c0_239] : memref<576x1xf32, #tpu.memory_space<vmem>>, vector<64x1xf32>
    tpu.vector_store %arg28[%c256_238, %c0_239], %274 {strides = array<i32>} : memref<576x1xf32, #tpu.memory_space<vmem>>, vector<64x1xf32>,
    %c5_240 = arith.constant 5 : index
    %c0_241 = arith.constant 0 : index
    %c0_242 = arith.constant 0 : index
    %276 = vector.load %arg21[%c5_240, %c0_241, %c0_242] : memref<9x4x1xbf16, #tpu.memory_space<vmem>>, vector<1x4x1xbf16>
    %277 = vector.shape_cast %276 : vector<1x4x1xbf16> to vector<4x1xbf16>
    %cst_243 = arith.constant dense<0.000000e+00> : vector<64x1xf32>
    %278 = tpu.matmul %255, %277, %cst_243 {dimension_numbers = #tpu.dot_dimension_numbers<[1], [0], [0], [1], [0, 0, 1, 1], [], []>} : vector<64x4xbf16>, vector<4x1xbf16>, vector<64x1xf32> -> vector<64x1xf32>
    %c320 = arith.constant 320 : index
    %c0_244 = arith.constant 0 : index
    %279 = vector.load %arg28[%c320, %c0_244] : memref<576x1xf32, #tpu.memory_space<vmem>>, vector<64x1xf32>
    tpu.vector_store %arg28[%c320, %c0_244], %278 {strides = array<i32>} : memref<576x1xf32, #tpu.memory_space<vmem>>, vector<64x1xf32>,
    %c6_245 = arith.constant 6 : index
    %c0_246 = arith.constant 0 : index
    %c0_247 = arith.constant 0 : index
    %280 = vector.load %arg21[%c6_245, %c0_246, %c0_247] : memref<9x4x1xbf16, #tpu.memory_space<vmem>>, vector<1x4x1xbf16>
    %281 = vector.shape_cast %280 : vector<1x4x1xbf16> to vector<4x1xbf16>
    %cst_248 = arith.constant dense<0.000000e+00> : vector<64x1xf32>
    %282 = tpu.matmul %255, %281, %cst_248 {dimension_numbers = #tpu.dot_dimension_numbers<[1], [0], [0], [1], [0, 0, 1, 1], [], []>} : vector<64x4xbf16>, vector<4x1xbf16>, vector<64x1xf32> -> vector<64x1xf32>
    %c384 = arith.constant 384 : index
    %c0_249 = arith.constant 0 : index
    %283 = vector.load %arg28[%c384, %c0_249] : memref<576x1xf32, #tpu.memory_space<vmem>>, vector<64x1xf32>
    tpu.vector_store %arg28[%c384, %c0_249], %282 {strides = array<i32>} : memref<576x1xf32, #tpu.memory_space<vmem>>, vector<64x1xf32>,
    %c7_250 = arith.constant 7 : index
    %c0_251 = arith.constant 0 : index
    %c0_252 = arith.constant 0 : index
    %284 = vector.load %arg21[%c7_250, %c0_251, %c0_252] : memref<9x4x1xbf16, #tpu.memory_space<vmem>>, vector<1x4x1xbf16>
    %285 = vector.shape_cast %284 : vector<1x4x1xbf16> to vector<4x1xbf16>
    %cst_253 = arith.constant dense<0.000000e+00> : vector<64x1xf32>
    %286 = tpu.matmul %255, %285, %cst_253 {dimension_numbers = #tpu.dot_dimension_numbers<[1], [0], [0], [1], [0, 0, 1, 1], [], []>} : vector<64x4xbf16>, vector<4x1xbf16>, vector<64x1xf32> -> vector<64x1xf32>
    %c448 = arith.constant 448 : index
    %c0_254 = arith.constant 0 : index
    %287 = vector.load %arg28[%c448, %c0_254] : memref<576x1xf32, #tpu.memory_space<vmem>>, vector<64x1xf32>
    tpu.vector_store %arg28[%c448, %c0_254], %286 {strides = array<i32>} : memref<576x1xf32, #tpu.memory_space<vmem>>, vector<64x1xf32>,
    %c8_255 = arith.constant 8 : index
    %c0_256 = arith.constant 0 : index
    %c0_257 = arith.constant 0 : index
    %288 = vector.load %arg21[%c8_255, %c0_256, %c0_257] : memref<9x4x1xbf16, #tpu.memory_space<vmem>>, vector<1x4x1xbf16>
    %289 = vector.shape_cast %288 : vector<1x4x1xbf16> to vector<4x1xbf16>
    %cst_258 = arith.constant dense<0.000000e+00> : vector<64x1xf32>
    %290 = tpu.matmul %255, %289, %cst_258 {dimension_numbers = #tpu.dot_dimension_numbers<[1], [0], [0], [1], [0, 0, 1, 1], [], []>} : vector<64x4xbf16>, vector<4x1xbf16>, vector<64x1xf32> -> vector<64x1xf32>
    %c512 = arith.constant 512 : index
    %c0_259 = arith.constant 0 : index
    %291 = vector.load %arg28[%c512, %c0_259] : memref<576x1xf32, #tpu.memory_space<vmem>>, vector<64x1xf32>
    tpu.vector_store %arg28[%c512, %c0_259], %290 {strides = array<i32>} : memref<576x1xf32, #tpu.memory_space<vmem>>, vector<64x1xf32>,
    %c0_260 = arith.constant 0 : index
    %c0_261 = arith.constant 0 : index
    %292 = vector.load %arg22[%c0_260, %c0_261] : memref<64x576xbf16, #tpu.memory_space<vmem>>, vector<64x576xbf16>
    %c0_262 = arith.constant 0 : index
    %c0_263 = arith.constant 0 : index
    %293 = vector.load %arg28[%c0_262, %c0_263] : memref<576x1xf32, #tpu.memory_space<vmem>>, vector<576x1xf32>
    %294 = arith.truncf %293 : vector<576x1xf32> to vector<576x1xbf16>
    %cst_264 = arith.constant dense<0.000000e+00> : vector<64x1xf32>
    %295 = tpu.matmul %292, %294, %cst_264 {dimension_numbers = #tpu.dot_dimension_numbers<[1], [0], [0], [1], [0, 0, 1, 1], [], []>} : vector<64x576xbf16>, vector<576x1xbf16>, vector<64x1xf32> -> vector<64x1xf32>
    %c0_265 = arith.constant 0 : index
    %c0_266 = arith.constant 0 : index
    %296 = vector.load %arg23[%c0_265, %c0_266] : memref<64x1xf32, #tpu.memory_space<vmem>>, vector<64x1xf32>
    %297 = arith.addf %295, %296 : vector<64x1xf32>
    %cst_267 = arith.constant 2.000000e-01 : f32
    %298 = vector.broadcast %cst_267 : f32 to vector<64x1xf32>
    %299 = arith.mulf %298, %297 : vector<64x1xf32>
    %300 = arith.maximumf %297, %299 : vector<64x1xf32>
    %cst_268 = arith.constant dense<0.000000e+00> : vector<64xf32>
    %301 = vector.multi_reduction <add>, %300, %cst_268 [1] : vector<64x1xf32> to vector<64xf32>
    %302 = vector.shape_cast %301 : vector<64xf32> to vector<64x1xf32>
    %cst_269 = arith.constant 1.000000e+00 : f32
    %303 = vector.broadcast %cst_269 : f32 to vector<64x1xf32>
    %304 = arith.divf %302, %303 : vector<64x1xf32>
    %305 = vector.shape_cast %304 : vector<64x1xf32> to vector<1x64x1xf32>
    %c0_270 = arith.constant 0 : index
    %c0_271 = arith.constant 0 : index
    %c0_272 = arith.constant 0 : index
    %306 = vector.load %arg24[%c0_270, %c0_271, %c0_272] : memref<1x64x1xf32, #tpu.memory_space<vmem>>, vector<1x64x1xf32>
    tpu.vector_store %arg24[%c0_270, %c0_271, %c0_272], %305 {strides = array<i32>} : memref<1x64x1xf32, #tpu.memory_space<vmem>>, vector<1x64x1xf32>,
    return
  }
  func.func @transform_0(%arg0: i32) -> (i32, i32, i32) {
    %c0_i32 = arith.constant 0 : i32
    %c0_i32_0 = arith.constant 0 : i32
    %c0_i32_1 = arith.constant 0 : i32
    return %arg0, %c0_i32, %c0_i32_0 : i32, i32, i32
  }
  func.func @transform_1(%arg0: i32) -> (i32, i32) {
    %c0_i32 = arith.constant 0 : i32
    %c0_i32_0 = arith.constant 0 : i32
    %c0_i32_1 = arith.constant 0 : i32
    return %c0_i32, %c0_i32_0 : i32, i32
  }
  func.func @transform_2(%arg0: i32) -> (i32, i32) {
    %c0_i32 = arith.constant 0 : i32
    %c0_i32_0 = arith.constant 0 : i32
    %c0_i32_1 = arith.constant 0 : i32
    return %c0_i32, %c0_i32_0 : i32, i32
  }
  func.func @transform_3(%arg0: i32) -> (i32, i32) {
    %c0_i32 = arith.constant 0 : i32
    %c0_i32_0 = arith.constant 0 : i32
    %c0_i32_1 = arith.constant 0 : i32
    return %c0_i32, %c0_i32_0 : i32, i32
  }
  func.func @transform_4(%arg0: i32) -> (i32, i32) {
    %c0_i32 = arith.constant 0 : i32
    %c0_i32_0 = arith.constant 0 : i32
    %c0_i32_1 = arith.constant 0 : i32
    return %c0_i32, %c0_i32_0 : i32, i32
  }
  func.func @transform_5(%arg0: i32) -> (i32, i32, i32) {
    %c0_i32 = arith.constant 0 : i32
    %c0_i32_0 = arith.constant 0 : i32
    %c0_i32_1 = arith.constant 0 : i32
    %c0_i32_2 = arith.constant 0 : i32
    return %c0_i32, %c0_i32_0, %c0_i32_1 : i32, i32, i32
  }
  func.func @transform_6(%arg0: i32) -> (i32, i32) {
    %c0_i32 = arith.constant 0 : i32
    %c0_i32_0 = arith.constant 0 : i32
    %c0_i32_1 = arith.constant 0 : i32
    return %c0_i32, %c0_i32_0 : i32, i32
  }
  func.func @transform_7(%arg0: i32) -> (i32, i32) {
    %c0_i32 = arith.constant 0 : i32
    %c0_i32_0 = arith.constant 0 : i32
    %c0_i32_1 = arith.constant 0 : i32
    return %c0_i32, %c0_i32_0 : i32, i32
  }
  func.func @transform_8(%arg0: i32) -> (i32, i32) {
    %c0_i32 = arith.constant 0 : i32
    %c0_i32_0 = arith.constant 0 : i32
    %c0_i32_1 = arith.constant 0 : i32
    return %c0_i32, %c0_i32_0 : i32, i32
  }
  func.func @transform_9(%arg0: i32) -> (i32, i32) {
    %c0_i32 = arith.constant 0 : i32
    %c0_i32_0 = arith.constant 0 : i32
    %c0_i32_1 = arith.constant 0 : i32
    return %c0_i32, %c0_i32_0 : i32, i32
  }
  func.func @transform_10(%arg0: i32) -> (i32, i32, i32) {
    %c0_i32 = arith.constant 0 : i32
    %c0_i32_0 = arith.constant 0 : i32
    %c0_i32_1 = arith.constant 0 : i32
    %c0_i32_2 = arith.constant 0 : i32
    return %c0_i32, %c0_i32_0, %c0_i32_1 : i32, i32, i32
  }
  func.func @transform_11(%arg0: i32) -> (i32, i32) {
    %c0_i32 = arith.constant 0 : i32
    %c0_i32_0 = arith.constant 0 : i32
    %c0_i32_1 = arith.constant 0 : i32
    return %c0_i32, %c0_i32_0 : i32, i32
  }
  func.func @transform_12(%arg0: i32) -> (i32, i32) {
    %c0_i32 = arith.constant 0 : i32
    %c0_i32_0 = arith.constant 0 : i32
    %c0_i32_1 = arith.constant 0 : i32
    return %c0_i32, %c0_i32_0 : i32, i32
  }
  func.func @transform_13(%arg0: i32) -> (i32, i32) {
    %c0_i32 = arith.constant 0 : i32
    %c0_i32_0 = arith.constant 0 : i32
    %c0_i32_1 = arith.constant 0 : i32
    return %c0_i32, %c0_i32_0 : i32, i32
  }
  func.func @transform_14(%arg0: i32) -> (i32, i32) {
    %c0_i32 = arith.constant 0 : i32
    %c0_i32_0 = arith.constant 0 : i32
    %c0_i32_1 = arith.constant 0 : i32
    return %c0_i32, %c0_i32_0 : i32, i32
  }
  func.func @transform_15(%arg0: i32) -> (i32, i32, i32) {
    %c0_i32 = arith.constant 0 : i32
    %c0_i32_0 = arith.constant 0 : i32
    %c0_i32_1 = arith.constant 0 : i32
    %c0_i32_2 = arith.constant 0 : i32
    return %c0_i32, %c0_i32_0, %c0_i32_1 : i32, i32, i32
  }
  func.func @transform_16(%arg0: i32) -> (i32, i32) {
    %c0_i32 = arith.constant 0 : i32
    %c0_i32_0 = arith.constant 0 : i32
    %c0_i32_1 = arith.constant 0 : i32
    return %c0_i32, %c0_i32_0 : i32, i32
  }
  func.func @transform_17(%arg0: i32) -> (i32, i32) {
    %c0_i32 = arith.constant 0 : i32
    %c0_i32_0 = arith.constant 0 : i32
    %c0_i32_1 = arith.constant 0 : i32
    return %c0_i32, %c0_i32_0 : i32, i32
  }
  func.func @transform_18(%arg0: i32) -> (i32, i32) {
    %c0_i32 = arith.constant 0 : i32
    %c0_i32_0 = arith.constant 0 : i32
    %c0_i32_1 = arith.constant 0 : i32
    return %c0_i32, %c0_i32_0 : i32, i32
  }
  func.func @transform_19(%arg0: i32) -> (i32, i32) {
    %c0_i32 = arith.constant 0 : i32
    %c0_i32_0 = arith.constant 0 : i32
    %c0_i32_1 = arith.constant 0 : i32
    return %c0_i32, %c0_i32_0 : i32, i32
  }
  func.func @transform_20(%arg0: i32) -> (i32, i32, i32) {
    %c0_i32 = arith.constant 0 : i32
    %c0_i32_0 = arith.constant 0 : i32
    %c0_i32_1 = arith.constant 0 : i32
    %c0_i32_2 = arith.constant 0 : i32
    return %c0_i32, %c0_i32_0, %c0_i32_1 : i32, i32, i32
  }
  func.func @transform_21(%arg0: i32) -> (i32, i32) {
    %c0_i32 = arith.constant 0 : i32
    %c0_i32_0 = arith.constant 0 : i32
    %c0_i32_1 = arith.constant 0 : i32
    return %c0_i32, %c0_i32_0 : i32, i32
  }
  func.func @transform_22(%arg0: i32) -> (i32, i32) {
    %c0_i32 = arith.constant 0 : i32
    %c0_i32_0 = arith.constant 0 : i32
    %c0_i32_1 = arith.constant 0 : i32
    return %c0_i32, %c0_i32_0 : i32, i32
  }
  func.func @transform_23(%arg0: i32) -> (i32, i32, i32) {
    %c0_i32 = arith.constant 0 : i32
    %c0_i32_0 = arith.constant 0 : i32
    %c0_i32_1 = arith.constant 0 : i32
    return %arg0, %c0_i32, %c0_i32_0 : i32, i32, i32
  }
}

</mosaic_0001>

<bundles_post_ra>
// kernel: small_backbone_forward.1
= control target key start
LH: loop header
LB: loop body
LE: loop exit
PB: predicated region body
PF: predicated region fallthrough
CT: control target
= control target key end

     0   :  { %s9161_s0 = inlined_call_operand.vmem [shape: bf16[2,32,256], index: 0, kind: input, shape index: {}]   ;;  %s9162_s1 = inlined_call_operand.vmem [shape: bf16[8,32], index: 1, kind: input, shape index: {}]   ;;  %s9163_s2 = inlined_call_operand.vmem [shape: f32[8,1], index: 2, kind: input, shape index: {}]   ;;  %s9164_s3 = inlined_call_operand.vmem [shape: f32[8,1], index: 3, kind: input, shape index: {}]   ;;  %s9165_s4 = inlined_call_operand.vmem [shape: f32[8,1], index: 4, kind: input, shape index: {}]   ;;  %s9166_s5 = inlined_call_operand.vmem [shape: bf16[9,256,64], index: 5, kind: input, shape index: {}]   ;;  %s9167_s6 = inlined_call_operand.vmem [shape: bf16[16,72], index: 6, kind: input, shape index: {}]   ;;  %s9168_s7 = inlined_call_operand.vmem [shape: f32[16,1], index: 7, kind: input, shape index: {}]   ;;  %s9169_s8 = inlined_call_operand.vmem [shape: f32[16,1], index: 8, kind: input, shape index: {}]   ;;  %s9170_s9 = inlined_call_operand.vmem [shape: f32[16,1], index: 9, kind: input, shape index: {}]   ;;  %s9171_s10 = inlined_call_operand.vmem [shape: bf16[9,64,16], index: 10, kind: input, shape index: {}]   ;;  %s9172_s11 = inlined_call_operand.vmem [shape: bf16[32,144], index: 11, kind: input, shape index: {}]   ;;  %s9173_s12 = inlined_call_operand.vmem [shape: f32[32,1], index: 12, kind: input, shape index: {}]   ;;  %s9174_s13 = inlined_call_operand.vmem [shape: f32[32,1], index: 13, kind: input, shape index: {}]   ;;  %s9175_s14 = inlined_call_operand.vmem [shape: f32[32,1], index: 14, kind: input, shape index: {}]   ;;  %s9176_s15 = inlined_call_operand.vmem [shape: bf16[9,16,4], index: 15, kind: input, shape index: {}]   ;;  %s9177_s16 = inlined_call_operand.vmem [shape: bf16[64,288], index: 16, kind: input, shape index: {}]   ;;  %s9178_s17 = inlined_call_operand.vmem [shape: f32[64,1], index: 17, kind: input, shape index: {}]   ;;  %s9179_s18 = inlined_call_operand.vmem [shape: f32[64,1], index: 18, kind: input, shape index: {}]   ;;  %s9180_s19 = inlined_call_operand.vmem [shape: f32[64,1], index: 19, kind: input, shape index: {}]   ;;  %s9181_s20 = inlined_call_operand.vmem [shape: bf16[9,4,1], index: 20, kind: input, shape index: {}]   ;;  %s9182_s21 = inlined_call_operand.vmem [shape: bf16[64,576], index: 21, kind: input, shape index: {}]   ;;  %s9183_s22 = inlined_call_operand.vmem [shape: f32[64,1], index: 22, kind: input, shape index: {}]   ;;  %s9184_s23 = inlined_call_operand.vmem [shape: f32[2,64,1], index: 23, kind: output, shape index: {}]  }
   0x1   :  { %9187 = sst [smem:[#allocation6_spill]] %s9161_s0 }
   0x2   :  { %9188 = sst [smem:[#allocation7_spill]] %s9162_s1 }
   0x3   :  { %9189 = sst [smem:[#allocation8_spill]] %s9163_s2 }
   0x4   :  { %9190 = sst [smem:[#allocation9_spill]] %s9164_s3 }
   0x5   :  { %9191 = sst [smem:[#allocation10_spill]] %s9165_s4  ;;  %s7683_s4 = smov 0  }
   0x6   :  { %9192 = sst [smem:[#allocation11_spill]] %s9166_s5 }
   0x7   :  { %9193 = sst [smem:[#allocation12_spill]] %s9167_s6 }
   0x8   :  { %9194 = sst [smem:[#allocation13_spill]] %s9168_s7 }
   0x9 LB: > { %s5844_s30 = sadd.s32 4294967295, %s7558_s4   ;;  %p5848_p0 = scmp.ge.s32.totalorder %s7558_s4, 1  ;;  %s7558_s4 = sphi %s7683_s4, %s33_s4  }
   0xa   : > { %p637_p1 = scmp.lt.s32.totalorder %s7558_s4, 3 }
   0xc   : > { %p638_p2 = pnand %p5848_p0, %p637_p1 }
   0xd   : > { %p701_p3 = scmp.lt.s32.totalorder (!%p638_p2), %s5844_s30, 1  ;;  %s9195_s5 = sld [smem:[#allocation8_spill]] (!%p638_p2)  ;;  %v7560_v1 = vmov (!%p638_p2), 0   ;;  %vm743_vm0 = vcmask (!%p638_p2), 261120   ;;  %v2477_v36 = vld [vmem:[%s9169_s8] sm:$0xff] (!%p638_p2)  ;;  %v2478_v42 = vld [vmem:[%s9169_s8 + $0x8] sm:$0xff] (!%p638_p2) }
   0xe   : > { %641 = sbr.rel (%p638_p2) target bundleno = 3153 (0xc51), region = 112  ;;  %779 = vmatprep.mubr.bf16.mxu0 (!%p638_p2), %v7560_v1  ;;  %7275 = vset.pattern.permute.xlu0 (!%p638_p2), %v7560_v1  ;;  %s9196_s2 = sld [smem:[#allocation9_spill]] (!%p638_p2)  ;;  %vm997_vm1 = vcmask (!%p638_p2), 523264   ;;  %vm7562_vm2 = vmmov (!%p638_p2), 0   ;;  %vm2396_vm3 = vcmask (!%p638_p2), 1043456   ;;  %vm2392_vm4 = vcmask (!%p638_p2), 588800  }
   0xf   : > { %7276 = vset.pattern.permute.xlu1 (!%p638_p2), %v7560_v1  ;;  %s9197_s28 = sld [smem:[#allocation6_spill]] (!%p638_p2)  ;;  %s9198_s24 = sld [smem:[#allocation7_spill]] (!%p638_p2)  ;;  %vm2582_vm5 = vcmask (!%p638_p2), 130048   ;;  %vm3514_vm6 = vcmask (!%p638_p2), 31744   ;;  %vm4608_vm7 = vcmask (!%p638_p2), 1041408   ;;  %vm4677_vm8 = vcmask (!%p638_p2), 7168  }
  0x10   : > { %s9199_s1 = sld [smem:[#allocation11_spill]] (!%p638_p2)  ;;  %s9200_s7 = sld [smem:[#allocation10_spill]] (!%p638_p2) }
  0x11   : > { %s9202_s26 = sld [smem:[#allocation12_spill]] (!%p638_p2) }
  0x13   : > { %v717_v0 = vld [vmem:[%s9195_s5] sm:$0xff] (!%p638_p2) }
  0x14   : > { %v811_v2 = vld [vmem:[%s9196_s2] sm:$0xff] (!%p638_p2)  ;;  %720 = vperm.xlu0 (!%p638_p2), %7275, %v717_v0  }
  0x15   : > { %s9204_s30 = smov (!%p701_p3, %s5844_s30), 1  ;;  %814 = vperm.xlu1 %7276, %v811_v2   ;;  %v712_v7 = vld [vmem:[%s9198_s24] sm:$0xf] }
  0x16   : > { %s6504_s6 = sshll.u32 %s9204_s30, 5  ;;  %v7283_v8 = vld [vmem:[%s9199_s1 + $0x40] sm:$0xff]   ;;  %v7287_v27 = vld [vmem:[%s9199_s1 + $0x48] sm:$0xff]   ;;  %v7291_v32 = vld [vmem:[%s9199_s1 + $0x50] sm:$0xff]   ;;  %s6505_s5 = sshll.u32 %s9204_s30, 6 }
  0x17   : > { %s705_s29 = scalar_lea.vmem %s9197_s28, %s6504_s6  ;;  %v7284_v9 = vld [vmem:[%s9199_s1 + $0xc0] sm:$0xff]   ;;  %6506 = vmatprep.subr.bf16.mxu1 %v7283_v8  ;;  %v7288_v28 = vld [vmem:[%s9199_s1 + $0xc8] sm:$0xff]   ;;  %v7292_v33 = vld [vmem:[%s9199_s1 + $0xd0] sm:$0xff]   ;;  %s9201_s28 = sld [smem:[#allocation13_spill]] }
  0x18   : > { %v7277_v3 = vld [vmem:[%s705_s29 + $0x4] ss:$8 sps:$4 sm:$0xff]   ;;  %v7279_v4 = vld [vmem:[%s705_s29] ss:$8 sps:$4 sm:$0xff]   ;;  %v7280_v5 = vld [vmem:[%s705_s29 + $0x14] ss:$8 sps:$4 sm:$0xff]  }
  0x19   : > { %747 = vmatprep.subr.bf16.mxu0 %v7277_v3  ;;  %v7282_v6 = vld [vmem:[%s705_s29 + $0x10] ss:$8 sps:$4 sm:$0xff]   ;;  %v7285_v10 = vld [vmem:[%s9199_s1] sm:$0xff]   ;;  %v7289_v29 = vld [vmem:[%s9199_s1 + $0x8] sm:$0xff]  }
  0x1a   : > { %748 = vmatpush1.bf16.msra.mxu0 %v7279_v4  ;;  %v7286_v11 = vld [vmem:[%s9199_s1 + $0x80] sm:$0xff]   ;;  %6507 = vmatpush3.bf16.msra.mxu1 %v7285_v10  ;;  %v7290_v30 = vld [vmem:[%s9199_s1 + $0x88] sm:$0xff]   ;;  %v7293_v34 = vld [vmem:[%s9199_s1 + $0x10] sm:$0xff]  }
  0x1b   : > { %749 = vmatprep.subr.bf16.mxu0 %v7280_v5  ;;  %6508 = vmatprep.subr.bf16.mxu1 %v7287_v27  ;;  %v819_v31 = vld [vmem:[%s9200_s7] sm:$0xff]  ;;  %v7294_v35 = vld [vmem:[%s9199_s1 + $0x90] sm:$0xff]   ;;  %v7295_v38 = vld [vmem:[%s9199_s1 + $0x58] sm:$0xff]   ;;  %s9123_s7 = scalar_lea.vmem %s9184_s23, %s6505_s5 }
  0x1c   : > { %v7296_v39 = vld [vmem:[%s9199_s1 + $0xd8] sm:$0xff]   ;;  %v7299_v44 = vld [vmem:[%s9199_s1 + $0x60] sm:$0xff]   ;;  %v7303_v48 = vld [vmem:[%s9199_s1 + $0x68] sm:$0xff]  }
  0x1d   : > { %v2375_v37 = vld [vmem:[%s9201_s28] sm:$0xff]  ;;  %v7297_v40 = vld [vmem:[%s9199_s1 + $0x18] sm:$0xff]   ;;  %v2376_v43 = vld [vmem:[%s9201_s28 + $0x8] sm:$0xff] }
  0x1e   : > { %750 = vmatpush1.bf16.msra.mxu0 %v7282_v6  ;;  %6509 = vmatpush3.bf16.msra.mxu1 %v7289_v29  ;;  %v7298_v41 = vld [vmem:[%s9199_s1 + $0x98] sm:$0xff]   ;;  %v7300_v45 = vld [vmem:[%s9199_s1 + $0xe0] sm:$0xff]   ;;  %v7304_v49 = vld [vmem:[%s9199_s1 + $0xe8] sm:$0xff]  }
  0x1f   : > { %6528 = vmatprep.subr.bf16.mxu0 %v7284_v9  ;;  %6510 = vmatprep.subr.bf16.mxu1 %v7291_v32  ;;  %v7301_v46 = vld [vmem:[%s9199_s1 + $0x20] sm:$0xff]   ;;  %v7305_v50 = vld [vmem:[%s9199_s1 + $0x28] sm:$0xff]   ;;  %v7307_v52 = vld [vmem:[%s9199_s1 + $0x70] sm:$0xff]  }
  0x20   : > { %v7302_v47 = vld [vmem:[%s9199_s1 + $0xa0] sm:$0xff]   ;;  %v7306_v51 = vld [vmem:[%s9199_s1 + $0xa8] sm:$0xff]   ;;  %v7308_v53 = vld [vmem:[%s9199_s1 + $0xf0] sm:$0xff]  }
  0x21   : > { %5857 = vmatmul.mubr.msk.bf16.vlgmr.msra.gmra.mrb[0].mxu0 %vm743_vm0, %v712_v7  ;;  %v7309_v54 = vld [vmem:[%s9199_s1 + $0x30] sm:$0xff]   ;;  %v7311_v56 = vld [vmem:[%s9199_s1 + $0x78] sm:$0xff]   ;;  %v7315_v60 = vld [vmem:[%s9199_s1 + $0x140] sm:$0xff]  }
  0x22   : > { %6529 = vmatpush3.bf16.msra.mxu0 %v7286_v11  ;;  %6511 = vmatpush3.bf16.msra.mxu1 %v7293_v34  ;;  %v7310_v55 = vld [vmem:[%s9199_s1 + $0xb0] sm:$0xff]   ;;  %v7312_v57 = vld [vmem:[%s9199_s1 + $0xf8] sm:$0xff]   ;;  %v7316_v61 = vld [vmem:[%s9199_s1 + $0x1c0] sm:$0xff]  }
  0x23   : > { %6530 = vmatprep.subr.bf16.mxu0 %v7288_v28  ;;  %6512 = vmatprep.subr.bf16.mxu1 %v7295_v38  ;;  %v7313_v58 = vld [vmem:[%s9199_s1 + $0x38] sm:$0xff]   ;;  %v7324_v27 = vld [vmem:[%s9199_s1 + $0x1d0] sm:$0xff]   ;;  %v7331_v34 = vld [vmem:[%s9199_s1 + $0x160] sm:$0xff]  }
  0x24   : > { %v7314_v59 = vld [vmem:[%s9199_s1 + $0xb8] sm:$0xff]   ;;  %v7325_v28 = vld [vmem:[%s9199_s1 + $0x110] sm:$0xff]   ;;  %v7335_v38 = vld [vmem:[%s9199_s1 + $0x168] sm:$0xff]  }
  0x25   : > { %v7326_v29 = vld [vmem:[%s9199_s1 + $0x190] sm:$0xff]   ;;  %v7329_v32 = vld [vmem:[%s9199_s1 + $0x118] sm:$0xff]  }
  0x26   : > { %6531 = vmatpush3.bf16.msra.mxu0 %v7290_v30  ;;  %6513 = vmatpush3.bf16.msra.mxu1 %v7297_v40  ;;  %v7327_v30 = vld [vmem:[%s9199_s1 + $0x158] sm:$0xff]   ;;  %v7337_v40 = vld [vmem:[%s9199_s1 + $0x128] sm:$0xff]  }
  0x27   : > { %6532 = vmatprep.subr.bf16.mxu0 %v7292_v33  ;;  %6514 = vmatprep.subr.bf16.mxu1 %v7299_v44  ;;  %v7330_v33 = vld [vmem:[%s9199_s1 + $0x198] sm:$0xff]   ;;  %v7341_v44 = vld [vmem:[%s9199_s1 + $0x130] sm:$0xff]  }
  0x2a   : > { %6533 = vmatpush3.bf16.msra.mxu0 %v7294_v35  ;;  %6515 = vmatpush3.bf16.msra.mxu1 %v7301_v46  ;;  %v7332_v35 = vld [vmem:[%s9199_s1 + $0x1e0] sm:$0xff]   ;;  %v7343_v46 = vld [vmem:[%s9199_s1 + $0x178] sm:$0xff]  }
  0x2b   : > { %6534 = vmatprep.subr.bf16.mxu0 %v7296_v39  ;;  %6516 = vmatprep.subr.bf16.mxu1 %v7303_v48  ;;  %v7336_v39 = vld [vmem:[%s9199_s1 + $0x1e8] sm:$0xff]   ;;  %v7345_v48 = vld [vmem:[%s9199_s1 + $0x138] sm:$0xff]  }
  0x2e   : > { %6535 = vmatpush3.bf16.msra.mxu0 %v7298_v41  ;;  %6517 = vmatpush3.bf16.msra.mxu1 %v7305_v50  ;;  %v7338_v41 = vld [vmem:[%s9199_s1 + $0x1a8] sm:$0xff]   ;;  %v7347_v50 = vld [vmem:[%s9199_s1 + $0x240] sm:$0xff]  }
  0x2f   : > { %6536 = vmatprep.subr.bf16.mxu0 %v7300_v45  ;;  %6518 = vmatprep.subr.bf16.mxu1 %v7307_v52  ;;  %v7342_v45 = vld [vmem:[%s9199_s1 + $0x1b0] sm:$0xff]   ;;  %v7349_v52 = vld [vmem:[%s9199_s1 + $0x200] sm:$0xff]  }
  0x32   : > { %6537 = vmatpush3.bf16.msra.mxu0 %v7302_v47  ;;  %6519 = vmatpush3.bf16.msra.mxu1 %v7309_v54  ;;  %v7344_v47 = vld [vmem:[%s9199_s1 + $0x1f8] sm:$0xff]   ;;  %v7351_v54 = vld [vmem:[%s9199_s1 + $0x248] sm:$0xff]  }
  0x33   : > { %6538 = vmatprep.subr.bf16.mxu0 %v7304_v49  ;;  %6520 = vmatprep.subr.bf16.mxu1 %v7311_v56  ;;  %v7346_v49 = vld [vmem:[%s9199_s1 + $0x1b8] sm:$0xff]   ;;  %v7353_v56 = vld [vmem:[%s9199_s1 + $0x208] sm:$0xff]  }
  0x36   : > { %6539 = vmatpush3.bf16.msra.mxu0 %v7306_v51  ;;  %6521 = vmatpush3.bf16.msra.mxu1 %v7313_v58  ;;  %v7348_v51 = vld [vmem:[%s9199_s1 + $0x2c0] sm:$0xff]   ;;  %v7355_v58 = vld [vmem:[%s9199_s1 + $0x250] sm:$0xff]  }
  0x37   : > { %6540 = vmatprep.subr.bf16.mxu0 %v7308_v53  ;;  %6550 = vmatprep.subr.bf16.mxu1 %v7315_v60  ;;  %v7350_v53 = vld [vmem:[%s9199_s1 + $0x280] sm:$0xff]   ;;  %v7357_v60 = vld [vmem:[%s9199_s1 + $0x210] sm:$0xff]  }
  0x3a   : > { %6541 = vmatpush3.bf16.msra.mxu0 %v7310_v55  ;;  %v7352_v55 = vld [vmem:[%s9199_s1 + $0x2c8] sm:$0xff]  }
  0x3b   : > { %6542 = vmatprep.subr.bf16.mxu0 %v7312_v57  ;;  %v7354_v57 = vld [vmem:[%s9199_s1 + $0x288] sm:$0xff]  }
  0x3e   : > { %6543 = vmatpush3.bf16.msra.mxu0 %v7314_v59  ;;  %v7356_v59 = vld [vmem:[%s9199_s1 + $0x2d0] sm:$0xff]  }
  0x3f   : > { %6572 = vmatprep.subr.bf16.mxu0 %v7316_v61  ;;  %v7358_v61 = vld [vmem:[%s9199_s1 + $0x290] sm:$0xff]  }
  0x93   : > { %v721_v12 = vpop.permute.xlu0 %720 }
  0x94   : > { %v815_v62 = vpop.permute.xlu1 %814 }
  0xf4   : > { %v781_v13 = vpop.f32.mrb[0].mxu0 }
  0xf5   : > { %v782_v14 = vadd.f32 %v781_v13, %v721_v12  ;;  %v783_v15 = vpop.f32.mrb[1].mxu0 }
  0xf6   : > { %v784_v16 = vadd.f32 %v783_v15, %v721_v12  ;;  %v785_v17 = vpop.f32.mrb[2].mxu0 }
  0xf7   : > { %v788_v18 = vmul.f32 0.2, %v782_v14  ;;  %v786_v19 = vpop.f32.mrb[3].mxu0 }
  0xf8   : > { %v789_v20 = vmul.f32 0.2, %v784_v16 }
  0xf9   : > { %v7722_v21 = vmax.f32 %v782_v14, %v788_v18 }
  0xfa   : > { %v7724_v22 = vmax.f32 %v784_v16, %v789_v20  ;;  %v7317_v20 = vld [vmem:[%s9199_s1 + $0x100] sm:$0xff]  }
  0xfb   : > { %v796_v23 = vmul.f32 %v7722_v21, %v7722_v21 }
  0xfc   : > { %v792_v24 = vadd.f32 %v7724_v22, %v7722_v21  ;;  %v797_v25 = vmul.f32 %v7724_v22, %v7724_v22 }
  0xfe   : > { %793 = vadd.xlane.f32.xlu0 %v792_v24  ;;  %v798_v26 = vadd.f32 %v797_v25, %v796_v23  ;;  %v7320_v23 = vld [vmem:[%s9199_s1 + $0x1c8] sm:$0xff]  }
  0xff   : > { %v7321_v24 = vld [vmem:[%s9199_s1 + $0x108] sm:$0xff]  }
 0x100   : > { %799 = vadd.xlane.f32.xlu1 %v798_v26  ;;  %v7322_v25 = vld [vmem:[%s9199_s1 + $0x188] sm:$0xff]   ;;  %v7323_v26 = vld [vmem:[%s9199_s1 + $0x150] sm:$0xff]  }
 0x111   : > { %822 = vperm.xlu1 %7276, %v819_v31   ;;  %v7328_v31 = vld [vmem:[%s9199_s1 + $0x1d8] sm:$0xff]  }
 0x114   : > { %2481 = vperm.xlu0 %7275, %v2477_v36   ;;  %v7333_v36 = vld [vmem:[%s9199_s1 + $0x120] sm:$0xff]  }
 0x115   : > { %2379 = vperm.xlu1 %7276, %v2375_v37   ;;  %v7334_v37 = vld [vmem:[%s9199_s1 + $0x1a0] sm:$0xff]  }
 0x118   : > { %2486 = vperm.xlu0 %7275, %v2478_v42   ;;  %v7339_v42 = vld [vmem:[%s9199_s1 + $0x170] sm:$0xff]  }
 0x119   : > { %2384 = vperm.xlu1 %7276, %v2376_v43   ;;  %v7340_v43 = vld [vmem:[%s9199_s1 + $0x1f0] sm:$0xff]  }
 0x18b   : > { %v794_v63 = vpop.xlane.xlu0 %793 }
 0x18c   : > { %v795_v0 = vmul.f32 0.00390625, %v794_v63  ;;  %v7360_v63 = vld [vmem:[%s9199_s1 + $0x2d8] sm:$0xff]  }
 0x18d   : > { %v800_v2 = vpop.xlane.xlu1 %799 }
 0x18e   : > { %v801_v3 = vmul.f32 0.00390625, %v800_v2  ;;  %v802_v4 = vmul.f32 %v795_v0, %v795_v0  ;;  %v805_v8 = vsub.f32 %v7722_v21, %v795_v0  ;;  %v806_v9 = vsub.f32 %v7724_v22, %v795_v0  ;;  %v7318_v21 = vld [vmem:[%s9199_s1 + $0x180] sm:$0xff]   ;;  %v7319_v22 = vld [vmem:[%s9199_s1 + $0x148] sm:$0xff]   ;;  %v7361_v0 = vld [vmem:[%s9199_s1 + $0x218] sm:$0xff]  }
 0x18f   : > { %v7362_v2 = vld [vmem:[%s9199_s1 + $0x298] sm:$0xff]  }
 0x190   : > { %v803_v5 = vsub.f32 %v801_v3, %v802_v4  ;;  %v7363_v3 = vld [vmem:[%s9199_s1 + $0x260] sm:$0xff]  }
 0x191   : > { %v823_v15 = vpop.permute.xlu1 %822  ;;  %v7364_v4 = vld [vmem:[%s9199_s1 + $0x2e0] sm:$0xff]  }
 0x192   : > { %v804_v6 = vmax.f32 %v803_v5, 0.0  ;;  %v7365_v5 = vld [vmem:[%s9199_s1 + $0x220] sm:$0xff]  }
 0x194   : > { %v807_v7 = vadd.f32 1e-05, %v804_v6  ;;  %v7366_v6 = vld [vmem:[%s9199_s1 + $0x2a0] sm:$0xff]  }
 0x196   : > { %7522 = vrsqrt.f32 %v807_v7  ;;  %v7367_v7 = vld [vmem:[%s9199_s1 + $0x268] sm:$0xff]  }
 0x1a0   : > { %v7523_v10 = vpop.eup %7522 }
 0x1a1   : > { %v809_v11 = vmul.f32 %v7523_v10, %v805_v8  ;;  %v810_v12 = vmul.f32 %v7523_v10, %v806_v9  ;;  %v7368_v8 = vld [vmem:[%s9199_s1 + $0x2e8] sm:$0xff]  }
 0x1a2   : > { %v7369_v9 = vld [vmem:[%s9199_s1 + $0x228] sm:$0xff]  }
 0x1a3   : > { %v817_v13 = vmul.f32 %v815_v62, %v809_v11  ;;  %v818_v14 = vmul.f32 %v815_v62, %v810_v12  ;;  %v7359_v62 = vld [vmem:[%s9199_s1 + $0x258] sm:$0xff]   ;;  %v7370_v10 = vld [vmem:[%s9199_s1 + $0x2a8] sm:$0xff]   ;;  %v7371_v11 = vld [vmem:[%s9199_s1 + $0x270] sm:$0xff]  }
 0x1a4   : > { %v7372_v12 = vld [vmem:[%s9199_s1 + $0x2f0] sm:$0xff]  }
 0x1a5   : > { %v825_v16 = vadd.f32 %v823_v15, %v817_v13  ;;  %v826_v17 = vadd.f32 %v823_v15, %v818_v14  ;;  %v7373_v13 = vld [vmem:[%s9199_s1 + $0x230] sm:$0xff]   ;;  %v7375_v15 = vld [vmem:[%s9199_s1 + $0x278] sm:$0xff]  }
 0x1a6   : > { %v7374_v14 = vld [vmem:[%s9199_s1 + $0x2b0] sm:$0xff]  }
 0x1a7   : > { %v7839_v18 = vpack.c.bf16 %v825_v16, %v825_v16  ;;  %v7841_v19 = vpack.c.bf16 %v826_v17, %v826_v17  ;;  %v7376_v16 = vld [vmem:[%s9199_s1 + $0x2f8] sm:$0xff]  }
 0x1a8   : > { %v7377_v17 = vld [vmem:[%s9199_s1 + $0x238] sm:$0xff]  }
 0x1a9   : > { %989 = vmatprep.mubr.bf16.mxu1 %v7841_v19  ;;  %1160 = vmatprep.mubr.bf16.mxu0 %v7841_v19 }
 0x1aa   : > { %990 = vmatmul.mubr.bf16.vlgmr.msra.gmra.mrb[0].mxu1 %v7839_v18  ;;  %1161 = vmatmul.mubr.bf16.vlgmr.msra.gmra.mrb[4].mxu0 %v7839_v18 }
 0x1ab   : > { %6551 = vmatpush3.bf16.msra.mxu1 %v7317_v20  ;;  %6573 = vmatpush3.bf16.msra.mxu0 %v7318_v21  ;;  %v7378_v20 = vld [vmem:[%s9199_s1 + $0x2b8] sm:$0xff]   ;;  %v7379_v21 = vld [vmem:[%s9199_s1 + $0x340] sm:$0xff]  }
 0x1ac   : > { %1330 = vmatprep.mubr.bf16.mxu1 %v7841_v19  ;;  %1500 = vmatprep.mubr.bf16.mxu0 %v7841_v19 }
 0x1ad   : > { %6552 = vmatprep.subr.bf16.mxu1 %v7319_v22  ;;  %6574 = vmatprep.subr.bf16.mxu0 %v7320_v23  ;;  %v7380_v22 = vld [vmem:[%s9199_s1 + $0x3c0] sm:$0xff]  }
 0x1ae   : > { %v7381_v23 = vld [vmem:[%s9199_s1 + $0x300] sm:$0xff]  }
 0x1af   : > { %6553 = vmatpush3.bf16.msra.mxu1 %v7321_v24  ;;  %6575 = vmatpush3.bf16.msra.mxu0 %v7322_v25  ;;  %v7382_v24 = vld [vmem:[%s9199_s1 + $0x380] sm:$0xff]   ;;  %v7383_v25 = vld [vmem:[%s9199_s1 + $0x348] sm:$0xff]  }
 0x1b0   : > { %6554 = vmatprep.subr.bf16.mxu1 %v7323_v26  ;;  %6576 = vmatprep.subr.bf16.mxu0 %v7324_v27  ;;  %v7384_v26 = vld [vmem:[%s9199_s1 + $0x3c8] sm:$0xff]  }
 0x1b1   : > { %v7385_v27 = vld [vmem:[%s9199_s1 + $0x308] sm:$0xff]  }
 0x1b3   : > { %6555 = vmatpush3.bf16.msra.mxu1 %v7325_v28  ;;  %6577 = vmatpush3.bf16.msra.mxu0 %v7326_v29  ;;  %v7386_v28 = vld [vmem:[%s9199_s1 + $0x388] sm:$0xff]   ;;  %v7387_v29 = vld [vmem:[%s9199_s1 + $0x350] sm:$0xff]  }
 0x1b4   : > { %6556 = vmatprep.subr.bf16.mxu1 %v7327_v30  ;;  %6578 = vmatprep.subr.bf16.mxu0 %v7328_v31  ;;  %v7388_v30 = vld [vmem:[%s9199_s1 + $0x3d0] sm:$0xff]  }
 0x1b5   : > { %v7389_v31 = vld [vmem:[%s9199_s1 + $0x310] sm:$0xff]  }
 0x1b7   : > { %6557 = vmatpush3.bf16.msra.mxu1 %v7329_v32  ;;  %6579 = vmatpush3.bf16.msra.mxu0 %v7330_v33  ;;  %v7390_v32 = vld [vmem:[%s9199_s1 + $0x390] sm:$0xff]   ;;  %v7391_v33 = vld [vmem:[%s9199_s1 + $0x358] sm:$0xff]  }
 0x1b8   : > { %6558 = vmatprep.subr.bf16.mxu1 %v7331_v34  ;;  %6580 = vmatprep.subr.bf16.mxu0 %v7332_v35  ;;  %v7392_v34 = vld [vmem:[%s9199_s1 + $0x3d8] sm:$0xff]  }
 0x1b9   : > { %v7393_v35 = vld [vmem:[%s9199_s1 + $0x318] sm:$0xff]  }
 0x1bb   : > { %6559 = vmatpush3.bf16.msra.mxu1 %v7333_v36  ;;  %6581 = vmatpush3.bf16.msra.mxu0 %v7334_v37  ;;  %v7394_v36 = vld [vmem:[%s9199_s1 + $0x398] sm:$0xff]   ;;  %v7395_v37 = vld [vmem:[%s9199_s1 + $0x360] sm:$0xff]  }
 0x1bc   : > { %6560 = vmatprep.subr.bf16.mxu1 %v7335_v38  ;;  %6582 = vmatprep.subr.bf16.mxu0 %v7336_v39  ;;  %v7396_v38 = vld [vmem:[%s9199_s1 + $0x3e0] sm:$0xff]  }
 0x1bd   : > { %v7397_v39 = vld [vmem:[%s9199_s1 + $0x320] sm:$0xff]  }
 0x1bf   : > { %6561 = vmatpush3.bf16.msra.mxu1 %v7337_v40  ;;  %6583 = vmatpush3.bf16.msra.mxu0 %v7338_v41  ;;  %v7398_v40 = vld [vmem:[%s9199_s1 + $0x3a0] sm:$0xff]   ;;  %v7399_v41 = vld [vmem:[%s9199_s1 + $0x368] sm:$0xff]  }
 0x1c0   : > { %6562 = vmatprep.subr.bf16.mxu1 %v7339_v42  ;;  %6584 = vmatprep.subr.bf16.mxu0 %v7340_v43  ;;  %v7400_v42 = vld [vmem:[%s9199_s1 + $0x3e8] sm:$0xff]  }
 0x1c1   : > { %v7401_v43 = vld [vmem:[%s9199_s1 + $0x328] sm:$0xff]  }
 0x1c3   : > { %6563 = vmatpush3.bf16.msra.mxu1 %v7341_v44  ;;  %6585 = vmatpush3.bf16.msra.mxu0 %v7342_v45  ;;  %v7402_v44 = vld [vmem:[%s9199_s1 + $0x3a8] sm:$0xff]   ;;  %v7403_v45 = vld [vmem:[%s9199_s1 + $0x370] sm:$0xff]  }
 0x1c4   : > { %6564 = vmatprep.subr.bf16.mxu1 %v7343_v46  ;;  %6586 = vmatprep.subr.bf16.mxu0 %v7344_v47  ;;  %v7404_v46 = vld [vmem:[%s9199_s1 + $0x3f0] sm:$0xff]  }
 0x1c5   : > { %v7405_v47 = vld [vmem:[%s9199_s1 + $0x330] sm:$0xff]  }
 0x1c7   : > { %6565 = vmatpush3.bf16.msra.mxu1 %v7345_v48  ;;  %6587 = vmatpush3.bf16.msra.mxu0 %v7346_v49  ;;  %v7406_v48 = vld [vmem:[%s9199_s1 + $0x3b0] sm:$0xff]   ;;  %v7407_v49 = vld [vmem:[%s9199_s1 + $0x378] sm:$0xff]  }
 0x1c8   : > { %6594 = vmatprep.subr.bf16.mxu1 %v7347_v50  ;;  %6616 = vmatprep.subr.bf16.mxu0 %v7348_v51  ;;  %v7408_v50 = vld [vmem:[%s9199_s1 + $0x3f8] sm:$0xff]  }
 0x1c9   : > { %v7409_v51 = vld [vmem:[%s9199_s1 + $0x338] sm:$0xff]  }
 0x1ca   : > { %1331 = vmatmul.mubr.bf16.vlgmr.msra.gmra.mrb[4].mxu1 %v7839_v18  ;;  %1501 = vmatmul.mubr.bf16.vlgmr.msra.gmra.mrb[8].mxu0 %v7839_v18 }
 0x1cb   : > { %6595 = vmatpush3.bf16.msra.mxu1 %v7349_v52  ;;  %1670 = vmatprep.mubr.bf16.mxu1 %v7841_v19  ;;  %v7410_v52 = vld [vmem:[%s9199_s1 + $0x3b8] sm:$0xff]  }
 0x1cc   : > { %6617 = vmatpush3.bf16.msra.mxu0 %v7350_v53  ;;  %1840 = vmatprep.mubr.bf16.mxu0 %v7841_v19  ;;  %v7411_v53 = vld [vmem:[%s9199_s1 + $0x440] sm:$0xff]  }
 0x1cd   : > { %6596 = vmatprep.subr.bf16.mxu1 %v7351_v54  ;;  %6618 = vmatprep.subr.bf16.mxu0 %v7352_v55  ;;  %v7412_v54 = vld [vmem:[%s9199_s1 + $0x400] sm:$0xff]   ;;  %v7413_v55 = vld [vmem:[%s9199_s1 + $0x448] sm:$0xff]  }
 0x1cf   : > { %6597 = vmatpush3.bf16.msra.mxu1 %v7353_v56  ;;  %v7561_v56 = vmov 0.0  }
 0x1d0   : > { %6619 = vmatpush3.bf16.msra.mxu0 %v7354_v57  ;;  %6598 = vmatprep.subr.bf16.mxu1 %v7355_v58  ;;  %v7414_v57 = vld [vmem:[%s9199_s1 + $0x408] sm:$0xff]   ;;  %v7415_v58 = vld [vmem:[%s9199_s1 + $0x450] sm:$0xff]  }
 0x1d1   : > { %6620 = vmatprep.subr.bf16.mxu0 %v7356_v59  ;;  %v7416_v59 = vld [vmem:[%s9199_s1 + $0x410] sm:$0xff]  }
 0x1d3   : > { %6599 = vmatpush3.bf16.msra.mxu1 %v7357_v60  ;;  %v7417_v60 = vld [vmem:[%s9199_s1 + $0x458] sm:$0xff]  }
 0x1d4   : > { %6621 = vmatpush3.bf16.msra.mxu0 %v7358_v61  ;;  %6600 = vmatprep.subr.bf16.mxu1 %v7359_v62  ;;  %v7419_v61 = vld [vmem:[%s9199_s1 + $0x460] sm:$0xff]  }
 0x1d5   : > { %6622 = vmatprep.subr.bf16.mxu0 %v7360_v63  ;;  %v7420_v62 = vld [vmem:[%s9199_s1 + $0x420] sm:$0xff]   ;;  %v7421_v63 = vld [vmem:[%s9199_s1 + $0x468] sm:$0xff]  }
 0x1d7   : > { %6601 = vmatpush3.bf16.msra.mxu1 %v7361_v0  ;;  %v7422_v0 = vld [vmem:[%s9199_s1 + $0x428] sm:$0xff]  }
 0x1d8   : > { %6623 = vmatpush3.bf16.msra.mxu0 %v7362_v2  ;;  %6602 = vmatprep.subr.bf16.mxu1 %v7363_v3  ;;  %v7423_v2 = vld [vmem:[%s9199_s1 + $0x470] sm:$0xff]  }
 0x1d9   : > { %6624 = vmatprep.subr.bf16.mxu0 %v7364_v4  ;;  %v7424_v3 = vld [vmem:[%s9199_s1 + $0x430] sm:$0xff]   ;;  %v7425_v4 = vld [vmem:[%s9199_s1 + $0x478] sm:$0xff]  }
 0x1db   : > { %6603 = vmatpush3.bf16.msra.mxu1 %v7365_v5  ;;  %v7426_v5 = vld [vmem:[%s9199_s1 + $0x438] sm:$0xff]  }
 0x1dc   : > { %6625 = vmatpush3.bf16.msra.mxu0 %v7366_v6  ;;  %6604 = vmatprep.subr.bf16.mxu1 %v7367_v7 }
 0x1dd   : > { %6626 = vmatprep.subr.bf16.mxu0 %v7368_v8 }
 0x1df   : > { %6605 = vmatpush3.bf16.msra.mxu1 %v7369_v9 }
 0x1e0   : > { %6627 = vmatpush3.bf16.msra.mxu0 %v7370_v10  ;;  %6606 = vmatprep.subr.bf16.mxu1 %v7371_v11 }
 0x1e1   : > { %6628 = vmatprep.subr.bf16.mxu0 %v7372_v12 }
 0x1e3   : > { %6607 = vmatpush3.bf16.msra.mxu1 %v7373_v13 }
 0x1e4   : > { %6629 = vmatpush3.bf16.msra.mxu0 %v7374_v14  ;;  %6608 = vmatprep.subr.bf16.mxu1 %v7375_v15 }
 0x1e5   : > { %6630 = vmatprep.subr.bf16.mxu0 %v7376_v16 }
 0x1e7   : > { %6609 = vmatpush3.bf16.msra.mxu1 %v7377_v17 }
 0x1e8   : > { %6631 = vmatpush3.bf16.msra.mxu0 %v7378_v20  ;;  %6638 = vmatprep.subr.bf16.mxu1 %v7379_v21 }
 0x1e9   : > { %6660 = vmatprep.subr.bf16.mxu0 %v7380_v22 }
 0x1ea   : > { %1671 = vmatmul.mubr.bf16.vlgmr.msra.gmra.mrb[8].mxu1 %v7839_v18 }
 0x1eb   : > { %1841 = vmatmul.mubr.bf16.vlgmr.msra.gmra.mrb[12].mxu0 %v7839_v18  ;;  %6639 = vmatpush3.bf16.msra.mxu1 %v7381_v23 }
 0x1ec   : > { %2010 = vmatprep.mubr.bf16.mxu1 %v7841_v19  ;;  %6661 = vmatpush3.bf16.msra.mxu0 %v7382_v24 }
 0x1ed   : > { %2180 = vmatprep.mubr.bf16.mxu0 %v7841_v19  ;;  %6640 = vmatprep.subr.bf16.mxu1 %v7383_v25 }
 0x1ee   : > { %6662 = vmatprep.subr.bf16.mxu0 %v7384_v26 }
 0x1ef   : > { %6641 = vmatpush3.bf16.msra.mxu1 %v7385_v27 }
 0x1f0   : > { %6663 = vmatpush3.bf16.msra.mxu0 %v7386_v28  ;;  %6642 = vmatprep.subr.bf16.mxu1 %v7387_v29 }
 0x1f1   : > { %6664 = vmatprep.subr.bf16.mxu0 %v7388_v30 }
 0x1f3   : > { %6643 = vmatpush3.bf16.msra.mxu1 %v7389_v31 }
 0x1f4   : > { %6665 = vmatpush3.bf16.msra.mxu0 %v7390_v32  ;;  %6644 = vmatprep.subr.bf16.mxu1 %v7391_v33 }
 0x1f5   : > { %6666 = vmatprep.subr.bf16.mxu0 %v7392_v34 }
 0x1f7   : > { %6645 = vmatpush3.bf16.msra.mxu1 %v7393_v35 }
 0x1f8   : > { %6667 = vmatpush3.bf16.msra.mxu0 %v7394_v36  ;;  %6646 = vmatprep.subr.bf16.mxu1 %v7395_v37 }
 0x1f9   : > { %6668 = vmatprep.subr.bf16.mxu0 %v7396_v38 }
 0x1fb   : > { %6647 = vmatpush3.bf16.msra.mxu1 %v7397_v39 }
 0x1fc   : > { %6669 = vmatpush3.bf16.msra.mxu0 %v7398_v40  ;;  %6648 = vmatprep.subr.bf16.mxu1 %v7399_v41 }
 0x1fd   : > { %6670 = vmatprep.subr.bf16.mxu0 %v7400_v42 }
 0x1ff   : > { %6649 = vmatpush3.bf16.msra.mxu1 %v7401_v43 }
 0x200   : > { %6671 = vmatpush3.bf16.msra.mxu0 %v7402_v44  ;;  %6650 = vmatprep.subr.bf16.mxu1 %v7403_v45 }
 0x201   : > { %6672 = vmatprep.subr.bf16.mxu0 %v7404_v46 }
 0x203   : > { %6651 = vmatpush3.bf16.msra.mxu1 %v7405_v47 }
 0x204   : > { %6673 = vmatpush3.bf16.msra.mxu0 %v7406_v48  ;;  %6652 = vmatprep.subr.bf16.mxu1 %v7407_v49 }
 0x205   : > { %6674 = vmatprep.subr.bf16.mxu0 %v7408_v50 }
 0x207   : > { %6653 = vmatpush3.bf16.msra.mxu1 %v7409_v51 }
 0x208   : > { %6675 = vmatpush3.bf16.msra.mxu0 %v7410_v52  ;;  %6682 = vmatprep.subr.bf16.mxu1 %v7411_v53 }
 0x209   : > { %6961 = vmatprep.subr.bf16.mxu0 %v7561_v56 }
 0x20a   : > { %2011 = vmatmul.mubr.bf16.vlgmr.msra.gmra.mrb[12].mxu1 %v7839_v18 }
 0x20b   : > { %2181 = vmatmul.mubr.bf16.vlgmr.msra.gmra.mrb[16].mxu0 %v7839_v18  ;;  %6683 = vmatpush3.bf16.msra.mxu1 %v7412_v54 }
 0x20c   : > { %2350 = vmatprep.mubr.bf16.mxu1 %v7841_v19  ;;  %6684 = vmatprep.subr.bf16.mxu1 %v7413_v55  ;;  %v7418_v19 = vld [vmem:[%s9199_s1 + $0x418] sm:$0xff]  }
 0x20d   : > { %6971 = vmatprep.mubr.msk.bf16.mxu0 %vm7562_vm2, %v7561_v56 }
 0x20f   : > { %6685 = vmatpush3.bf16.msra.mxu1 %v7414_v57 }
 0x210   : > { %6686 = vmatprep.subr.bf16.mxu1 %v7415_v58 }
 0x213   : > { %6687 = vmatpush3.bf16.msra.mxu1 %v7416_v59 }
 0x214   : > { %6688 = vmatprep.subr.bf16.mxu1 %v7417_v60 }
 0x217   : > { %6689 = vmatpush3.bf16.msra.mxu1 %v7418_v19 }
 0x218   : > { %6690 = vmatprep.subr.bf16.mxu1 %v7419_v61 }
 0x21b   : > { %6691 = vmatpush3.bf16.msra.mxu1 %v7420_v62 }
 0x21c   : > { %6692 = vmatprep.subr.bf16.mxu1 %v7421_v63 }
 0x21f   : > { %6693 = vmatpush3.bf16.msra.mxu1 %v7422_v0 }
 0x220   : > { %6694 = vmatprep.subr.bf16.mxu1 %v7423_v2 }
 0x223   : > { %6695 = vmatpush3.bf16.msra.mxu1 %v7424_v3 }
 0x224   : > { %6696 = vmatprep.subr.bf16.mxu1 %v7425_v4  ;;  %v7427_v4 = vld [vmem:[%s9202_s26] sm:$0xff]  }
 0x227   : > { %6697 = vmatpush3.bf16.msra.mxu1 %v7426_v5  ;;  %v2380_v5 = vpop.permute.xlu1 %2379 }
 0x228   : > { %6987 = vmatprep.subr.bf16.mxu1 %v7561_v56 }
 0x22a   : > { %2351 = vmatmul.mubr.bf16.vlgmr.msra.gmra.mrb[16].mxu1 %v7839_v18 }
 0x22b   : > { %6995 = vmatprep.mubr.msk.bf16.mxu1 %vm7562_vm2, %v7561_v56 }
 0x27d   : > { %v6522_v6 = vpop.f32.mrb[0].mxu1  ;;  %v6544_v7 = vpop.f32.mrb[4].mxu0 }
 0x27e   : > { %v6523_v8 = vpop.f32.mrb[1].mxu1  ;;  %v6545_v9 = vpop.f32.mrb[5].mxu0 }
 0x27f   : > { %v6524_v10 = vadd.f32 %v6523_v8, %v6522_v6  ;;  %v6546_v11 = vadd.f32 %v6545_v9, %v6544_v7  ;;  %v6525_v12 = vpop.f32.mrb[2].mxu1  ;;  %v6547_v13 = vpop.f32.mrb[6].mxu0 }
 0x280   : > { %v6526_v14 = vpop.f32.mrb[3].mxu1  ;;  %v6548_v15 = vpop.f32.mrb[7].mxu0 }
 0x281   : > { %998 = vst.msk [vmem:[#allocation2] sm:$0xff] %vm997_vm1, %v6524_v10  ;;  %1168 = vst.msk [vmem:[#allocation2 + $0x8] sm:$0xff] %vm997_vm1, %v6546_v11  ;;  %v2385_v9 = vpop.permute.xlu1 %2384 }
 0x288   : > { %v2361_v16 = vld [vmem:[#allocation2] sm:$0xff]  ;;  %v2362_v17 = vld [vmem:[#allocation2 + $0x8] sm:$0xff] }
 0x289   : > { %v2370_v20 = vpack.c.bf16 %v2362_v17, %v2361_v16 }
 0x28b   : > { %6962 = vmatpush3.bf16.msra.mxu0 %v2370_v20 }
 0x28c   : > { %6963 = vmatprep.subr.bf16.mxu0 %v7561_v56 }
 0x29d   : > { %v6566_v18 = vpop.f32.mrb[4].mxu1  ;;  %v6588_v21 = vpop.f32.mrb[8].mxu0 }
 0x29e   : > { %v6567_v22 = vpop.f32.mrb[5].mxu1  ;;  %v6589_v23 = vpop.f32.mrb[9].mxu0 }
 0x29f   : > { %v6568_v24 = vadd.f32 %v6567_v22, %v6566_v18  ;;  %v6590_v25 = vadd.f32 %v6589_v23, %v6588_v21  ;;  %v6569_v26 = vpop.f32.mrb[6].mxu1  ;;  %v6591_v27 = vpop.f32.mrb[10].mxu0 }
 0x2a0   : > { %v6570_v28 = vpop.f32.mrb[7].mxu1  ;;  %v6592_v29 = vpop.f32.mrb[11].mxu0  ;;  %v3393_v26 = vld [vmem:[%s9174_s13] sm:$0xff]  ;;  %v3395_v27 = vld [vmem:[%s9174_s13 + $0x10] sm:$0xff] }
 0x2a1   : > { %1338 = vst.msk [vmem:[#allocation2 + $0x10] sm:$0xff] %vm997_vm1, %v6568_v24  ;;  %1508 = vst.msk [vmem:[#allocation2 + $0x18] sm:$0xff] %vm997_vm1, %v6590_v25  ;;  %v2491_v24 = vld [vmem:[%s9170_s9] sm:$0xff]  ;;  %v3227_v25 = vld [vmem:[%s9173_s12 + $0x18] sm:$0xff] }
 0x2a2   : > { %v2492_v28 = vld [vmem:[%s9170_s9 + $0x8] sm:$0xff]  ;;  %v3396_v29 = vld [vmem:[%s9174_s13 + $0x18] sm:$0xff] }
 0x2a8   : > { %v2363_v30 = vld [vmem:[#allocation2 + $0x10] sm:$0xff]  ;;  %v2364_v31 = vld [vmem:[#allocation2 + $0x18] sm:$0xff] }
 0x2a9   : > { %v2371_v32 = vpack.c.bf16 %v2364_v31, %v2363_v30  ;;  %v3224_v30 = vld [vmem:[%s9173_s12] sm:$0xff]  ;;  %v3422_v31 = vld [vmem:[%s9175_s14 + $0x8] sm:$0xff] }
 0x2ab   : > { %6964 = vmatpush3.bf16.msra.mxu0 %v2371_v32  ;;  %v7428_v32 = vld [vmem:[%s9171_s10] sm:$0xff]  }
 0x2ac   : > { %6965 = vmatprep.subr.bf16.mxu0 %v7561_v56 }
 0x2bd   : > { %v6610_v33 = vpop.f32.mrb[8].mxu1 }
 0x2be   : > { %v6632_v34 = vpop.f32.mrb[12].mxu0  ;;  %v6611_v35 = vpop.f32.mrb[9].mxu1 }
 0x2bf   : > { %v6612_v36 = vadd.f32 %v6611_v35, %v6610_v33  ;;  %v6633_v37 = vpop.f32.mrb[13].mxu0  ;;  %v6613_v38 = vpop.f32.mrb[10].mxu1  ;;  %v7429_v33 = vld [vmem:[%s9171_s10 + $0x20] sm:$0xff]   ;;  %v7430_v35 = vld [vmem:[%s9171_s10 + $0x8] sm:$0xff]  }
 0x2c0   : > { %v6634_v39 = vadd.f32 %v6633_v37, %v6632_v34  ;;  %v6635_v40 = vpop.f32.mrb[14].mxu0  ;;  %v6614_v41 = vpop.f32.mrb[11].mxu1  ;;  %v3225_v34 = vld [vmem:[%s9173_s12 + $0x8] sm:$0xff]  ;;  %6988 = vmatpush3.bf16.msra.mxu1 %v7429_v33  ;;  %v3226_v37 = vld [vmem:[%s9173_s12 + $0x10] sm:$0xff] }
 0x2c1   : > { %1678 = vst.msk [vmem:[#allocation2 + $0x20] sm:$0xff] %vm997_vm1, %v6612_v36  ;;  %v6636_v42 = vpop.f32.mrb[15].mxu0  ;;  %6989 = vmatprep.subr.bf16.mxu1 %v7561_v56  ;;  %v7431_v36 = vld [vmem:[%s9171_s10 + $0x28] sm:$0xff]   ;;  %v7432_v38 = vld [vmem:[%s9171_s10 + $0x10] sm:$0xff]   ;;  %v7434_v41 = vld [vmem:[%s9171_s10 + $0x18] sm:$0xff]  }
 0x2c2   : > { %1848 = vst.msk [vmem:[#allocation2 + $0x28] sm:$0xff] %vm997_vm1, %v6634_v39  ;;  %v7433_v39 = vld [vmem:[%s9171_s10 + $0x30] sm:$0xff]   ;;  %v3394_v40 = vld [vmem:[%s9174_s13 + $0x8] sm:$0xff]  ;;  %v7435_v42 = vld [vmem:[%s9171_s10 + $0x38] sm:$0xff]  }
 0x2c3   : > { %v7456_v33 = vld [vmem:[%s9171_s10 + $0xd0] sm:$0xff]  }
 0x2c4   : > { %6990 = vmatpush3.bf16.msra.mxu1 %v7431_v36  ;;  %v7459_v36 = vld [vmem:[%s9171_s10 + $0xf8] sm:$0xff]  }
 0x2c5   : > { %6991 = vmatprep.subr.bf16.mxu1 %v7561_v56 }
 0x2c8   : > { %v2365_v43 = vld [vmem:[#allocation2 + $0x20] sm:$0xff]  ;;  %6992 = vmatpush3.bf16.msra.mxu1 %v7433_v39  ;;  %v7462_v39 = vld [vmem:[%s9171_s10 + $0x110] sm:$0xff]  }
 0x2c9   : > { %v2366_v44 = vld [vmem:[#allocation2 + $0x28] sm:$0xff]  ;;  %6993 = vmatprep.subr.bf16.mxu1 %v7561_v56 }
 0x2ca   : > { %v2372_v45 = vpack.c.bf16 %v2366_v44, %v2365_v43  ;;  %v3421_v43 = vld [vmem:[%s9175_s14] sm:$0xff]  ;;  %v2482_v44 = vpop.permute.xlu0 %2481 }
 0x2cc   : > { %6966 = vmatpush3.bf16.msra.mxu0 %v2372_v45  ;;  %6994 = vmatpush3.bf16.msra.mxu1 %v7435_v42 }
 0x2cd   : > { %6967 = vmatprep.subr.bf16.mxu0 %v7561_v56  ;;  %7011 = vmatprep.subr.bf16.mxu1 %v7561_v56 }
 0x2ce   : > { %v2487_v45 = vpop.permute.xlu0 %2486 }
 0x2dd   : > { %v6654_v46 = vpop.f32.mrb[12].mxu1 }
 0x2de   : > { %v6676_v47 = vpop.f32.mrb[16].mxu0  ;;  %v6655_v48 = vpop.f32.mrb[13].mxu1 }
 0x2df   : > { %v6656_v49 = vadd.f32 %v6655_v48, %v6654_v46  ;;  %v6677_v50 = vpop.f32.mrb[17].mxu0  ;;  %v6657_v51 = vpop.f32.mrb[14].mxu1 }
 0x2e0   : > { %v6678_v52 = vadd.f32 %v6677_v50, %v6676_v47  ;;  %v6679_v53 = vpop.f32.mrb[18].mxu0  ;;  %v6658_v54 = vpop.f32.mrb[15].mxu1 }
 0x2e1   : > { %2018 = vst.msk [vmem:[#allocation2 + $0x30] sm:$0xff] %vm997_vm1, %v6656_v49  ;;  %v6680_v55 = vpop.f32.mrb[19].mxu0 }
 0x2e2   : > { %2188 = vst.msk [vmem:[#allocation2 + $0x38] sm:$0xff] %vm997_vm1, %v6678_v52 }
 0x2e8   : > { %v2367_v57 = vld [vmem:[#allocation2 + $0x30] sm:$0xff] }
 0x2e9   : > { %v2368_v58 = vld [vmem:[#allocation2 + $0x38] sm:$0xff] }
 0x2ea   : > { %v2373_v59 = vpack.c.bf16 %v2368_v58, %v2367_v57 }
 0x2ec   : > { %6968 = vmatpush3.bf16.msra.mxu0 %v2373_v59 }
 0x2ed   : > { %6969 = vmatprep.subr.bf16.mxu0 %v7561_v56 }
 0x2fd   : > { %v6698_v60 = vpop.f32.mrb[16].mxu1 }
 0x2fe   : > { %v6699_v19 = vpop.f32.mrb[17].mxu1 }
 0x2ff   : > { %v6700_v61 = vadd.f32 %v6699_v19, %v6698_v60  ;;  %v6701_v62 = vpop.f32.mrb[18].mxu1 }
 0x300   : > { %v6702_v63 = vpop.f32.mrb[19].mxu1 }
 0x301   : > { %2358 = vst.msk [vmem:[#allocation2 + $0x40] sm:$0xff] %vm997_vm1, %v6700_v61 }
 0x308   : > { %v2369_v0 = vld [vmem:[#allocation2 + $0x40] sm:$0xff] }
 0x309   : > { %v2374_v2 = vpack.c.bf16 %v2369_v0, %v2369_v0 }
 0x30b   : > { %v2398_v3 = vsel %vm2396_vm3, %v2374_v2, 0 }
 0x30c   : > { %6970 = vmatpush3.bf16.msra.mxu0 %v2398_v3 }
 0x30d   : > { %6975 = vmatprep.subr.bf16.mxu0 %v7561_v56 }
 0x30f   : > { %6972 = vmatmul.mubr.msk.bf16.vlgmr.msra.gmra.mrb[20].mxu0 %vm2392_vm4, %v7427_v4 }
 0x310   : > { %6983 = vmatprep.mubr.msk.bf16.mxu0 %vm7562_vm2, %v7561_v56  ;;  %6976 = vmatpush3.bf16.msra.mxu0 %v7428_v32  ;;  %v7455_v32 = vld [vmem:[%s9171_s10 + $0xe8] sm:$0xff]  }
 0x311   : > { %6977 = vmatprep.subr.bf16.mxu0 %v7561_v56 }
 0x314   : > { %6978 = vmatpush3.bf16.msra.mxu0 %v7430_v35  ;;  %v7458_v35 = vld [vmem:[%s9171_s10 + $0xd8] sm:$0xff]  }
 0x315   : > { %6979 = vmatprep.subr.bf16.mxu0 %v7561_v56 }
 0x318   : > { %6980 = vmatpush3.bf16.msra.mxu0 %v7432_v38  ;;  %v7461_v38 = vld [vmem:[%s9171_s10 + $0x108] sm:$0xff]  }
 0x319   : > { %6981 = vmatprep.subr.bf16.mxu0 %v7561_v56 }
 0x31c   : > { %6982 = vmatpush3.bf16.msra.mxu0 %v7434_v41  ;;  %v7464_v41 = vld [vmem:[%s9172_s11 + $0x4] ss:$8 sps:$4 sm:$0xff]  }
 0x31d   : > { %6999 = vmatprep.subr.bf16.mxu0 %v7561_v56 }
 0x3e2   : > { %v2434_v6 = vpop.f32.mrb[20].mxu0 }
 0x3e3   : > { %v2435_v7 = vadd.f32 %v2434_v6, %v2380_v5  ;;  %v6973_v8 = vpop.f32.mrb[21].mxu0 }
 0x3e4   : > { %v2437_v10 = vpop.f32.mrb[22].mxu0 }
 0x3e5   : > { %v2441_v11 = vmul.f32 0.2, %v2435_v7  ;;  %v2438_v12 = vadd.f32 %v2437_v10, %v2385_v9  ;;  %v6974_v13 = vpop.f32.mrb[23].mxu0 }
 0x3e7   : > { %v8216_v14 = vmax.f32 %v2435_v7, %v2441_v11  ;;  %v2442_v15 = vmul.f32 0.2, %v2438_v12  ;;  %v7436_v11 = vld [vmem:[%s9171_s10 + $0x40] sm:$0xff]  }
 0x3e9   : > { %v8218_v16 = vmax.f32 %v2438_v12, %v2442_v15  ;;  %v2445_v17 = vsel %vm997_vm1, %v8216_v14, 0.0  ;;  %v2453_v18 = vmul.f32 %v8216_v14, %v8216_v14  ;;  %v7437_v12 = vld [vmem:[%s9171_s10 + $0x60] sm:$0xff]   ;;  %v7439_v15 = vld [vmem:[%s9171_s10 + $0x68] sm:$0xff]  }
 0x3ea   : > { %2446 = vadd.xlane.f32.xlu1 %v2445_v17  ;;  %v7441_v17 = vld [vmem:[%s9171_s10 + $0x70] sm:$0xff]  }
 0x3eb   : > { %v2448_v20 = vsel %vm997_vm1, %v8218_v16, 0.0  ;;  %v2455_v21 = vsel %vm997_vm1, %v2453_v18, 0.0  ;;  %v2454_v22 = vmul.f32 %v8218_v16, %v8218_v16  ;;  %v7443_v18 = vld [vmem:[%s9171_s10 + $0x78] sm:$0xff]  }
 0x3ec   : > { %2449 = vadd.xlane.f32.xlu0 %v2448_v20  ;;  %v7442_v20 = vld [vmem:[%s9171_s10 + $0x58] sm:$0xff]  }
 0x3ed   : > { %v2458_v23 = vsel %vm997_vm1, %v2454_v22, 0.0  ;;  %v7445_v22 = vld [vmem:[%s9171_s10 + $0xa0] sm:$0xff]  }
 0x3f0   : > { %2456 = vadd.xlane.f32.xlu0 %v2455_v21  ;;  %v7444_v21 = vld [vmem:[%s9171_s10 + $0x80] sm:$0xff]  }
 0x3f4   : > { %2459 = vadd.xlane.f32.xlu0 %v2458_v23  ;;  %v7446_v23 = vld [vmem:[%s9171_s10 + $0x88] sm:$0xff]  }
 0x3fb   : > { %2495 = vperm.xlu1 %7276, %v2491_v24   ;;  %v7447_v24 = vld [vmem:[%s9171_s10 + $0xa8] sm:$0xff]  }
 0x3ff   : > { %3245 = vperm.xlu1 %7276, %v3227_v25   ;;  %v7448_v25 = vld [vmem:[%s9171_s10 + $0x90] sm:$0xff]  }
 0x403   : > { %3399 = vperm.xlu1 %7276, %v3393_v26   ;;  %v7449_v26 = vld [vmem:[%s9171_s10 + $0xb0] sm:$0xff]  }
 0x407   : > { %3409 = vperm.xlu1 %7276, %v3395_v27   ;;  %v7450_v27 = vld [vmem:[%s9171_s10 + $0x98] sm:$0xff]  }
 0x40a   : > { %2500 = vperm.xlu0 %7275, %v2492_v28   ;;  %v7451_v28 = vld [vmem:[%s9171_s10 + $0xb8] sm:$0xff]  }
 0x40b   : > { %3414 = vperm.xlu1 %7276, %v3396_v29   ;;  %v7452_v29 = vld [vmem:[%s9171_s10 + $0xc0] sm:$0xff]  }
 0x40e   : > { %3230 = vperm.xlu0 %7275, %v3224_v30   ;;  %v7453_v30 = vld [vmem:[%s9171_s10 + $0xe0] sm:$0xff]  }
 0x40f   : > { %3432 = vperm.xlu1 %7276, %v3422_v31   ;;  %v7454_v31 = vld [vmem:[%s9171_s10 + $0xc8] sm:$0xff]  }
 0x412   : > { %3235 = vperm.xlu0 %7275, %v3225_v34   ;;  %v7457_v34 = vld [vmem:[%s9171_s10 + $0xf0] sm:$0xff]  }
 0x416   : > { %3240 = vperm.xlu0 %7275, %v3226_v37   ;;  %v7460_v37 = vld [vmem:[%s9171_s10 + $0x100] sm:$0xff]  }
 0x41a   : > { %3404 = vperm.xlu0 %7275, %v3394_v40   ;;  %v7463_v40 = vld [vmem:[%s9171_s10 + $0x118] sm:$0xff]  }
 0x41e   : > { %3427 = vperm.xlu0 %7275, %v3421_v43  }
 0x477   : > { %v2447_v46 = vpop.xlane.xlu1 %2446 }
 0x478   : > { %v2451_v48 = vmul.f32 0.015625, %v2447_v46 }
 0x479   : > { %v2450_v47 = vpop.xlane.xlu0 %2449 }
 0x47a   : > { %v2463_v50 = vmul.f32 %v2451_v48, %v2451_v48  ;;  %v2452_v51 = vmul.f32 0.015625, %v2450_v47  ;;  %v2469_v62 = vsub.f32 %v8216_v14, %v2451_v48  ;;  %v7438_v14 = vld [vmem:[%s9171_s10 + $0x48] sm:$0xff]  }
 0x47b   : > { %v2496_v7 = vpop.permute.xlu1 %2495 }
 0x47c   : > { %v2464_v55 = vmul.f32 %v2452_v51, %v2452_v51  ;;  %v2470_v2 = vsub.f32 %v8218_v16, %v2452_v51  ;;  %v7440_v16 = vld [vmem:[%s9171_s10 + $0x50] sm:$0xff]  }
 0x47d   : > { %v2457_v49 = vpop.xlane.xlu0 %2456 }
 0x47e   : > { %v2461_v52 = vmul.f32 0.015625, %v2457_v49 }
 0x480   : > { %v2465_v53 = vsub.f32 %v2461_v52, %v2463_v50 }
 0x481   : > { %v2460_v54 = vpop.xlane.xlu0 %2459 }
 0x482   : > { %v2467_v57 = vmax.f32 %v2465_v53, 0.0  ;;  %v2462_v58 = vmul.f32 0.015625, %v2460_v54 }
 0x484   : > { %v2471_v59 = vadd.f32 1e-05, %v2467_v57  ;;  %v2466_v60 = vsub.f32 %v2462_v58, %v2464_v55 }
 0x486   : > { %7524 = vrsqrt.f32 %v2471_v59  ;;  %v2468_v19 = vmax.f32 %v2466_v60, 0.0 }
 0x488   : > { %v2472_v61 = vadd.f32 1e-05, %v2468_v19 }
 0x489   : > { %v2501_v8 = vpop.permute.xlu0 %2500 }
 0x48a   : > { %7526 = vrsqrt.f32 %v2472_v61 }
 0x490   : > { %v7525_v63 = vpop.eup %7524 }
 0x491   : > { %v2475_v0 = vmul.f32 %v7525_v63, %v2469_v62 }
 0x493   : > { %v2489_v5 = vmul.f32 %v2482_v44, %v2475_v0 }
 0x494   : > { %v7527_v3 = vpop.eup %7526 }
 0x495   : > { %v2476_v4 = vmul.f32 %v7527_v3, %v2470_v2  ;;  %v2503_v9 = vadd.f32 %v2496_v7, %v2489_v5 }
 0x497   : > { %v2490_v6 = vmul.f32 %v2487_v45, %v2476_v4 }
 0x499   : > { %v2504_v10 = vadd.f32 %v2501_v8, %v2490_v6 }
 0x49b   : > { %v8306_v13 = vpack.c.bf16 %v2504_v10, %v2503_v9 }
 0x49d   : > { %6984 = vmatmul.mubr.msk.bf16.vlgmr.msra.gmra.mrb[24].mxu0 %vm997_vm1, %v8306_v13  ;;  %6996 = vmatmul.mubr.msk.bf16.vlgmr.msra.gmra.mrb[20].mxu1 %vm997_vm1, %v8306_v13 }
 0x49e   : > { %7000 = vmatpush3.bf16.msra.mxu0 %v7436_v11  ;;  %7012 = vmatpush3.bf16.msra.mxu1 %v7437_v12 }
 0x49f   : > { %7001 = vmatprep.subr.bf16.mxu0 %v7561_v56  ;;  %7013 = vmatprep.subr.bf16.mxu1 %v7561_v56 }
 0x4a0   : > { %7007 = vmatprep.mubr.msk.bf16.mxu0 %vm7562_vm2, %v7561_v56  ;;  %7019 = vmatprep.mubr.msk.bf16.mxu1 %vm7562_vm2, %v7561_v56 }
 0x4a2   : > { %7002 = vmatpush3.bf16.msra.mxu0 %v7438_v14  ;;  %7014 = vmatpush3.bf16.msra.mxu1 %v7439_v15 }
 0x4a3   : > { %7003 = vmatprep.subr.bf16.mxu0 %v7561_v56  ;;  %7015 = vmatprep.subr.bf16.mxu1 %v7561_v56 }
 0x4a6   : > { %7004 = vmatpush3.bf16.msra.mxu0 %v7440_v16  ;;  %7016 = vmatpush3.bf16.msra.mxu1 %v7441_v17 }
 0x4a7   : > { %7005 = vmatprep.subr.bf16.mxu0 %v7561_v56  ;;  %7017 = vmatprep.subr.bf16.mxu1 %v7561_v56 }
 0x4aa   : > { %7006 = vmatpush3.bf16.msra.mxu0 %v7442_v20  ;;  %7018 = vmatpush3.bf16.msra.mxu1 %v7443_v18 }
 0x4ab   : > { %7023 = vmatprep.subr.bf16.mxu0 %v7561_v56  ;;  %7035 = vmatprep.subr.bf16.mxu1 %v7561_v56 }
 0x4ad   : > { %7008 = vmatmul.mubr.msk.bf16.vlgmr.msra.gmra.mrb[28].mxu0 %vm997_vm1, %v8306_v13  ;;  %7020 = vmatmul.mubr.msk.bf16.vlgmr.msra.gmra.mrb[24].mxu1 %vm997_vm1, %v8306_v13 }
 0x4ae   : > { %7024 = vmatpush3.bf16.msra.mxu0 %v7444_v21  ;;  %7036 = vmatpush3.bf16.msra.mxu1 %v7445_v22 }
 0x4af   : > { %7025 = vmatprep.subr.bf16.mxu0 %v7561_v56  ;;  %7037 = vmatprep.subr.bf16.mxu1 %v7561_v56 }
 0x4b0   : > { %7031 = vmatprep.mubr.msk.bf16.mxu0 %vm7562_vm2, %v7561_v56  ;;  %7043 = vmatprep.mubr.msk.bf16.mxu1 %vm7562_vm2, %v7561_v56 }
 0x4b2   : > { %7026 = vmatpush3.bf16.msra.mxu0 %v7446_v23  ;;  %7038 = vmatpush3.bf16.msra.mxu1 %v7447_v24 }
 0x4b3   : > { %7027 = vmatprep.subr.bf16.mxu0 %v7561_v56  ;;  %7039 = vmatprep.subr.bf16.mxu1 %v7561_v56 }
 0x4b6   : > { %7028 = vmatpush3.bf16.msra.mxu0 %v7448_v25  ;;  %7040 = vmatpush3.bf16.msra.mxu1 %v7449_v26 }
 0x4b7   : > { %7029 = vmatprep.subr.bf16.mxu0 %v7561_v56  ;;  %7041 = vmatprep.subr.bf16.mxu1 %v7561_v56 }
 0x4ba   : > { %7030 = vmatpush3.bf16.msra.mxu0 %v7450_v27  ;;  %7042 = vmatpush3.bf16.msra.mxu1 %v7451_v28 }
 0x4bb   : > { %7047 = vmatprep.subr.bf16.mxu0 %v7561_v56  ;;  %7059 = vmatprep.subr.bf16.mxu1 %v7561_v56 }
 0x4bd   : > { %7032 = vmatmul.mubr.msk.bf16.vlgmr.msra.gmra.mrb[32].mxu0 %vm997_vm1, %v8306_v13  ;;  %7044 = vmatmul.mubr.msk.bf16.vlgmr.msra.gmra.mrb[28].mxu1 %vm997_vm1, %v8306_v13 }
 0x4be   : > { %7048 = vmatpush3.bf16.msra.mxu0 %v7452_v29  ;;  %7060 = vmatpush3.bf16.msra.mxu1 %v7453_v30 }
 0x4bf   : > { %7049 = vmatprep.subr.bf16.mxu0 %v7561_v56  ;;  %7061 = vmatprep.subr.bf16.mxu1 %v7561_v56 }
 0x4c0   : > { %7055 = vmatprep.mubr.msk.bf16.mxu0 %vm7562_vm2, %v7561_v56  ;;  %7067 = vmatprep.mubr.msk.bf16.mxu1 %vm7562_vm2, %v7561_v56 }
 0x4c2   : > { %7050 = vmatpush3.bf16.msra.mxu0 %v7454_v31  ;;  %7062 = vmatpush3.bf16.msra.mxu1 %v7455_v32 }
 0x4c3   : > { %7051 = vmatprep.subr.bf16.mxu0 %v7561_v56  ;;  %7063 = vmatprep.subr.bf16.mxu1 %v7561_v56 }
 0x4c6   : > { %7052 = vmatpush3.bf16.msra.mxu0 %v7456_v33  ;;  %7064 = vmatpush3.bf16.msra.mxu1 %v7457_v34 }
 0x4c7   : > { %7053 = vmatprep.subr.bf16.mxu0 %v7561_v56  ;;  %7065 = vmatprep.subr.bf16.mxu1 %v7561_v56 }
 0x4ca   : > { %7054 = vmatpush3.bf16.msra.mxu0 %v7458_v35  ;;  %7066 = vmatpush3.bf16.msra.mxu1 %v7459_v36 }
 0x4cb   : > { %7071 = vmatprep.subr.bf16.mxu0 %v7561_v56  ;;  %3272 = vmatprep.subr.bf16.mxu1 %v7560_v1 }
 0x4cd   : > { %7056 = vmatmul.mubr.msk.bf16.vlgmr.msra.gmra.mrb[36].mxu0 %vm997_vm1, %v8306_v13  ;;  %7068 = vmatmul.mubr.msk.bf16.vlgmr.msra.gmra.mrb[32].mxu1 %vm997_vm1, %v8306_v13 }
 0x4ce   : > { %7072 = vmatpush3.bf16.msra.mxu0 %v7460_v37  ;;  %7079 = vmatprep.mubr.msk.bf16.mxu0 %vm7562_vm2, %v7561_v56 }
 0x4cf   : > { %7073 = vmatprep.subr.bf16.mxu0 %v7561_v56  ;;  %6373 = vmatprep.mubr.msk.bf16.mxu1 %vm2582_vm5, %v7464_v41 }
 0x4d2   : > { %7074 = vmatpush3.bf16.msra.mxu0 %v7461_v38 }
 0x4d3   : > { %7075 = vmatprep.subr.bf16.mxu0 %v7561_v56 }
 0x4d6   : > { %7076 = vmatpush3.bf16.msra.mxu0 %v7462_v39 }
 0x4d7   : > { %7077 = vmatprep.subr.bf16.mxu0 %v7561_v56 }
 0x4da   : > { %7078 = vmatpush3.bf16.msra.mxu0 %v7463_v40 }
 0x4dd   : > { %7080 = vmatmul.mubr.msk.bf16.vlgmr.msra.gmra.mrb[40].mxu0 %vm997_vm1, %v8306_v13 }
 0x570   : > { %v2575_v42 = vpop.f32.mrb[24].mxu0  ;;  %v2652_v43 = vpop.f32.mrb[20].mxu1 }
 0x571   : > { %2583 = vst.msk [vmem:[#allocation3] sm:$0xff] %vm2582_vm5, %v2575_v42  ;;  %2659 = vst.msk [vmem:[#allocation3 + $0x10] sm:$0xff] %vm2582_vm5, %v2652_v43  ;;  %v6985_v44 = vpop.f32.mrb[25].mxu0  ;;  %v6997_v45 = vpop.f32.mrb[21].mxu1  ;;  %v7466_v42 = vld [vmem:[%s9172_s11] ss:$8 sps:$4 sm:$0xff]  }
 0x572   : > { %v2578_v56 = vpop.f32.mrb[26].mxu0  ;;  %v2655_v46 = vpop.f32.mrb[22].mxu1  ;;  %v7467_v43 = vld [vmem:[%s9172_s11 + $0x14] ss:$8 sps:$4 sm:$0xff]  }
 0x573   : > { %2584 = vst.msk [vmem:[#allocation3 + $0x8] sm:$0xff] %vm2582_vm5, %v2578_v56  ;;  %2660 = vst.msk [vmem:[#allocation3 + $0x18] sm:$0xff] %vm2582_vm5, %v2655_v46  ;;  %v6986_v47 = vpop.f32.mrb[27].mxu0  ;;  %v6998_v48 = vpop.f32.mrb[23].mxu1 }
 0x574   : > { %v3231_v44 = vpop.permute.xlu0 %3230 }
 0x578   : > { %v3197_v49 = vld [vmem:[#allocation3] sm:$0xff]  ;;  %v3199_v53 = vld [vmem:[#allocation3 + $0x10] sm:$0xff]  ;;  %v3236_v47 = vpop.permute.xlu0 %3235 }
 0x57a   : > { %v3198_v50 = vld [vmem:[#allocation3 + $0x8] sm:$0xff]  ;;  %v3200_v52 = vld [vmem:[#allocation3 + $0x18] sm:$0xff] }
 0x57b   : > { %v3215_v51 = vpack.c.bf16 %v3198_v50, %v3197_v49  ;;  %v3216_v54 = vpack.c.bf16 %v3200_v52, %v3199_v53 }
 0x57d   : > { %3273 = vmatpush1.bf16.msra.mxu1 %v3215_v51 }
 0x57e   : > { %3274 = vmatprep.subr.bf16.mxu1 %v7560_v1 }
 0x580   : > { %v2728_v55 = vpop.f32.mrb[28].mxu0  ;;  %v2804_v57 = vpop.f32.mrb[24].mxu1 }
 0x581   : > { %2735 = vst.msk [vmem:[#allocation3 + $0x20] sm:$0xff] %vm2582_vm5, %v2728_v55  ;;  %2811 = vst.msk [vmem:[#allocation3 + $0x30] sm:$0xff] %vm2582_vm5, %v2804_v57  ;;  %v7009_v58 = vpop.f32.mrb[29].mxu0  ;;  %v7021_v59 = vpop.f32.mrb[25].mxu1  ;;  %3275 = vmatpush1.bf16.msra.mxu1 %v3216_v54 }
 0x582   : > { %v2731_v60 = vpop.f32.mrb[30].mxu0  ;;  %v2807_v19 = vpop.f32.mrb[26].mxu1  ;;  %3276 = vmatprep.subr.bf16.mxu1 %v7560_v1 }
 0x583   : > { %2736 = vst.msk [vmem:[#allocation3 + $0x28] sm:$0xff] %vm2582_vm5, %v2731_v60  ;;  %2812 = vst.msk [vmem:[#allocation3 + $0x38] sm:$0xff] %vm2582_vm5, %v2807_v19  ;;  %v7010_v61 = vpop.f32.mrb[31].mxu0  ;;  %v7022_v62 = vpop.f32.mrb[27].mxu1 }
 0x584   : > { %v3241_v57 = vpop.permute.xlu0 %3240 }
 0x588   : > { %v3201_v63 = vld [vmem:[#allocation3 + $0x20] sm:$0xff]  ;;  %v3203_v4 = vld [vmem:[#allocation3 + $0x30] sm:$0xff] }
 0x58a   : > { %v3202_v0 = vld [vmem:[#allocation3 + $0x28] sm:$0xff]  ;;  %v3204_v3 = vld [vmem:[#allocation3 + $0x38] sm:$0xff] }
 0x58b   : > { %v3217_v2 = vpack.c.bf16 %v3202_v0, %v3201_v63  ;;  %v3218_v5 = vpack.c.bf16 %v3204_v3, %v3203_v4  ;;  %v3246_v63 = vpop.permute.xlu1 %3245 }
 0x58d   : > { %3277 = vmatpush1.bf16.msra.mxu1 %v3217_v2 }
 0x58e   : > { %3278 = vmatprep.subr.bf16.mxu1 %v7560_v1 }
 0x590   : > { %v2880_v6 = vpop.f32.mrb[32].mxu0  ;;  %v2956_v7 = vpop.f32.mrb[28].mxu1 }
 0x591   : > { %2887 = vst.msk [vmem:[#allocation3 + $0x40] sm:$0xff] %vm2582_vm5, %v2880_v6  ;;  %2963 = vst.msk [vmem:[#allocation3 + $0x50] sm:$0xff] %vm2582_vm5, %v2956_v7  ;;  %v7033_v8 = vpop.f32.mrb[33].mxu0  ;;  %v7045_v9 = vpop.f32.mrb[29].mxu1  ;;  %3279 = vmatpush1.bf16.msra.mxu1 %v3218_v5 }
 0x592   : > { %v2883_v10 = vpop.f32.mrb[34].mxu0  ;;  %v2959_v11 = vpop.f32.mrb[30].mxu1  ;;  %3280 = vmatprep.subr.bf16.mxu1 %v7560_v1 }
 0x593   : > { %2888 = vst.msk [vmem:[#allocation3 + $0x48] sm:$0xff] %vm2582_vm5, %v2883_v10  ;;  %2964 = vst.msk [vmem:[#allocation3 + $0x58] sm:$0xff] %vm2582_vm5, %v2959_v11  ;;  %v7034_v12 = vpop.f32.mrb[35].mxu0  ;;  %v7046_v13 = vpop.f32.mrb[31].mxu1 }
 0x598   : > { %v3205_v14 = vld [vmem:[#allocation3 + $0x40] sm:$0xff]  ;;  %v3207_v20 = vld [vmem:[#allocation3 + $0x50] sm:$0xff] }
 0x59a   : > { %v3206_v15 = vld [vmem:[#allocation3 + $0x48] sm:$0xff]  ;;  %v3208_v17 = vld [vmem:[#allocation3 + $0x58] sm:$0xff] }
 0x59b   : > { %v3219_v16 = vpack.c.bf16 %v3206_v15, %v3205_v14  ;;  %v3220_v18 = vpack.c.bf16 %v3208_v17, %v3207_v20  ;;  %v4086_v17 = vld [vmem:[%s9178_s17 + $0x8] sm:$0xff]  ;;  %v4088_v20 = vld [vmem:[%s9178_s17 + $0x18] sm:$0xff] }
 0x59d   : > { %3281 = vmatpush1.bf16.msra.mxu1 %v3219_v16  ;;  %v3424_v16 = vld [vmem:[%s9175_s14 + $0x18] sm:$0xff] }
 0x59e   : > { %3282 = vmatprep.subr.bf16.mxu1 %v7560_v1 }
 0x5a0   : > { %v3032_v21 = vpop.f32.mrb[36].mxu0  ;;  %v3108_v22 = vpop.f32.mrb[32].mxu1 }
 0x5a1   : > { %3039 = vst.msk [vmem:[#allocation3 + $0x60] sm:$0xff] %vm2582_vm5, %v3032_v21  ;;  %3115 = vst.msk [vmem:[#allocation3 + $0x70] sm:$0xff] %vm2582_vm5, %v3108_v22  ;;  %v7057_v23 = vpop.f32.mrb[37].mxu0  ;;  %v7069_v24 = vpop.f32.mrb[33].mxu1  ;;  %3283 = vmatpush1.bf16.msra.mxu1 %v3220_v18  ;;  %v3423_v18 = vld [vmem:[%s9175_s14 + $0x10] sm:$0xff]  ;;  %v4090_v21 = vld [vmem:[%s9178_s17 + $0x28] sm:$0xff] }
 0x5a2   : > { %v3035_v25 = vpop.f32.mrb[38].mxu0  ;;  %v3111_v26 = vpop.f32.mrb[34].mxu1  ;;  %3284 = vmatprep.subr.bf16.mxu1 %v7560_v1  ;;  %v4085_v22 = vld [vmem:[%s9178_s17] sm:$0xff]  ;;  %v4092_v23 = vld [vmem:[%s9178_s17 + $0x38] sm:$0xff]  ;;  %v4087_v24 = vld [vmem:[%s9178_s17 + $0x10] sm:$0xff] }
 0x5a3   : > { %3040 = vst.msk [vmem:[#allocation3 + $0x68] sm:$0xff] %vm2582_vm5, %v3035_v25  ;;  %3116 = vst.msk [vmem:[#allocation3 + $0x78] sm:$0xff] %vm2582_vm5, %v3111_v26  ;;  %v7058_v27 = vpop.f32.mrb[39].mxu0  ;;  %v7070_v28 = vpop.f32.mrb[35].mxu1  ;;  %v4479_v25 = vld [vmem:[%s9179_s18] sm:$0xff] }
 0x5a4   : > { %v4089_v26 = vld [vmem:[%s9178_s17 + $0x20] sm:$0xff]  ;;  %v4481_v27 = vld [vmem:[%s9179_s18 + $0x10] sm:$0xff] }
 0x5a5   : > { %v4091_v28 = vld [vmem:[%s9178_s17 + $0x30] sm:$0xff] }
 0x5a8   : > { %v3209_v29 = vld [vmem:[#allocation3 + $0x60] sm:$0xff]  ;;  %v3211_v33 = vld [vmem:[#allocation3 + $0x70] sm:$0xff] }
 0x5aa   : > { %v3210_v30 = vld [vmem:[#allocation3 + $0x68] sm:$0xff]  ;;  %v3212_v32 = vld [vmem:[#allocation3 + $0x78] sm:$0xff] }
 0x5ab   : > { %v3221_v31 = vpack.c.bf16 %v3210_v30, %v3209_v29  ;;  %v3222_v34 = vpack.c.bf16 %v3212_v32, %v3211_v33  ;;  %v4482_v29 = vld [vmem:[%s9179_s18 + $0x18] sm:$0xff]  ;;  %v7470_v30 = vld [vmem:[%s9176_s15] sm:$0xff]   ;;  %v4480_v32 = vld [vmem:[%s9179_s18 + $0x8] sm:$0xff] }
 0x5ac   : > { %7083 = vmatprep.subr.bf16.mxu0 %v7470_v30  ;;  %v8564_v33 = vld [vmem:[%s9176_s15 + $0x8] sm:$0xff]  }
 0x5ad   : > { %3285 = vmatpush1.bf16.msra.mxu1 %v3221_v31  ;;  %v7471_v31 = vld [vmem:[%s9176_s15 + $0x28] sm:$0xff]   ;;  %7084 = vmatpush3.bf16.msra.mxu0 %v7470_v30 }
 0x5ae   : > { %3286 = vmatprep.subr.bf16.mxu1 %v7560_v1  ;;  %7089 = vmatprep.subr.bf16.mxu0 %v8564_v33 }
 0x5b0   : > { %v3184_v35 = vpop.f32.mrb[40].mxu0 }
 0x5b1   : > { %3191 = vst.msk [vmem:[#allocation3 + $0x80] sm:$0xff] %vm2582_vm5, %v3184_v35  ;;  %v7081_v36 = vpop.f32.mrb[41].mxu0  ;;  %3287 = vmatpush1.bf16.msra.mxu1 %v3222_v34  ;;  %v4536_v34 = vld [vmem:[%s9180_s19 + $0x8] sm:$0xff]  ;;  %v4535_v35 = vld [vmem:[%s9180_s19] sm:$0xff] }
 0x5b2   : > { %v3187_v37 = vpop.f32.mrb[42].mxu0  ;;  %3288 = vmatprep.subr.bf16.mxu1 %v7560_v1  ;;  %v7469_v1 = vld [vmem:[%s9172_s11 + $0x10] ss:$8 sps:$4 sm:$0xff]  }
 0x5b3   : > { %3192 = vst.msk [vmem:[#allocation3 + $0x88] sm:$0xff] %vm2582_vm5, %v3187_v37  ;;  %v7082_v38 = vpop.f32.mrb[43].mxu0  ;;  %v8576_v36 = vld [vmem:[%s9176_s15 + $0x38] sm:$0xff]  }
 0x5b4   : > { %v4538_v37 = vld [vmem:[%s9180_s19 + $0x18] sm:$0xff]  ;;  %v4537_v38 = vld [vmem:[%s9180_s19 + $0x10] sm:$0xff] }
 0x5b8   : > { %v3213_v39 = vld [vmem:[#allocation3 + $0x80] sm:$0xff] }
 0x5ba   : > { %v3214_v40 = vld [vmem:[#allocation3 + $0x88] sm:$0xff] }
 0x5bb   : > { %v3223_v41 = vpack.c.bf16 %v3214_v40, %v3213_v39  ;;  %v4484_v39 = vld [vmem:[%s9179_s18 + $0x28] sm:$0xff]  ;;  %v4483_v40 = vld [vmem:[%s9179_s18 + $0x20] sm:$0xff] }
 0x5bd   : > { %3289 = vmatpush1.bf16.msra.mxu1 %v3223_v41  ;;  %v4486_v41 = vld [vmem:[%s9179_s18 + $0x38] sm:$0xff] }
 0x5be   : > { %7113 = vmatprep.subr.bf16.mxu1 %v7471_v31 }
 0x5c0   : > { %3305 = vmatmul.mubr.bf16.vlgmr.msra.gmra.mrb[36].mxu1 %v7466_v42  ;;  %v4485_v42 = vld [vmem:[%s9179_s18 + $0x30] sm:$0xff] }
 0x5c1   : > { %6374 = vmatprep.mubr.msk.bf16.mxu1 %vm2582_vm5, %v7467_v43  ;;  %7114 = vmatpush3.bf16.msra.mxu1 %v7471_v31  ;;  %v4540_v43 = vld [vmem:[%s9180_s19 + $0x28] sm:$0xff] }
 0x5c2   : > { %7125 = vmatprep.subr.bf16.mxu1 %v8576_v36 }
 0x5c8   : > { %3313 = vmatmul.mubr.bf16.gmra.mrb[40].mxu1 %v7469_v1  ;;  %v4539_v1 = vld [vmem:[%s9180_s19 + $0x20] sm:$0xff] }
 0x693   : > { %v3306_v45 = vpop.f32.mrb[36].mxu1 }
 0x694   : > { %v3307_v56 = vadd.f32 %v3306_v45, %v3231_v44  ;;  %v3308_v46 = vpop.f32.mrb[37].mxu1  ;;  %v3400_v44 = vpop.permute.xlu1 %3399 }
 0x695   : > { %v3309_v48 = vpop.f32.mrb[38].mxu1 }
 0x696   : > { %v3321_v49 = vmul.f32 0.2, %v3307_v56  ;;  %v3310_v50 = vadd.f32 %v3309_v48, %v3236_v47  ;;  %v3311_v51 = vpop.f32.mrb[39].mxu1 }
 0x698   : > { %v8485_v52 = vmax.f32 %v3307_v56, %v3321_v49  ;;  %v3322_v53 = vmul.f32 0.2, %v3310_v50  ;;  %v3410_v45 = vpop.permute.xlu1 %3409  ;;  %v3405_v56 = vpop.permute.xlu0 %3404 }
 0x69a   : > { %v8487_v54 = vmax.f32 %v3310_v50, %v3322_v53  ;;  %v3329_v55 = vsel %vm2582_vm5, %v8485_v52, 0.0  ;;  %v3345_v62 = vmul.f32 %v8485_v52, %v8485_v52 }
 0x69b   : > { %v3314_v58 = vpop.f32.mrb[40].mxu1  ;;  %3330 = vadd.xlane.f32.xlu0 %v3329_v55 }
 0x69c   : > { %v3315_v59 = vadd.f32 %v3314_v58, %v3241_v57  ;;  %v3316_v60 = vpop.f32.mrb[41].mxu1  ;;  %v3332_v19 = vsel %vm2582_vm5, %v8487_v54, 0.0  ;;  %v3346_v61 = vmul.f32 %v8487_v54, %v8487_v54  ;;  %v3349_v8 = vsel %vm2582_vm5, %v3345_v62, 0.0  ;;  %v3415_v46 = vpop.permute.xlu1 %3414 }
 0x69d   : > { %v3317_v0 = vpop.f32.mrb[42].mxu1  ;;  %3333 = vadd.xlane.f32.xlu1 %v3332_v19  ;;  %v3428_v47 = vpop.permute.xlu0 %3427 }
 0x69e   : > { %v3323_v2 = vmul.f32 0.2, %v3315_v59  ;;  %v3318_v3 = vadd.f32 %v3317_v0, %v3246_v63  ;;  %v3319_v4 = vpop.f32.mrb[43].mxu1  ;;  %v3352_v5 = vsel %vm2582_vm5, %v3346_v61, 0.0 }
 0x69f   : > { %3353 = vadd.xlane.f32.xlu0 %v3352_v5 }
 0x6a0   : > { %v8498_v6 = vmax.f32 %v3315_v59, %v3323_v2  ;;  %v3324_v7 = vmul.f32 0.2, %v3318_v3  ;;  %v3433_v48 = vpop.permute.xlu1 %3432 }
 0x6a1   : > { %3350 = vadd.xlane.f32.xlu1 %v3349_v8 }
 0x6a2   : > { %v8501_v9 = vmax.f32 %v3318_v3, %v3324_v7  ;;  %v3335_v10 = vsel %vm2582_vm5, %v8498_v6, 0.0  ;;  %v3347_v11 = vmul.f32 %v8498_v6, %v8498_v6 }
 0x6a3   : > { %3336 = vadd.xlane.f32.xlu0 %v3335_v10 }
 0x6a4   : > { %v3355_v12 = vsel %vm2582_vm5, %v3347_v11, 0.0  ;;  %v3338_v13 = vsel %vm2582_vm5, %v8501_v9, 0.0  ;;  %v3348_v14 = vmul.f32 %v8501_v9, %v8501_v9 }
 0x6a5   : > { %3356 = vadd.xlane.f32.xlu1 %v3355_v12 }
 0x6a6   : > { %v3358_v15 = vsel %vm2582_vm5, %v3348_v14, 0.0 }
 0x6a7   : > { %3339 = vadd.xlane.f32.xlu0 %v3338_v13 }
 0x6ab   : > { %3359 = vadd.xlane.f32.xlu0 %v3358_v15 }
 0x6b6   : > { %3442 = vperm.xlu1 %7276, %v3424_v16  }
 0x6ba   : > { %4100 = vperm.xlu1 %7276, %v4086_v17  }
 0x6be   : > { %4110 = vperm.xlu1 %7276, %v4088_v20  }
 0x6c1   : > { %3437 = vperm.xlu0 %7275, %v3423_v18  }
 0x6c2   : > { %4120 = vperm.xlu1 %7276, %v4090_v21  }
 0x6c5   : > { %4095 = vperm.xlu0 %7275, %v4085_v22  }
 0x6c6   : > { %4130 = vperm.xlu1 %7276, %v4092_v23  }
 0x6c9   : > { %4105 = vperm.xlu0 %7275, %v4087_v24  }
 0x6ca   : > { %4489 = vperm.xlu1 %7276, %v4479_v25  }
 0x6cd   : > { %4115 = vperm.xlu0 %7275, %v4089_v26  }
 0x6ce   : > { %4499 = vperm.xlu1 %7276, %v4481_v27  }
 0x6d1   : > { %4125 = vperm.xlu0 %7275, %v4091_v28  }
 0x6d2   : > { %4504 = vperm.xlu1 %7276, %v4482_v29  }
 0x6d5   : > { %4494 = vperm.xlu0 %7275, %v4480_v32  }
 0x6d6   : > { %4550 = vperm.xlu1 %7276, %v4536_v34  }
 0x6d9   : > { %4545 = vperm.xlu0 %7275, %v4535_v35  }
 0x6da   : > { %4560 = vperm.xlu1 %7276, %v4538_v37  }
 0x6dd   : > { %4555 = vperm.xlu0 %7275, %v4537_v38  }
 0x6de   : > { %4514 = vperm.xlu1 %7276, %v4484_v39  }
 0x6e1   : > { %4509 = vperm.xlu0 %7275, %v4483_v40  }
 0x6e2   : > { %4524 = vperm.xlu1 %7276, %v4486_v41  }
 0x6e5   : > { %4519 = vperm.xlu0 %7275, %v4485_v42  }
 0x6e6   : > { %4570 = vperm.xlu1 %7276, %v4540_v43  }
 0x6e9   : > { %4565 = vperm.xlu0 %7275, %v4539_v1  }
 0x728   : > { %v3331_v49 = vpop.xlane.xlu0 %3330 }
 0x729   : > { %v3341_v51 = vmul.f32 0.0625, %v3331_v49 }
 0x72a   : > { %v3334_v50 = vpop.xlane.xlu1 %3333 }
 0x72b   : > { %v3342_v53 = vmul.f32 0.0625, %v3334_v50  ;;  %v3365_v60 = vmul.f32 %v3341_v51, %v3341_v51  ;;  %v3377_v25 = vsub.f32 %v8485_v52, %v3341_v51 }
 0x72c   : > { %v3354_v55 = vpop.xlane.xlu0 %3353 }
 0x72d   : > { %v3366_v57 = vmul.f32 %v3342_v53, %v3342_v53  ;;  %v3362_v58 = vmul.f32 0.0625, %v3354_v55  ;;  %v3378_v22 = vsub.f32 %v8487_v54, %v3342_v53 }
 0x72e   : > { %v3351_v59 = vpop.xlane.xlu1 %3350 }
 0x72f   : > { %v3370_v19 = vsub.f32 %v3362_v58, %v3366_v57  ;;  %v3361_v61 = vmul.f32 0.0625, %v3351_v59 }
 0x730   : > { %v3337_v62 = vpop.xlane.xlu0 %3336 }
 0x731   : > { %v3374_v63 = vmax.f32 %v3370_v19, 0.0  ;;  %v3369_v0 = vsub.f32 %v3361_v61, %v3365_v60  ;;  %v3343_v2 = vmul.f32 0.0625, %v3337_v62 }
 0x732   : > { %v3357_v3 = vpop.xlane.xlu1 %3356 }
 0x733   : > { %v3382_v4 = vadd.f32 1e-05, %v3374_v63  ;;  %v3373_v5 = vmax.f32 %v3369_v0, 0.0  ;;  %v3367_v7 = vmul.f32 %v3343_v2, %v3343_v2  ;;  %v3363_v8 = vmul.f32 0.0625, %v3357_v3 }
 0x734   : > { %v3340_v10 = vpop.xlane.xlu0 %3339  ;;  %v3379_v35 = vsub.f32 %v8498_v6, %v3343_v2  ;;  %v7474_v6 = vld [vmem:[%s9176_s15 + $0x10] sm:$0xff]  }
 0x735   : > { %7528 = vrsqrt.f32 %v3382_v4  ;;  %v3381_v11 = vadd.f32 1e-05, %v3373_v5  ;;  %v3344_v12 = vmul.f32 0.0625, %v3340_v10  ;;  %v3371_v13 = vsub.f32 %v3363_v8, %v3367_v7 }
 0x736   : > { %v3443_v42 = vpop.permute.xlu1 %3442 }
 0x737   : > { %7530 = vrsqrt.f32 %v3381_v11  ;;  %v3375_v14 = vmax.f32 %v3371_v13, 0.0  ;;  %v3368_v16 = vmul.f32 %v3344_v12, %v3344_v12  ;;  %v3380_v39 = vsub.f32 %v8501_v9, %v3344_v12  ;;  %v7475_v9 = vld [vmem:[%s9176_s15 + $0x18] sm:$0xff]  }
 0x738   : > { %v3360_v15 = vpop.xlane.xlu0 %3359 }
 0x739   : > { %v3364_v17 = vmul.f32 0.0625, %v3360_v15  ;;  %v3383_v20 = vadd.f32 1e-05, %v3375_v14 }
 0x73b   : > { %v3372_v18 = vsub.f32 %v3364_v17, %v3368_v16  ;;  %7532 = vrsqrt.f32 %v3383_v20 }
 0x73d   : > { %v3376_v21 = vmax.f32 %v3372_v18, 0.0 }
 0x73f   : > { %v7529_v23 = vpop.eup %7528  ;;  %v3384_v24 = vadd.f32 1e-05, %v3376_v21 }
 0x740   : > { %v3390_v26 = vmul.f32 %v7529_v23, %v3378_v22  ;;  %v3438_v43 = vpop.permute.xlu0 %3437 }
 0x741   : > { %v7531_v27 = vpop.eup %7530  ;;  %7534 = vrsqrt.f32 %v3384_v24 }
 0x742   : > { %v3418_v28 = vmul.f32 %v3405_v56, %v3390_v26  ;;  %v3389_v29 = vmul.f32 %v7531_v27, %v3377_v25 }
 0x744   : > { %v3417_v30 = vmul.f32 %v3400_v44, %v3389_v29  ;;  %v3446_v32 = vadd.f32 %v3433_v48, %v3418_v28 }
 0x745   : > { %v7533_v31 = vpop.eup %7532 }
 0x746   : > { %v3445_v34 = vadd.f32 %v3428_v47, %v3417_v30  ;;  %v3391_v38 = vmul.f32 %v7533_v31, %v3379_v35  ;;  %v7482_v47 = vld [vmem:[%s9177_s16 + $0x8] ss:$12 sps:$4 sm:$0xff]  }
 0x748   : > { %v3449_v37 = vpack.c.bf16 %v3446_v32, %v3445_v34  ;;  %v3419_v40 = vmul.f32 %v3410_v45, %v3391_v38  ;;  %v7478_v45 = vld [vmem:[%s9176_s15 + $0x40] sm:$0xff]  }
 0x74a   : > { %7085 = vmatprep.mubr.msk.bf16.mxu0 %vm2582_vm5, %v3449_v37  ;;  %7115 = vmatprep.mubr.msk.bf16.mxu1 %vm2582_vm5, %v3449_v37  ;;  %v3447_v44 = vadd.f32 %v3438_v43, %v3419_v40 }
 0x74b   : > { %v7535_v52 = vpop.eup %7534 }
 0x74c   : > { %v3392_v54 = vmul.f32 %v7535_v52, %v3380_v39 }
 0x74e   : > { %v3420_v41 = vmul.f32 %v3415_v46, %v3392_v54  ;;  %v7481_v46 = vld [vmem:[%s9177_s16 + $0x4] ss:$12 sps:$4 sm:$0xff]  }
 0x750   : > { %v3448_v1 = vadd.f32 %v3443_v42, %v3420_v41 }
 0x752   : > { %v3450_v56 = vpack.c.bf16 %v3448_v1, %v3447_v44 }
 0x754   : > { %7086 = vmatmul.mubr.msk.bf16.vlgmr.msra.gmra.mrb[44].mxu0 %vm2582_vm5, %v3450_v56  ;;  %7116 = vmatmul.mubr.msk.bf16.vlgmr.msra.gmra.mrb[44].mxu1 %vm2582_vm5, %v3450_v56 }
 0x755   : > { %7090 = vmatpush3.bf16.msra.mxu0 %v8564_v33  ;;  %7091 = vmatprep.mubr.msk.bf16.mxu0 %vm2582_vm5, %v3449_v37  ;;  %v7476_v33 = vld [vmem:[%s9176_s15 + $0x20] sm:$0xff]  }
 0x756   : > { %7127 = vmatprep.mubr.msk.bf16.mxu1 %vm2582_vm5, %v3449_v37  ;;  %7126 = vmatpush3.bf16.msra.mxu1 %v8576_v36  ;;  %v7477_v36 = vld [vmem:[%s9176_s15 + $0x30] sm:$0xff]  }
 0x757   : > { %7095 = vmatprep.subr.bf16.mxu0 %v7474_v6 }
 0x75c   : > { %7092 = vmatmul.mubr.msk.bf16.vlgmr.msra.gmra.mrb[48].mxu0 %vm2582_vm5, %v3450_v56  ;;  %7128 = vmatmul.mubr.msk.bf16.vlgmr.msra.gmra.mrb[48].mxu1 %vm2582_vm5, %v3450_v56 }
 0x75d   : > { %7096 = vmatpush3.bf16.msra.mxu0 %v7474_v6  ;;  %7097 = vmatprep.mubr.msk.bf16.mxu0 %vm2582_vm5, %v3449_v37 }
 0x75e   : > { %7101 = vmatprep.subr.bf16.mxu0 %v7475_v9  ;;  %4237 = vmatprep.mubr.bf16.mxu1 %v7481_v46 }
 0x764   : > { %7098 = vmatmul.mubr.msk.bf16.vlgmr.msra.gmra.mrb[52].mxu0 %vm2582_vm5, %v3450_v56 }
 0x765   : > { %7102 = vmatpush3.bf16.msra.mxu0 %v7475_v9  ;;  %7103 = vmatprep.mubr.msk.bf16.mxu0 %vm2582_vm5, %v3449_v37 }
 0x766   : > { %7107 = vmatprep.subr.bf16.mxu0 %v7476_v33 }
 0x76c   : > { %7104 = vmatmul.mubr.msk.bf16.vlgmr.msra.gmra.mrb[56].mxu0 %vm2582_vm5, %v3450_v56 }
 0x76d   : > { %7108 = vmatpush3.bf16.msra.mxu0 %v7476_v33  ;;  %7109 = vmatprep.mubr.msk.bf16.mxu0 %vm2582_vm5, %v3449_v37 }
 0x76e   : > { %7119 = vmatprep.subr.bf16.mxu0 %v7477_v36 }
 0x774   : > { %7110 = vmatmul.mubr.msk.bf16.vlgmr.msra.gmra.mrb[60].mxu0 %vm2582_vm5, %v3450_v56 }
 0x775   : > { %7121 = vmatprep.mubr.msk.bf16.mxu0 %vm2582_vm5, %v3449_v37  ;;  %7120 = vmatpush3.bf16.msra.mxu0 %v7477_v36 }
 0x776   : > { %7131 = vmatprep.subr.bf16.mxu0 %v7478_v45 }
 0x77c   : > { %7122 = vmatmul.mubr.msk.bf16.vlgmr.msra.gmra.mrb[64].mxu0 %vm2582_vm5, %v3450_v56 }
 0x77d   : > { %7133 = vmatprep.mubr.msk.bf16.mxu0 %vm2582_vm5, %v3449_v37  ;;  %7132 = vmatpush3.bf16.msra.mxu0 %v7478_v45 }
 0x784   : > { %7134 = vmatmul.mubr.msk.bf16.vlgmr.msra.gmra.mrb[68].mxu0 %vm2582_vm5, %v3450_v56 }
 0x785   : > { %7141 = vmatprep.mubr.msk.bf16.mxu0 %vm743_vm0, %v7482_v47 }
 0x827   : > { %v7087_v48 = vpop.f32.mrb[44].mxu0  ;;  %v7117_v49 = vpop.f32.mrb[44].mxu1 }
 0x828   : > { %3517 = vst.msk [vmem:[#allocation4 + $0x10] sm:$0xff] %vm3514_vm6, %v7087_v48  ;;  %3827 = vst.msk [vmem:[#allocation4 + $0xb0] sm:$0xff] %vm3514_vm6, %v7117_v49  ;;  %v3499_v50 = vpop.f32.mrb[45].mxu0  ;;  %v3810_v51 = vpop.f32.mrb[45].mxu1 }
 0x829   : > { %3515 = vst.msk [vmem:[#allocation4] sm:$0xff] %vm3514_vm6, %v3499_v50  ;;  %3825 = vst.msk [vmem:[#allocation4 + $0xa0] sm:$0xff] %vm3514_vm6, %v3810_v51  ;;  %v7088_v53 = vpop.f32.mrb[46].mxu0  ;;  %v7118_v55 = vpop.f32.mrb[46].mxu1 }
 0x82a   : > { %3518 = vst.msk [vmem:[#allocation4 + $0x18] sm:$0xff] %vm3514_vm6, %v7088_v53  ;;  %3828 = vst.msk [vmem:[#allocation4 + $0xb8] sm:$0xff] %vm3514_vm6, %v7118_v55  ;;  %v3502_v57 = vpop.f32.mrb[47].mxu0  ;;  %v3813_v58 = vpop.f32.mrb[47].mxu1 }
 0x82b   : > { %3516 = vst.msk [vmem:[#allocation4 + $0x8] sm:$0xff] %vm3514_vm6, %v3502_v57  ;;  %3826 = vst.msk [vmem:[#allocation4 + $0xa8] sm:$0xff] %vm3514_vm6, %v3813_v58 }
 0x82f   : > { %v7093_v59 = vpop.f32.mrb[48].mxu0  ;;  %v7129_v60 = vpop.f32.mrb[48].mxu1  ;;  %v4033_v35 = vld [vmem:[#allocation4 + $0x10] sm:$0xff] }
 0x830   : > { %3579 = vst.msk [vmem:[#allocation4 + $0x30] sm:$0xff] %vm3514_vm6, %v7093_v59  ;;  %3951 = vst.msk [vmem:[#allocation4 + $0xf0] sm:$0xff] %vm3514_vm6, %v7129_v60  ;;  %v3562_v19 = vpop.f32.mrb[49].mxu0  ;;  %v3934_v61 = vpop.f32.mrb[49].mxu1  ;;  %v4031_v27 = vld [vmem:[#allocation4] sm:$0xff]  ;;  %v4053_v44 = vld [vmem:[#allocation4 + $0xb0] sm:$0xff] }
 0x831   : > { %3577 = vst.msk [vmem:[#allocation4 + $0x20] sm:$0xff] %vm3514_vm6, %v3562_v19  ;;  %3949 = vst.msk [vmem:[#allocation4 + $0xe0] sm:$0xff] %vm3514_vm6, %v3934_v61  ;;  %v7094_v62 = vpop.f32.mrb[50].mxu0  ;;  %v7130_v63 = vpop.f32.mrb[50].mxu1  ;;  %v4034_v31 = vld [vmem:[#allocation4 + $0x18] sm:$0xff]  ;;  %v4051_v39 = vld [vmem:[#allocation4 + $0xa0] sm:$0xff] }
 0x832   : > { %3580 = vst.msk [vmem:[#allocation4 + $0x38] sm:$0xff] %vm3514_vm6, %v7094_v62  ;;  %3952 = vst.msk [vmem:[#allocation4 + $0xf8] sm:$0xff] %vm3514_vm6, %v7130_v63  ;;  %v3565_v0 = vpop.f32.mrb[51].mxu0  ;;  %v3937_v2 = vpop.f32.mrb[51].mxu1  ;;  %v4032_v21 = vld [vmem:[#allocation4 + $0x8] sm:$0xff]  ;;  %v4068_v38 = vpack.c.bf16 %v4034_v31, %v4033_v35  ;;  %v4054_v42 = vld [vmem:[#allocation4 + $0xb8] sm:$0xff] }
 0x833   : > { %3578 = vst.msk [vmem:[#allocation4 + $0x28] sm:$0xff] %vm3514_vm6, %v3565_v0  ;;  %3950 = vst.msk [vmem:[#allocation4 + $0xe8] sm:$0xff] %vm3514_vm6, %v3937_v2  ;;  %v4067_v28 = vpack.c.bf16 %v4032_v21, %v4031_v27  ;;  %v4052_v32 = vld [vmem:[#allocation4 + $0xa8] sm:$0xff]  ;;  %v4078_v56 = vpack.c.bf16 %v4054_v42, %v4053_v44  ;;  %v4101_v42 = vpop.permute.xlu1 %4100 }
 0x834   : > { %v4077_v54 = vpack.c.bf16 %v4052_v32, %v4051_v39  ;;  %v7486_v21 = vld [vmem:[%s9177_s16 + $0x18] ss:$12 sps:$4 sm:$0xff]  }
 0x837   : > { %v7099_v3 = vpop.f32.mrb[52].mxu0  ;;  %v4037_v33 = vld [vmem:[#allocation4 + $0x30] sm:$0xff] }
 0x838   : > { %3641 = vst.msk [vmem:[#allocation4 + $0x50] sm:$0xff] %vm3514_vm6, %v7099_v3  ;;  %v3624_v4 = vpop.f32.mrb[53].mxu0  ;;  %v4035_v43 = vld [vmem:[#allocation4 + $0x20] sm:$0xff] }
 0x839   : > { %3639 = vst.msk [vmem:[#allocation4 + $0x40] sm:$0xff] %vm3514_vm6, %v3624_v4  ;;  %v7100_v5 = vpop.f32.mrb[54].mxu0  ;;  %v4038_v6 = vld [vmem:[#allocation4 + $0x38] sm:$0xff]  ;;  %v4059_v2 = vld [vmem:[#allocation4 + $0xe0] sm:$0xff] }
 0x83a   : > { %3642 = vst.msk [vmem:[#allocation4 + $0x58] sm:$0xff] %vm3514_vm6, %v7100_v5  ;;  %v3627_v7 = vpop.f32.mrb[55].mxu0  ;;  %v4036_v40 = vld [vmem:[#allocation4 + $0x28] sm:$0xff]  ;;  %v4070_v36 = vpack.c.bf16 %v4038_v6, %v4037_v33 }
 0x83b   : > { %3640 = vst.msk [vmem:[#allocation4 + $0x48] sm:$0xff] %vm3514_vm6, %v3627_v7  ;;  %v4069_v1 = vpack.c.bf16 %v4036_v40, %v4035_v43  ;;  %v4060_v62 = vld [vmem:[#allocation4 + $0xe8] sm:$0xff]  ;;  %v4062_v7 = vld [vmem:[#allocation4 + $0xf8] sm:$0xff] }
 0x83c   : > { %v4081_v3 = vpack.c.bf16 %v4060_v62, %v4059_v2  ;;  %v7483_v5 = vld [vmem:[%s9177_s16 + $0x20] ss:$12 sps:$4 sm:$0xff]  }
 0x83f   : > { %v7105_v8 = vpop.f32.mrb[56].mxu0  ;;  %v4041_v63 = vld [vmem:[#allocation4 + $0x50] sm:$0xff] }
 0x840   : > { %3703 = vst.msk [vmem:[#allocation4 + $0x70] sm:$0xff] %vm3514_vm6, %v7105_v8  ;;  %v3686_v10 = vpop.f32.mrb[57].mxu0  ;;  %v4039_v55 = vld [vmem:[#allocation4 + $0x40] sm:$0xff] }
 0x841   : > { %3701 = vst.msk [vmem:[#allocation4 + $0x60] sm:$0xff] %vm3514_vm6, %v3686_v10  ;;  %v7106_v11 = vpop.f32.mrb[58].mxu0  ;;  %v4042_v61 = vld [vmem:[#allocation4 + $0x58] sm:$0xff]  ;;  %v7490_v8 = vld [vmem:[%s9177_s16 + $0x38] ss:$12 sps:$4 sm:$0xff]  }
 0x842   : > { %3704 = vst.msk [vmem:[#allocation4 + $0x78] sm:$0xff] %vm3514_vm6, %v7106_v11  ;;  %v3689_v12 = vpop.f32.mrb[59].mxu0  ;;  %v4040_v47 = vld [vmem:[#allocation4 + $0x48] sm:$0xff]  ;;  %v4072_v0 = vpack.c.bf16 %v4042_v61, %v4041_v63 }
 0x843   : > { %3702 = vst.msk [vmem:[#allocation4 + $0x68] sm:$0xff] %vm3514_vm6, %v3689_v12  ;;  %v4071_v57 = vpack.c.bf16 %v4040_v47, %v4039_v55  ;;  %v4061_v12 = vld [vmem:[#allocation4 + $0xf0] sm:$0xff]  ;;  %v4111_v55 = vpop.permute.xlu1 %4110 }
 0x847   : > { %v7111_v13 = vpop.f32.mrb[60].mxu0 }
 0x848   : > { %3765 = vst.msk [vmem:[#allocation4 + $0x90] sm:$0xff] %vm3514_vm6, %v7111_v13  ;;  %v3748_v14 = vpop.f32.mrb[61].mxu0  ;;  %v4043_v10 = vld [vmem:[#allocation4 + $0x60] sm:$0xff]  ;;  %v4082_v13 = vpack.c.bf16 %v4062_v7, %v4061_v12 }
 0x849   : > { %3763 = vst.msk [vmem:[#allocation4 + $0x80] sm:$0xff] %vm3514_vm6, %v3748_v14  ;;  %v7112_v15 = vpop.f32.mrb[62].mxu0  ;;  %v4046_v14 = vld [vmem:[#allocation4 + $0x78] sm:$0xff] }
 0x84a   : > { %3766 = vst.msk [vmem:[#allocation4 + $0x98] sm:$0xff] %vm3514_vm6, %v7112_v15  ;;  %v3751_v16 = vpop.f32.mrb[63].mxu0  ;;  %v4044_v4 = vld [vmem:[#allocation4 + $0x68] sm:$0xff]  ;;  %v4045_v15 = vld [vmem:[#allocation4 + $0x70] sm:$0xff] }
 0x84b   : > { %3764 = vst.msk [vmem:[#allocation4 + $0x88] sm:$0xff] %vm3514_vm6, %v3751_v16  ;;  %v4073_v11 = vpack.c.bf16 %v4044_v4, %v4043_v10  ;;  %v4074_v16 = vpack.c.bf16 %v4046_v14, %v4045_v15 }
 0x84f   : > { %v7123_v17 = vpop.f32.mrb[64].mxu0  ;;  %v4049_v29 = vld [vmem:[#allocation4 + $0x90] sm:$0xff] }
 0x850   : > { %3889 = vst.msk [vmem:[#allocation4 + $0xd0] sm:$0xff] %vm3514_vm6, %v7123_v17  ;;  %v3872_v20 = vpop.f32.mrb[65].mxu0  ;;  %v4047_v23 = vld [vmem:[#allocation4 + $0x80] sm:$0xff]  ;;  %v7479_v17 = vld [vmem:[%s9177_s16] ss:$12 sps:$4 sm:$0xff]  }
 0x851   : > { %3887 = vst.msk [vmem:[#allocation4 + $0xc0] sm:$0xff] %vm3514_vm6, %v3872_v20  ;;  %v7124_v18 = vpop.f32.mrb[66].mxu0  ;;  %v4050_v25 = vld [vmem:[#allocation4 + $0x98] sm:$0xff] }
 0x852   : > { %3890 = vst.msk [vmem:[#allocation4 + $0xd8] sm:$0xff] %vm3514_vm6, %v7124_v18  ;;  %v3875_v22 = vpop.f32.mrb[67].mxu0  ;;  %v4048_v24 = vld [vmem:[#allocation4 + $0x88] sm:$0xff]  ;;  %v4076_v30 = vpack.c.bf16 %v4050_v25, %v4049_v29  ;;  %v7491_v20 = vld [vmem:[%s9177_s16 + $0x50] ss:$12 sps:$4 sm:$0xff]  }
 0x853   : > { %3888 = vst.msk [vmem:[#allocation4 + $0xc8] sm:$0xff] %vm3514_vm6, %v3875_v22  ;;  %v4075_v26 = vpack.c.bf16 %v4048_v24, %v4047_v23  ;;  %v7484_v18 = vld [vmem:[%s9177_s16 + $0x1c] ss:$12 sps:$4 sm:$0xff]   ;;  %v7487_v22 = vld [vmem:[%s9177_s16 + $0x34] ss:$12 sps:$4 sm:$0xff]  }
 0x854   : > { %v7489_v23 = vld [vmem:[%s9177_s16 + $0x30] ss:$12 sps:$4 sm:$0xff]   ;;  %v7492_v24 = vld [vmem:[%s9177_s16 + $0x4c] ss:$12 sps:$4 sm:$0xff]   ;;  %v7494_v25 = vld [vmem:[%s9177_s16 + $0x48] ss:$12 sps:$4 sm:$0xff]  }
 0x855   : > { %6782 = vmatprep.subr.bf16.mxu1 %v4075_v26 }
 0x856   : > { %6783 = vmatpush3.bf16.msra.mxu1 %v4067_v28 }
 0x857   : > { %v7135_v34 = vpop.f32.mrb[68].mxu0  ;;  %6784 = vmatprep.subr.bf16.mxu1 %v4076_v30  ;;  %v4057_v58 = vld [vmem:[#allocation4 + $0xd0] sm:$0xff]  ;;  %v4096_v30 = vpop.permute.xlu0 %4095 }
 0x858   : > { %4013 = vst.msk [vmem:[#allocation4 + $0x110] sm:$0xff] %vm3514_vm6, %v7135_v34  ;;  %v3996_v37 = vpop.f32.mrb[69].mxu0  ;;  %v4055_v45 = vld [vmem:[#allocation4 + $0xc0] sm:$0xff] }
 0x859   : > { %4011 = vst.msk [vmem:[#allocation4 + $0x100] sm:$0xff] %vm3514_vm6, %v3996_v37  ;;  %v7136_v52 = vpop.f32.mrb[70].mxu0  ;;  %v4058_v48 = vld [vmem:[#allocation4 + $0xd8] sm:$0xff] }
 0x85a   : > { %4014 = vst.msk [vmem:[#allocation4 + $0x118] sm:$0xff] %vm3514_vm6, %v7136_v52  ;;  %v3999_v41 = vpop.f32.mrb[71].mxu0  ;;  %6785 = vmatpush3.bf16.msra.mxu1 %v4068_v38  ;;  %v4056_v9 = vld [vmem:[#allocation4 + $0xc8] sm:$0xff]  ;;  %v4080_v60 = vpack.c.bf16 %v4058_v48, %v4057_v58 }
 0x85b   : > { %4012 = vst.msk [vmem:[#allocation4 + $0x108] sm:$0xff] %vm3514_vm6, %v3999_v41  ;;  %6786 = vmatprep.subr.bf16.mxu1 %v4077_v54  ;;  %v4079_v46 = vpack.c.bf16 %v4056_v9, %v4055_v45  ;;  %v4106_v47 = vpop.permute.xlu0 %4105 }
 0x85e   : > { %6787 = vmatpush3.bf16.msra.mxu1 %v4069_v1 }
 0x85f   : > { %6788 = vmatprep.subr.bf16.mxu1 %v4078_v56  ;;  %v4065_v59 = vld [vmem:[#allocation4 + $0x110] sm:$0xff]  ;;  %v4116_v10 = vpop.permute.xlu0 %4115 }
 0x860   : > { %v4063_v49 = vld [vmem:[#allocation4 + $0x100] sm:$0xff] }
 0x861   : > { %v4066_v51 = vld [vmem:[#allocation4 + $0x118] sm:$0xff] }
 0x862   : > { %6789 = vmatpush3.bf16.msra.mxu1 %v4070_v36  ;;  %v4064_v50 = vld [vmem:[#allocation4 + $0x108] sm:$0xff]  ;;  %v4084_v19 = vpack.c.bf16 %v4066_v51, %v4065_v59 }
 0x863   : > { %6790 = vmatprep.subr.bf16.mxu1 %v4079_v46  ;;  %v4083_v53 = vpack.c.bf16 %v4064_v50, %v4063_v49 }
 0x865   : > { %7137 = vmatprep.subr.bf16.mxu0 %v4083_v53 }
 0x866   : > { %6791 = vmatpush3.bf16.msra.mxu1 %v4071_v57  ;;  %7138 = vmatpush3.bf16.msra.mxu0 %v4083_v53 }
 0x867   : > { %6792 = vmatprep.subr.bf16.mxu1 %v4080_v60  ;;  %7139 = vmatprep.subr.bf16.mxu0 %v4084_v19 }
 0x86a   : > { %6793 = vmatpush3.bf16.msra.mxu1 %v4072_v0  ;;  %7140 = vmatpush3.bf16.msra.mxu0 %v4084_v19 }
 0x86b   : > { %6794 = vmatprep.subr.bf16.mxu1 %v4081_v3 }
 0x86d   : > { %7142 = vmatmul.mubr.msk.bf16.vlgmr.msra.gmra.mrb[72].mxu0 %vm743_vm0, %v7483_v5 }
 0x86e   : > { %6795 = vmatpush3.bf16.msra.mxu1 %v4073_v11  ;;  %7145 = vmatprep.mubr.msk.bf16.mxu0 %vm743_vm0, %v7490_v8 }
 0x86f   : > { %6796 = vmatprep.subr.bf16.mxu1 %v4082_v13 }
 0x872   : > { %6797 = vmatpush3.bf16.msra.mxu1 %v4074_v16  ;;  %v4121_v16 = vpop.permute.xlu1 %4120 }
 0x875   : > { %4238 = vmatmul.mubr.bf16.vlgmr.msra.gmra.mrb[52].mxu1 %v7479_v17  ;;  %7146 = vmatmul.mubr.msk.bf16.gmra.mrb[76].mxu0 %vm743_vm0, %v7491_v20 }
 0x876   : > { %4245 = vmatprep.mubr.bf16.mxu1 %v7484_v18 }
 0x87d   : > { %4246 = vmatmul.mubr.bf16.gmra.mrb[56].mxu1 %v7486_v21 }
 0x87e   : > { %4253 = vmatprep.mubr.bf16.mxu1 %v7487_v22 }
 0x885   : > { %4254 = vmatmul.mubr.bf16.gmra.mrb[60].mxu1 %v7489_v23 }
 0x886   : > { %4261 = vmatprep.mubr.bf16.mxu1 %v7492_v24 }
 0x88d   : > { %4262 = vmatmul.mubr.bf16.gmra.mrb[64].mxu1 %v7494_v25 }
 0x940   : > { %v7143_v26 = vpop.f32.mrb[72].mxu0 }
 0x941   : > { %v4304_v27 = vpop.f32.mrb[73].mxu0 }
 0x942   : > { %v7144_v28 = vpop.f32.mrb[74].mxu0 }
 0x943   : > { %v4307_v29 = vpop.f32.mrb[75].mxu0 }
 0x948   : > { %v6798_v31 = vpop.f32.mrb[52].mxu1  ;;  %v8718_v32 = vpop.f32.mrb[76].mxu0 }
 0x949   : > { %v6799_v34 = vpop.f32.mrb[53].mxu1  ;;  %v4320_v35 = vpop.f32.mrb[77].mxu0 }
 0x94a   : > { %v6800_v37 = vadd.f32 %v6799_v34, %v6798_v31  ;;  %v6801_v38 = vpop.f32.mrb[54].mxu1  ;;  %v8720_v39 = vpop.f32.mrb[78].mxu0 }
 0x94b   : > { %v6802_v52 = vpop.f32.mrb[55].mxu1  ;;  %v4323_v54 = vpop.f32.mrb[79].mxu0 }
 0x94c   : > { %v4240_v40 = vadd.f32 %v6800_v37, %v4096_v30  ;;  %v6803_v41 = vadd.f32 %v6802_v52, %v6801_v38  ;;  %v4126_v34 = vpop.permute.xlu0 %4125 }
 0x94e   : > { %v4305_v43 = vadd.f32 %v4304_v27, %v4240_v40  ;;  %v4243_v1 = vadd.f32 %v6803_v41, %v4101_v42  ;;  %v4131_v41 = vpop.permute.xlu1 %4130 }
 0x950   : > { %v4335_v44 = vmul.f32 0.2, %v4305_v43  ;;  %v4308_v56 = vadd.f32 %v4307_v29, %v4243_v1  ;;  %v6804_v6 = vpop.f32.mrb[56].mxu1 }
 0x951   : > { %v6805_v9 = vpop.f32.mrb[57].mxu1 }
 0x952   : > { %v8722_v33 = vmax.f32 %v4305_v43, %v4335_v44  ;;  %v4336_v36 = vmul.f32 0.2, %v4308_v56  ;;  %v6806_v45 = vadd.f32 %v6805_v9, %v6804_v6  ;;  %v6807_v46 = vpop.f32.mrb[58].mxu1 }
 0x953   : > { %v6808_v48 = vpop.f32.mrb[59].mxu1 }
 0x954   : > { %v8724_v49 = vmax.f32 %v4308_v56, %v4336_v36  ;;  %v4248_v50 = vadd.f32 %v6806_v45, %v4106_v47  ;;  %v6809_v51 = vadd.f32 %v6808_v48, %v6807_v46  ;;  %v4351_v53 = vsel %vm3514_vm6, %v8722_v33, 0.0 }
 0x955   : > { %4352 = vadd.xlane.f32.xlu0 %v4351_v53  ;;  %v4383_v57 = vmul.f32 %v8722_v33, %v8722_v33 }
 0x956   : > { %v4313_v58 = vadd.f32 %v7143_v26, %v4248_v50  ;;  %v4251_v59 = vadd.f32 %v6809_v51, %v4111_v55  ;;  %v4354_v60 = vsel %vm3514_vm6, %v8724_v49, 0.0  ;;  %v4384_v19 = vmul.f32 %v8724_v49, %v8724_v49 }
 0x957   : > { %4355 = vadd.xlane.f32.xlu1 %v4354_v60  ;;  %v4391_v7 = vsel %vm3514_vm6, %v4383_v57, 0.0  ;;  %v4542_v57 = vld [vmem:[%s9180_s19 + $0x38] sm:$0xff]  ;;  %v6448_v60 = vld [vmem:[%s9181_s20 + $0x6] sm:$0x3] }
 0x958   : > { %v4337_v61 = vmul.f32 0.2, %v4313_v58  ;;  %v4316_v62 = vadd.f32 %v7144_v28, %v4251_v59  ;;  %v6810_v63 = vpop.f32.mrb[60].mxu1  ;;  %v4394_v0 = vsel %vm3514_vm6, %v4384_v19, 0.0  ;;  %v4595_v59 = vld [vmem:[%s9181_s20] sm:$0x3]  ;;  %7258 = vmatprep.subr.msk.bf16.mxu1 %vm4608_vm7, %v6448_v60 }
 0x959   : > { %v6811_v2 = vpop.f32.mrb[61].mxu1  ;;  %4395 = vadd.xlane.f32.xlu0 %v4394_v0  ;;  %7255 = vmatprep.subr.msk.bf16.mxu0 %vm4608_vm7, %v4595_v59  ;;  %v4610_v19 = vsel %vm4608_vm7, %v4595_v59, 0  ;;  %v8810_v0 = vpop.permute.xlu1 %4489 }
 0x95a   : > { %v4338_v3 = vmul.f32 0.2, %v4316_v62  ;;  %v6812_v4 = vadd.f32 %v6811_v2, %v6810_v63  ;;  %v6813_v5 = vpop.f32.mrb[62].mxu1  ;;  %v8736_v8 = vmax.f32 %v4313_v58, %v4337_v61  ;;  %v4541_v58 = vld [vmem:[%s9180_s19 + $0x30] sm:$0xff]  ;;  %v4845_v61 = vsel %vm4608_vm7, %v6448_v60, 0  ;;  %7150 = vmatpush3.bf16.msra.mxu0 %v4610_v19 }
 0x95b   : > { %v6814_v11 = vpop.f32.mrb[63].mxu1  ;;  %4392 = vadd.xlane.f32.xlu1 %v4391_v7  ;;  %7180 = vmatpush3.bf16.msra.mxu1 %v4845_v61  ;;  %v8806_v63 = vld [vmem:[%s9181_s20 + $0xa] sm:$0x3] }
 0x95c   : > { %v6815_v12 = vadd.f32 %v6814_v11, %v6813_v5  ;;  %v4256_v13 = vadd.f32 %v6812_v4, %v4116_v10  ;;  %v4357_v14 = vsel %vm3514_vm6, %v8736_v8, 0.0  ;;  %v4385_v15 = vmul.f32 %v8736_v8, %v8736_v8  ;;  %7260 = vmatprep.subr.msk.bf16.mxu1 %vm4608_vm7, %v8806_v63 }
 0x95d   : > { %4358 = vadd.xlane.f32.xlu0 %v4357_v14  ;;  %v8742_v17 = vmax.f32 %v4316_v62, %v4338_v3  ;;  %v8799_v62 = vld [vmem:[%s9181_s20 + $0x2] sm:$0x3]  ;;  %v8812_v2 = vpop.permute.xlu1 %4499  ;;  %v8814_v3 = vpop.permute.xlu0 %4494 }
 0x95e   : > { %v4321_v20 = vadd.f32 %v4320_v35, %v4256_v13  ;;  %v4259_v18 = vadd.f32 %v6815_v12, %v4121_v16  ;;  %v4397_v21 = vsel %vm3514_vm6, %v4385_v15, 0.0  ;;  %7256 = vmatprep.subr.msk.bf16.mxu0 %vm4608_vm7, %v8799_v62 }
 0x95f   : > { %4398 = vadd.xlane.f32.xlu1 %v4397_v21  ;;  %v4386_v22 = vmul.f32 %v8742_v17, %v8742_v17  ;;  %v4360_v26 = vsel %vm3514_vm6, %v8742_v17, 0.0 }
 0x960   : > { %v4339_v23 = vmul.f32 0.2, %v4321_v20  ;;  %v4324_v24 = vadd.f32 %v4323_v54, %v4259_v18  ;;  %v6816_v25 = vpop.f32.mrb[64].mxu1 }
 0x961   : > { %v6817_v27 = vpop.f32.mrb[65].mxu1  ;;  %4361 = vadd.xlane.f32.xlu0 %v4360_v26  ;;  %v4400_v37 = vsel %vm3514_vm6, %v4386_v22, 0.0  ;;  %v8816_v4 = vpop.permute.xlu1 %4504 }
 0x962   : > { %v8749_v28 = vmax.f32 %v4321_v20, %v4339_v23  ;;  %v4340_v29 = vmul.f32 0.2, %v4324_v24  ;;  %v6818_v30 = vadd.f32 %v6817_v27, %v6816_v25  ;;  %v6819_v31 = vpop.f32.mrb[66].mxu1  ;;  %v8818_v5 = vpop.permute.xlu0 %4545 }
 0x963   : > { %v6820_v35 = vpop.f32.mrb[67].mxu1 }
 0x964   : > { %v8752_v38 = vmax.f32 %v4324_v24, %v4340_v29  ;;  %v4264_v52 = vadd.f32 %v6818_v30, %v4126_v34  ;;  %v6821_v40 = vadd.f32 %v6820_v35, %v6819_v31  ;;  %v4363_v54 = vsel %vm3514_vm6, %v8749_v28, 0.0 }
 0x965   : > { %4401 = vadd.xlane.f32.xlu0 %v4400_v37  ;;  %4364 = vadd.xlane.f32.xlu1 %v4363_v54  ;;  %v4387_v42 = vmul.f32 %v8749_v28, %v8749_v28  ;;  %v8820_v7 = vpop.permute.xlu1 %4550 }
 0x966   : > { %v4329_v43 = vadd.f32 %v8718_v32, %v4264_v52  ;;  %v4267_v1 = vadd.f32 %v6821_v40, %v4131_v41  ;;  %v4366_v44 = vsel %vm3514_vm6, %v8752_v38, 0.0  ;;  %v4388_v36 = vmul.f32 %v8752_v38, %v8752_v38  ;;  %v8822_v10 = vpop.permute.xlu0 %4555 }
 0x967   : > { %v4403_v9 = vsel %vm3514_vm6, %v4387_v42, 0.0 }
 0x968   : > { %v4341_v56 = vmul.f32 0.2, %v4329_v43  ;;  %v4332_v6 = vadd.f32 %v8720_v39, %v4267_v1  ;;  %v4406_v47 = vsel %vm3514_vm6, %v4388_v36, 0.0 }
 0x969   : > { %4367 = vadd.xlane.f32.xlu0 %v4366_v44  ;;  %4404 = vadd.xlane.f32.xlu1 %v4403_v9  ;;  %v8824_v11 = vpop.permute.xlu1 %4560 }
 0x96a   : > { %v4342_v45 = vmul.f32 0.2, %v4332_v6  ;;  %v8765_v46 = vmax.f32 %v4329_v43, %v4341_v56  ;;  %v8826_v12 = vpop.permute.xlu0 %4509 }
 0x96c   : > { %v4369_v32 = vsel %vm3514_vm6, %v8765_v46, 0.0  ;;  %v8770_v48 = vmax.f32 %v4332_v6, %v4342_v45  ;;  %v4389_v39 = vmul.f32 %v8765_v46, %v8765_v46 }
 0x96d   : > { %4407 = vadd.xlane.f32.xlu0 %v4406_v47  ;;  %4370 = vadd.xlane.f32.xlu1 %v4369_v32  ;;  %v8828_v13 = vpop.permute.xlu1 %4514 }
 0x96e   : > { %v4372_v50 = vsel %vm3514_vm6, %v8770_v48, 0.0  ;;  %v4409_v51 = vsel %vm3514_vm6, %v4389_v39, 0.0  ;;  %v4390_v53 = vmul.f32 %v8770_v48, %v8770_v48  ;;  %v8830_v14 = vpop.permute.xlu0 %4519 }
 0x970   : > { %v4412_v55 = vsel %vm3514_vm6, %v4390_v53, 0.0 }
 0x971   : > { %4373 = vadd.xlane.f32.xlu0 %v4372_v50  ;;  %4410 = vadd.xlane.f32.xlu1 %v4409_v51  ;;  %v8832_v15 = vpop.permute.xlu1 %4524 }
 0x972   : > { %v8834_v16 = vpop.permute.xlu0 %4565 }
 0x975   : > { %4413 = vadd.xlane.f32.xlu0 %v4412_v55  ;;  %v8836_v20 = vpop.permute.xlu1 %4570 }
 0x982   : > { %4580 = vperm.xlu1 %7276, %v4542_v57  }
 0x98b   : > { %4575 = vperm.xlu0 %7275, %v4541_v58  }
 0x9e2   : > { %v4353_v18 = vpop.xlane.xlu0 %4352 }
 0x9e3   : > { %v4375_v22 = vmul.f32 0.25, %v4353_v18 }
 0x9e4   : > { %v4356_v21 = vpop.xlane.xlu1 %4355 }
 0x9e5   : > { %v4376_v23 = vmul.f32 0.25, %v4356_v21  ;;  %v4423_v29 = vmul.f32 %v4375_v22, %v4375_v22 }
 0x9e6   : > { %v4396_v24 = vpop.xlane.xlu0 %4395 }
 0x9e7   : > { %v4424_v25 = vmul.f32 %v4376_v23, %v4376_v23  ;;  %v4416_v26 = vmul.f32 0.25, %v4396_v24  ;;  %v4448_v19 = vsub.f32 %v8724_v49, %v4376_v23  ;;  %v4447_v24 = vsub.f32 %v8722_v33, %v4375_v22 }
 0x9e8   : > { %v4393_v27 = vpop.xlane.xlu1 %4392 }
 0x9e9   : > { %v4432_v30 = vsub.f32 %v4416_v26, %v4424_v25  ;;  %v4415_v31 = vmul.f32 0.25, %v4393_v27 }
 0x9ea   : > { %v4359_v34 = vpop.xlane.xlu0 %4358 }
 0x9eb   : > { %v4440_v35 = vmax.f32 %v4432_v30, 0.0  ;;  %v4431_v37 = vsub.f32 %v4415_v31, %v4423_v29  ;;  %v4377_v52 = vmul.f32 0.25, %v4359_v34 }
 0x9ec   : > { %v4399_v40 = vpop.xlane.xlu1 %4398 }
 0x9ed   : > { %v4456_v54 = vadd.f32 1e-05, %v4440_v35  ;;  %v4439_v41 = vmax.f32 %v4431_v37, 0.0  ;;  %v4425_v42 = vmul.f32 %v4377_v52, %v4377_v52  ;;  %v4417_v43 = vmul.f32 0.25, %v4399_v40 }
 0x9ee   : > { %v4362_v1 = vpop.xlane.xlu0 %4361 }
 0x9ef   : > { %7536 = vrsqrt.f32 %v4456_v54  ;;  %v4455_v44 = vadd.f32 1e-05, %v4439_v41  ;;  %v8838_v56 = vmul.f32 0.25, %v4362_v1  ;;  %v4433_v6 = vsub.f32 %v4417_v43, %v4425_v42 }
 0x9f1   : > { %7538 = vrsqrt.f32 %v4455_v44  ;;  %v4441_v9 = vmax.f32 %v4433_v6, 0.0  ;;  %v4426_v47 = vmul.f32 %v8838_v56, %v8838_v56 }
 0x9f2   : > { %v4365_v36 = vpop.xlane.xlu1 %4364  ;;  %v4402_v45 = vpop.xlane.xlu0 %4401 }
 0x9f3   : > { %v8842_v32 = vmul.f32 0.25, %v4365_v36  ;;  %v4418_v39 = vmul.f32 0.25, %v4402_v45  ;;  %v4457_v50 = vadd.f32 1e-05, %v4441_v9 }
 0x9f5   : > { %v4434_v51 = vsub.f32 %v4418_v39, %v4426_v47  ;;  %7540 = vrsqrt.f32 %v4457_v50  ;;  %v4427_v57 = vmul.f32 %v8842_v32, %v8842_v32 }
 0x9f6   : > { %v4405_v53 = vpop.xlane.xlu1 %4404  ;;  %v4368_v55 = vpop.xlane.xlu0 %4367 }
 0x9f7   : > { %v4442_v58 = vmax.f32 %v4434_v51, 0.0  ;;  %v4419_v59 = vmul.f32 0.25, %v4405_v53  ;;  %v8846_v60 = vmul.f32 0.25, %v4368_v55  ;;  %v4450_v55 = vsub.f32 %v8742_v17, %v8838_v56 }
 0x9f9   : > { %v7537_v61 = vpop.eup %7536  ;;  %v4458_v18 = vadd.f32 1e-05, %v4442_v58  ;;  %v4435_v21 = vsub.f32 %v4419_v59, %v4427_v57  ;;  %v4428_v26 = vmul.f32 %v8846_v60, %v8846_v60  ;;  %v4451_v59 = vsub.f32 %v8749_v28, %v8842_v32 }
 0x9fa   : > { %v4472_v25 = vmul.f32 %v7537_v61, %v4448_v19  ;;  %v4371_v27 = vpop.xlane.xlu1 %4370  ;;  %v4408_v29 = vpop.xlane.xlu0 %4407  ;;  %v5001_v28 = vsel %vm4608_vm7, %v8806_v63, 0 }
 0x9fb   : > { %v7539_v30 = vpop.eup %7538  ;;  %7542 = vrsqrt.f32 %v4458_v18  ;;  %v4443_v31 = vmax.f32 %v4435_v21, 0.0  ;;  %v8852_v34 = vmul.f32 0.25, %v4371_v27  ;;  %v4420_v35 = vmul.f32 0.25, %v4408_v29 }
 0x9fc   : > { %v4528_v37 = vmul.f32 %v8814_v3, %v4472_v25  ;;  %v4471_v49 = vmul.f32 %v7539_v30, %v4447_v24  ;;  %v4449_v3 = vsub.f32 %v8736_v8, %v4377_v52  ;;  %v4689_v25 = vsel %vm4608_vm7, %v8799_v62, 0 }
 0x9fd   : > { %v4459_v23 = vadd.f32 1e-05, %v4443_v31  ;;  %v4436_v40 = vsub.f32 %v4420_v35, %v4428_v26  ;;  %v4429_v33 = vmul.f32 %v8852_v34, %v8852_v34 }
 0x9fe   : > { %v4527_v54 = vmul.f32 %v8810_v0, %v4471_v49  ;;  %v4411_v22 = vpop.xlane.xlu1 %4410  ;;  %v4374_v41 = vpop.xlane.xlu0 %4373  ;;  %v4584_v6 = vadd.f32 %v8820_v7, %v4528_v37 }
 0x9ff   : > { %7544 = vrsqrt.f32 %v4459_v23  ;;  %v4444_v42 = vmax.f32 %v4436_v40, 0.0  ;;  %v4421_v43 = vmul.f32 0.25, %v4411_v22  ;;  %v4382_v1 = vmul.f32 0.25, %v4374_v41  ;;  %v7541_v44 = vpop.eup %7540  ;;  %v6463_v40 = vld [vmem:[%s9181_s20 + $0xc] sm:$0x3] }
 0xa00   : > { %v4583_v9 = vadd.f32 %v8818_v5, %v4527_v54  ;;  %v4473_v0 = vmul.f32 %v7541_v44, %v4449_v3  ;;  %v5079_v54 = vsel %vm4608_vm7, %v6463_v40, 0  ;;  %v7497_v41 = vld [vmem:[%s9182_s21 + $0x4] ss:$20 sps:$4 sm:$0xff]  }
 0xa01   : > { %v4460_v36 = vadd.f32 1e-05, %v4444_v42  ;;  %v4437_v45 = vsub.f32 %v4421_v43, %v4429_v33  ;;  %v4430_v51 = vmul.f32 %v4382_v1, %v4382_v1  ;;  %v4454_v30 = vsub.f32 %v8770_v48, %v4382_v1  ;;  %v6473_v33 = vld [vmem:[%s9181_s20 + $0x10] sm:$0x3]  ;;  %v7508_v42 = vld [vmem:[%s9182_s21 + $0xc] ss:$20 sps:$4 sm:$0xff]  }
 0xa02   : > { %v8861_v47 = vpack.c.bf16 %v4584_v6, %v4583_v9  ;;  %v4414_v39 = vpop.xlane.xlu0 %4413  ;;  %v4529_v52 = vmul.f32 %v8812_v2, %v4473_v0  ;;  %v4452_v2 = vsub.f32 %v8752_v38, %v8846_v60  ;;  %v4453_v38 = vsub.f32 %v8765_v46, %v8852_v34 }
 0xa03   : > { %7546 = vrsqrt.f32 %v4460_v36  ;;  %v4445_v50 = vmax.f32 %v4437_v45, 0.0  ;;  %v4422_v53 = vmul.f32 0.25, %v4414_v39  ;;  %v5235_v22 = vsel %vm4608_vm7, %v6473_v33, 0 }
 0xa04   : > { %7151 = vmatprep.mubr.msk.bf16.mxu0 %vm3514_vm6, %v8861_v47  ;;  %7181 = vmatprep.mubr.msk.bf16.mxu1 %vm3514_vm6, %v8861_v47  ;;  %v4585_v61 = vadd.f32 %v8822_v10, %v4529_v52  ;;  %v6443_v10 = vld [vmem:[%s9181_s20 + $0x4] sm:$0x3] }
 0xa05   : > { %v7543_v8 = vpop.eup %7542  ;;  %v4461_v5 = vadd.f32 1e-05, %v4445_v50  ;;  %v4438_v7 = vsub.f32 %v4422_v53, %v4430_v51  ;;  %v4767_v48 = vsel %vm4608_vm7, %v6443_v10, 0 }
 0xa06   : > { %v4474_v57 = vmul.f32 %v7543_v8, %v4450_v55 }
 0xa07   : > { %7548 = vrsqrt.f32 %v4461_v5  ;;  %v4446_v58 = vmax.f32 %v4438_v7, 0.0 }
 0xa08   : > { %v4530_v19 = vmul.f32 %v8816_v4, %v4474_v57 }
 0xa09   : > { %v7545_v17 = vpop.eup %7544  ;;  %v4462_v56 = vadd.f32 1e-05, %v4446_v58 }
 0xa0a   : > { %v4586_v18 = vadd.f32 %v8824_v11, %v4530_v19  ;;  %v4475_v21 = vmul.f32 %v7545_v17, %v4451_v59  ;;  %v6468_v11 = vld [vmem:[%s9181_s20 + $0xe] sm:$0x3]  ;;  %v4576_v34 = vpop.permute.xlu0 %4575 }
 0xa0b   : > { %7550 = vrsqrt.f32 %v4462_v56 }
 0xa0c   : > { %v8875_v24 = vpack.c.bf16 %v4586_v18, %v4585_v61  ;;  %v4531_v32 = vmul.f32 %v8826_v12, %v4475_v21 }
 0xa0d   : > { %v7547_v4 = vpop.eup %7546 }
 0xa0e   : > { %v4476_v26 = vmul.f32 %v7547_v4, %v4452_v2  ;;  %7152 = vmatmul.mubr.msk.bf16.vlgmr.msra.gmra.mrb[80].mxu0 %vm3514_vm6, %v8875_v24  ;;  %7182 = vmatmul.mubr.msk.bf16.vlgmr.msra.gmra.mrb[68].mxu1 %vm3514_vm6, %v8875_v24  ;;  %v4587_v12 = vadd.f32 %v8834_v16, %v4531_v32 }
 0xa0f   : > { %7160 = vmatpush3.bf16.msra.mxu0 %v4689_v25  ;;  %7200 = vmatpush3.bf16.msra.mxu1 %v5001_v28 }
 0xa10   : > { %v4532_v62 = vmul.f32 %v8828_v13, %v4476_v26  ;;  %7257 = vmatprep.subr.msk.bf16.mxu0 %vm4608_vm7, %v6443_v10  ;;  %7262 = vmatprep.subr.msk.bf16.mxu1 %vm4608_vm7, %v6468_v11  ;;  %v4581_v13 = vpop.permute.xlu1 %4580 }
 0xa11   : > { %v7549_v63 = vpop.eup %7548 }
 0xa12   : > { %v4588_v60 = vadd.f32 %v8836_v20, %v4532_v62  ;;  %v4477_v27 = vmul.f32 %v7549_v63, %v4453_v38 }
 0xa14   : > { %v4593_v29 = vpack.c.bf16 %v4588_v60, %v4587_v12  ;;  %v4533_v37 = vmul.f32 %v8830_v14, %v4477_v27  ;;  %v5157_v14 = vsel %vm4608_vm7, %v6468_v11, 0 }
 0xa15   : > { %v7551_v31 = vpop.eup %7550 }
 0xa16   : > { %v4478_v35 = vmul.f32 %v7551_v31, %v4454_v30  ;;  %7155 = vmatprep.mubr.msk.bf16.mxu0 %vm3514_vm6, %v4593_v29  ;;  %7185 = vmatprep.mubr.msk.bf16.mxu1 %vm3514_vm6, %v4593_v29  ;;  %v4589_v16 = vadd.f32 %v4576_v34, %v4533_v37 }
 0xa18   : > { %v4534_v46 = vmul.f32 %v8832_v15, %v4478_v35  ;;  %v6453_v15 = vld [vmem:[%s9181_s20 + $0x8] sm:$0x3] }
 0xa19   : > { %v4923_v20 = vsel %vm4608_vm7, %v6453_v15, 0 }
 0xa1a   : > { %v4590_v49 = vadd.f32 %v4581_v13, %v4534_v46 }
 0xa1c   : > { %v4594_v23 = vpack.c.bf16 %v4590_v49, %v4589_v16 }
 0xa1e   : > { %7156 = vmatmul.mubr.msk.bf16.gmra.mrb[84].mxu0 %vm3514_vm6, %v4594_v23  ;;  %7186 = vmatmul.mubr.msk.bf16.gmra.mrb[72].mxu1 %vm3514_vm6, %v4594_v23 }
 0xa1f   : > { %7161 = vmatprep.mubr.msk.bf16.mxu0 %vm3514_vm6, %v8861_v47  ;;  %7201 = vmatprep.mubr.msk.bf16.mxu1 %vm3514_vm6, %v8861_v47 }
 0xa26   : > { %7162 = vmatmul.mubr.msk.bf16.vlgmr.msra.gmra.mrb[88].mxu0 %vm3514_vm6, %v8875_v24  ;;  %7202 = vmatmul.mubr.msk.bf16.vlgmr.msra.gmra.mrb[76].mxu1 %vm3514_vm6, %v8875_v24 }
 0xa27   : > { %7170 = vmatpush3.bf16.msra.mxu0 %v4767_v48  ;;  %7165 = vmatprep.mubr.msk.bf16.mxu0 %vm3514_vm6, %v4593_v29 }
 0xa28   : > { %7205 = vmatprep.mubr.msk.bf16.mxu1 %vm3514_vm6, %v4593_v29  ;;  %7220 = vmatpush3.bf16.msra.mxu1 %v5157_v14 }
 0xa29   : > { %7259 = vmatprep.subr.msk.bf16.mxu0 %vm4608_vm7, %v6453_v15 }
 0xa2e   : > { %7166 = vmatmul.mubr.msk.bf16.gmra.mrb[92].mxu0 %vm3514_vm6, %v4594_v23  ;;  %7206 = vmatmul.mubr.msk.bf16.gmra.mrb[80].mxu1 %vm3514_vm6, %v4594_v23 }
 0xa2f   : > { %7171 = vmatprep.mubr.msk.bf16.mxu0 %vm3514_vm6, %v8861_v47  ;;  %7221 = vmatprep.mubr.msk.bf16.mxu1 %vm3514_vm6, %v8861_v47 }
 0xa36   : > { %7172 = vmatmul.mubr.msk.bf16.vlgmr.msra.gmra.mrb[96].mxu0 %vm3514_vm6, %v8875_v24  ;;  %7222 = vmatmul.mubr.msk.bf16.vlgmr.msra.gmra.mrb[84].mxu1 %vm3514_vm6, %v8875_v24 }
 0xa37   : > { %7190 = vmatpush3.bf16.msra.mxu0 %v4923_v20  ;;  %7175 = vmatprep.mubr.msk.bf16.mxu0 %vm3514_vm6, %v4593_v29 }
 0xa38   : > { %7225 = vmatprep.mubr.msk.bf16.mxu1 %vm3514_vm6, %v4593_v29  ;;  %7261 = vmatprep.subr.msk.bf16.mxu0 %vm4608_vm7, %v6463_v40 }
 0xa3e   : > { %7176 = vmatmul.mubr.msk.bf16.gmra.mrb[100].mxu0 %vm3514_vm6, %v4594_v23  ;;  %7226 = vmatmul.mubr.msk.bf16.gmra.mrb[88].mxu1 %vm3514_vm6, %v4594_v23 }
 0xa3f   : > { %7191 = vmatprep.mubr.msk.bf16.mxu0 %vm3514_vm6, %v8861_v47  ;;  %5594 = vmatprep.mubr.bf16.mxu1 %v7497_v41 }
 0xa46   : > { %7192 = vmatmul.mubr.msk.bf16.vlgmr.msra.gmra.mrb[104].mxu0 %vm3514_vm6, %v8875_v24 }
 0xa47   : > { %7210 = vmatpush3.bf16.msra.mxu0 %v5079_v54  ;;  %7195 = vmatprep.mubr.msk.bf16.mxu0 %vm3514_vm6, %v4593_v29 }
 0xa48   : > { %7263 = vmatprep.subr.msk.bf16.mxu0 %vm4608_vm7, %v6473_v33 }
 0xa4e   : > { %7196 = vmatmul.mubr.msk.bf16.gmra.mrb[108].mxu0 %vm3514_vm6, %v4594_v23 }
 0xa4f   : > { %7211 = vmatprep.mubr.msk.bf16.mxu0 %vm3514_vm6, %v8861_v47 }
 0xa56   : > { %7212 = vmatmul.mubr.msk.bf16.vlgmr.msra.gmra.mrb[112].mxu0 %vm3514_vm6, %v8875_v24 }
 0xa57   : > { %7215 = vmatprep.mubr.msk.bf16.mxu0 %vm3514_vm6, %v4593_v29  ;;  %7230 = vmatpush3.bf16.msra.mxu0 %v5235_v22 }
 0xa5e   : > { %7216 = vmatmul.mubr.msk.bf16.gmra.mrb[116].mxu0 %vm3514_vm6, %v4594_v23 }
 0xa5f   : > { %7231 = vmatprep.mubr.msk.bf16.mxu0 %vm3514_vm6, %v8861_v47 }
 0xa66   : > { %7232 = vmatmul.mubr.msk.bf16.vlgmr.msra.gmra.mrb[120].mxu0 %vm3514_vm6, %v8875_v24 }
 0xa67   : > { %7235 = vmatprep.mubr.msk.bf16.mxu0 %vm3514_vm6, %v4593_v29 }
 0xa6e   : > { %7236 = vmatmul.mubr.msk.bf16.gmra.mrb[124].mxu0 %vm3514_vm6, %v4594_v23 }
 0xa6f   : > { %5659 = vmatprep.mubr.bf16.mxu0 %v7508_v42 }
 0xae1   : > { %v7153_v43 = vpop.f32.mrb[80].mxu0  ;;  %v7183_v1 = vpop.f32.mrb[68].mxu1 }
 0xae2   : > { %4680 = vst.msk [vmem:[#allocation5 + $0x10] sm:$0xff] %vm4677_vm8, %v7153_v43  ;;  %4914 = vst.msk [vmem:[#allocation5 + $0xd0] sm:$0xff] %vm4677_vm8, %v7183_v1  ;;  %v4646_v44 = vpop.f32.mrb[81].mxu0  ;;  %v4881_v6 = vpop.f32.mrb[69].mxu1 }
 0xae3   : > { %4678 = vst.msk [vmem:[#allocation5] sm:$0xff] %vm4677_vm8, %v4646_v44  ;;  %4912 = vst.msk [vmem:[#allocation5 + $0xc0] sm:$0xff] %vm4677_vm8, %v4881_v6  ;;  %v7154_v9 = vpop.f32.mrb[82].mxu0  ;;  %v7184_v3 = vpop.f32.mrb[70].mxu1 }
 0xae4   : > { %4681 = vst.msk [vmem:[#allocation5 + $0x18] sm:$0xff] %vm4677_vm8, %v7154_v9  ;;  %4915 = vst.msk [vmem:[#allocation5 + $0xd8] sm:$0xff] %vm4677_vm8, %v7184_v3  ;;  %v4649_v36 = vpop.f32.mrb[83].mxu0  ;;  %v4884_v45 = vpop.f32.mrb[71].mxu1 }
 0xae5   : > { %4679 = vst.msk [vmem:[#allocation5 + $0x8] sm:$0xff] %vm4677_vm8, %v4649_v36  ;;  %4913 = vst.msk [vmem:[#allocation5 + $0xc8] sm:$0xff] %vm4677_vm8, %v4884_v45 }
 0xae9   : > { %v5336_v54 = vld [vmem:[#allocation5 + $0x10] sm:$0xff] }
 0xaea   : > { %v5334_v23 = vld [vmem:[#allocation5] sm:$0xff] }
 0xaeb   : > { %v5337_v20 = vld [vmem:[#allocation5 + $0x18] sm:$0xff] }
 0xaec   : > { %v5335_v35 = vld [vmem:[#allocation5 + $0x8] sm:$0xff]  ;;  %v5407_v22 = vpack.c.bf16 %v5337_v20, %v5336_v54 }
 0xaed   : > { %v5406_v48 = vpack.c.bf16 %v5335_v35, %v5334_v23 }
 0xaf1   : > { %v7157_v47 = vpop.f32.mrb[84].mxu0  ;;  %v7187_v0 = vpop.f32.mrb[72].mxu1 }
 0xaf2   : > { %4684 = vst.msk [vmem:[#allocation5 + $0x30] sm:$0xff] %vm4677_vm8, %v7157_v47  ;;  %4918 = vst.msk [vmem:[#allocation5 + $0xf0] sm:$0xff] %vm4677_vm8, %v7187_v0  ;;  %v4662_v39 = vpop.f32.mrb[85].mxu0  ;;  %v4897_v50 = vpop.f32.mrb[73].mxu1 }
 0xaf3   : > { %4682 = vst.msk [vmem:[#allocation5 + $0x20] sm:$0xff] %vm4677_vm8, %v4662_v39  ;;  %4916 = vst.msk [vmem:[#allocation5 + $0xe0] sm:$0xff] %vm4677_vm8, %v4897_v50  ;;  %v7158_v51 = vpop.f32.mrb[86].mxu0  ;;  %v7188_v53 = vpop.f32.mrb[74].mxu1  ;;  %v5359_v39 = vld [vmem:[#allocation5 + $0xc8] sm:$0xff] }
 0xaf4   : > { %4685 = vst.msk [vmem:[#allocation5 + $0x38] sm:$0xff] %vm4677_vm8, %v7158_v51  ;;  %4919 = vst.msk [vmem:[#allocation5 + $0xf8] sm:$0xff] %vm4677_vm8, %v7188_v53  ;;  %v4665_v55 = vpop.f32.mrb[87].mxu0  ;;  %v4900_v8 = vpop.f32.mrb[75].mxu1 }
 0xaf5   : > { %4683 = vst.msk [vmem:[#allocation5 + $0x28] sm:$0xff] %vm4677_vm8, %v4665_v55  ;;  %4917 = vst.msk [vmem:[#allocation5 + $0xe8] sm:$0xff] %vm4677_vm8, %v4900_v8  ;;  %v5358_v8 = vld [vmem:[#allocation5 + $0xc0] sm:$0xff] }
 0xaf9   : > { %v7163_v5 = vpop.f32.mrb[88].mxu0  ;;  %v7203_v7 = vpop.f32.mrb[76].mxu1  ;;  %v5340_v51 = vld [vmem:[#allocation5 + $0x30] sm:$0xff] }
 0xafa   : > { %4758 = vst.msk [vmem:[#allocation5 + $0x50] sm:$0xff] %vm4677_vm8, %v7163_v5  ;;  %5070 = vst.msk [vmem:[#allocation5 + $0x150] sm:$0xff] %vm4677_vm8, %v7203_v7  ;;  %v4725_v52 = vpop.f32.mrb[89].mxu0  ;;  %v5037_v57 = vpop.f32.mrb[77].mxu1  ;;  %v5338_v3 = vld [vmem:[#allocation5 + $0x20] sm:$0xff]  ;;  %v5418_v7 = vpack.c.bf16 %v5359_v39, %v5358_v8 }
 0xafb   : > { %4756 = vst.msk [vmem:[#allocation5 + $0x40] sm:$0xff] %vm4677_vm8, %v4725_v52  ;;  %5068 = vst.msk [vmem:[#allocation5 + $0x140] sm:$0xff] %vm4677_vm8, %v5037_v57  ;;  %v7164_v58 = vpop.f32.mrb[90].mxu0  ;;  %v7204_v59 = vpop.f32.mrb[78].mxu1  ;;  %v5341_v0 = vld [vmem:[#allocation5 + $0x38] sm:$0xff] }
 0xafc   : > { %4759 = vst.msk [vmem:[#allocation5 + $0x58] sm:$0xff] %vm4677_vm8, %v7164_v58  ;;  %5071 = vst.msk [vmem:[#allocation5 + $0x158] sm:$0xff] %vm4677_vm8, %v7204_v59  ;;  %v4728_v19 = vpop.f32.mrb[91].mxu0  ;;  %v5040_v17 = vpop.f32.mrb[79].mxu1  ;;  %v5339_v42 = vld [vmem:[#allocation5 + $0x28] sm:$0xff]  ;;  %v5409_v55 = vpack.c.bf16 %v5341_v0, %v5340_v51  ;;  %v5361_v58 = vld [vmem:[#allocation5 + $0xd8] sm:$0xff] }
 0xafd   : > { %4757 = vst.msk [vmem:[#allocation5 + $0x48] sm:$0xff] %vm4677_vm8, %v4728_v19  ;;  %5069 = vst.msk [vmem:[#allocation5 + $0x148] sm:$0xff] %vm4677_vm8, %v5040_v17  ;;  %v5408_v36 = vpack.c.bf16 %v5339_v42, %v5338_v3  ;;  %v5360_v17 = vld [vmem:[#allocation5 + $0xd0] sm:$0xff] }
 0xafe   : > { %v7500_v3 = vld [vmem:[%s9182_s21 + $0x54] ss:$20 sps:$4 sm:$0xff]  }
 0xb01   : > { %v7167_v56 = vpop.f32.mrb[92].mxu0  ;;  %v7207_v61 = vpop.f32.mrb[80].mxu1 }
 0xb02   : > { %4762 = vst.msk [vmem:[#allocation5 + $0x70] sm:$0xff] %vm4677_vm8, %v7167_v56  ;;  %5074 = vst.msk [vmem:[#allocation5 + $0x170] sm:$0xff] %vm4677_vm8, %v7207_v61  ;;  %v4741_v18 = vpop.f32.mrb[93].mxu0  ;;  %v5053_v21 = vpop.f32.mrb[81].mxu1  ;;  %v5342_v59 = vld [vmem:[#allocation5 + $0x40] sm:$0xff]  ;;  %v5419_v56 = vpack.c.bf16 %v5361_v58, %v5360_v17 }
 0xb03   : > { %4760 = vst.msk [vmem:[#allocation5 + $0x60] sm:$0xff] %vm4677_vm8, %v4741_v18  ;;  %5072 = vst.msk [vmem:[#allocation5 + $0x160] sm:$0xff] %vm4677_vm8, %v5053_v21  ;;  %v7168_v24 = vpop.f32.mrb[94].mxu0  ;;  %v7208_v2 = vpop.f32.mrb[82].mxu1  ;;  %v5345_v61 = vld [vmem:[#allocation5 + $0x58] sm:$0xff]  ;;  %v5363_v18 = vld [vmem:[#allocation5 + $0xe8] sm:$0xff] }
 0xb04   : > { %4763 = vst.msk [vmem:[#allocation5 + $0x78] sm:$0xff] %vm4677_vm8, %v7168_v24  ;;  %5075 = vst.msk [vmem:[#allocation5 + $0x178] sm:$0xff] %vm4677_vm8, %v7208_v2  ;;  %v4744_v25 = vpop.f32.mrb[95].mxu0  ;;  %v5056_v28 = vpop.f32.mrb[83].mxu1  ;;  %v5343_v52 = vld [vmem:[#allocation5 + $0x48] sm:$0xff]  ;;  %v5344_v24 = vld [vmem:[#allocation5 + $0x50] sm:$0xff] }
 0xb05   : > { %4761 = vst.msk [vmem:[#allocation5 + $0x68] sm:$0xff] %vm4677_vm8, %v4744_v25  ;;  %5073 = vst.msk [vmem:[#allocation5 + $0x168] sm:$0xff] %vm4677_vm8, %v5056_v28  ;;  %v5410_v19 = vpack.c.bf16 %v5343_v52, %v5342_v59  ;;  %v5411_v25 = vpack.c.bf16 %v5345_v61, %v5344_v24  ;;  %v5362_v28 = vld [vmem:[#allocation5 + $0xe0] sm:$0xff] }
 0xb09   : > { %v7173_v4 = vpop.f32.mrb[96].mxu0  ;;  %v7223_v10 = vpop.f32.mrb[84].mxu1 }
 0xb0a   : > { %4836 = vst.msk [vmem:[#allocation5 + $0x90] sm:$0xff] %vm4677_vm8, %v7173_v4  ;;  %5226 = vst.msk [vmem:[#allocation5 + $0x1d0] sm:$0xff] %vm4677_vm8, %v7223_v10  ;;  %v4803_v11 = vpop.f32.mrb[97].mxu0  ;;  %v5193_v32 = vpop.f32.mrb[85].mxu1  ;;  %v5420_v10 = vpack.c.bf16 %v5363_v18, %v5362_v28  ;;  %v7502_v18 = vld [vmem:[%s9182_s21 + $0x50] ss:$20 sps:$4 sm:$0xff]  }
 0xb0b   : > { %4834 = vst.msk [vmem:[#allocation5 + $0x80] sm:$0xff] %vm4677_vm8, %v4803_v11  ;;  %5224 = vst.msk [vmem:[#allocation5 + $0x1c0] sm:$0xff] %vm4677_vm8, %v5193_v32  ;;  %v7174_v26 = vpop.f32.mrb[98].mxu0  ;;  %v7224_v38 = vpop.f32.mrb[86].mxu1 }
 0xb0c   : > { %4837 = vst.msk [vmem:[#allocation5 + $0x98] sm:$0xff] %vm4677_vm8, %v7174_v26  ;;  %5227 = vst.msk [vmem:[#allocation5 + $0x1d8] sm:$0xff] %vm4677_vm8, %v7224_v38  ;;  %v4806_v62 = vpop.f32.mrb[99].mxu0  ;;  %v5196_v63 = vpop.f32.mrb[87].mxu1  ;;  %v5347_v11 = vld [vmem:[#allocation5 + $0x68] sm:$0xff]  ;;  %v5365_v26 = vld [vmem:[#allocation5 + $0xf8] sm:$0xff] }
 0xb0d   : > { %4835 = vst.msk [vmem:[#allocation5 + $0x88] sm:$0xff] %vm4677_vm8, %v4806_v62  ;;  %5225 = vst.msk [vmem:[#allocation5 + $0x1c8] sm:$0xff] %vm4677_vm8, %v5196_v63  ;;  %v5346_v38 = vld [vmem:[#allocation5 + $0x60] sm:$0xff]  ;;  %v5364_v63 = vld [vmem:[#allocation5 + $0xf0] sm:$0xff] }
 0xb0e   : > { %v5412_v62 = vpack.c.bf16 %v5347_v11, %v5346_v38 }
 0xb11   : > { %v7177_v12 = vpop.f32.mrb[100].mxu0  ;;  %v7227_v60 = vpop.f32.mrb[88].mxu1  ;;  %v5352_v14 = vld [vmem:[#allocation5 + $0x90] sm:$0xff] }
 0xb12   : > { %4840 = vst.msk [vmem:[#allocation5 + $0xb0] sm:$0xff] %vm4677_vm8, %v7177_v12  ;;  %5230 = vst.msk [vmem:[#allocation5 + $0x1f0] sm:$0xff] %vm4677_vm8, %v7227_v60  ;;  %v4819_v27 = vpop.f32.mrb[101].mxu0  ;;  %v5209_v29 = vpop.f32.mrb[89].mxu1  ;;  %v5350_v13 = vld [vmem:[#allocation5 + $0x80] sm:$0xff]  ;;  %v5421_v12 = vpack.c.bf16 %v5365_v26, %v5364_v63  ;;  %v5349_v60 = vld [vmem:[#allocation5 + $0x78] sm:$0xff] }
 0xb13   : > { %4838 = vst.msk [vmem:[#allocation5 + $0xa0] sm:$0xff] %vm4677_vm8, %v4819_v27  ;;  %5228 = vst.msk [vmem:[#allocation5 + $0x1e0] sm:$0xff] %vm4677_vm8, %v5209_v29  ;;  %v7178_v30 = vpop.f32.mrb[102].mxu0  ;;  %v7228_v31 = vpop.f32.mrb[90].mxu1  ;;  %v5353_v49 = vld [vmem:[#allocation5 + $0x98] sm:$0xff]  ;;  %v5348_v29 = vld [vmem:[#allocation5 + $0x70] sm:$0xff] }
 0xb14   : > { %4841 = vst.msk [vmem:[#allocation5 + $0xb8] sm:$0xff] %vm4677_vm8, %v7178_v30  ;;  %5231 = vst.msk [vmem:[#allocation5 + $0x1f8] sm:$0xff] %vm4677_vm8, %v7228_v31  ;;  %v4822_v37 = vpop.f32.mrb[103].mxu0  ;;  %v5212_v46 = vpop.f32.mrb[91].mxu1  ;;  %v5351_v34 = vld [vmem:[#allocation5 + $0x88] sm:$0xff]  ;;  %v5415_v15 = vpack.c.bf16 %v5353_v49, %v5352_v14  ;;  %v5413_v31 = vpack.c.bf16 %v5349_v60, %v5348_v29  ;;  %v5390_v59 = vld [vmem:[#allocation5 + $0x1c0] sm:$0xff] }
 0xb15   : > { %4839 = vst.msk [vmem:[#allocation5 + $0xa8] sm:$0xff] %vm4677_vm8, %v4822_v37  ;;  %5229 = vst.msk [vmem:[#allocation5 + $0x1e8] sm:$0xff] %vm4677_vm8, %v5212_v46  ;;  %v5414_v16 = vpack.c.bf16 %v5351_v34, %v5350_v13  ;;  %v7495_v46 = vld [vmem:[%s9182_s21] ss:$20 sps:$4 sm:$0xff]   ;;  %v5392_v11 = vld [vmem:[#allocation5 + $0x1d0] sm:$0xff] }
 0xb16   : > { %v7498_v13 = vld [vmem:[%s9182_s21 + $0x2c] ss:$20 sps:$4 sm:$0xff]   ;;  %v5393_v61 = vld [vmem:[#allocation5 + $0x1d8] sm:$0xff] }
 0xb17   : > { %6873 = vmatprep.subr.bf16.mxu1 %v5414_v16  ;;  %v7503_v26 = vld [vmem:[%s9182_s21 + $0x7c] ss:$20 sps:$4 sm:$0xff]   ;;  %v5435_v38 = vpack.c.bf16 %v5393_v61, %v5392_v11  ;;  %v5376_v60 = vld [vmem:[#allocation5 + $0x150] sm:$0xff] }
 0xb18   : > { %6874 = vmatpush3.bf16.msra.mxu1 %v5406_v48  ;;  %v5377_v63 = vld [vmem:[#allocation5 + $0x158] sm:$0xff] }
 0xb19   : > { %v7193_v40 = vpop.f32.mrb[104].mxu0  ;;  %6875 = vmatprep.subr.bf16.mxu1 %v5415_v15  ;;  %v5356_v45 = vld [vmem:[#allocation5 + $0xb0] sm:$0xff] }
 0xb1a   : > { %4992 = vst.msk [vmem:[#allocation5 + $0x110] sm:$0xff] %vm4677_vm8, %v7193_v40  ;;  %v4959_v33 = vpop.f32.mrb[105].mxu0  ;;  %v5354_v1 = vld [vmem:[#allocation5 + $0xa0] sm:$0xff] }
 0xb1b   : > { %4990 = vst.msk [vmem:[#allocation5 + $0x100] sm:$0xff] %vm4677_vm8, %v4959_v33  ;;  %v7194_v41 = vpop.f32.mrb[106].mxu0  ;;  %v5357_v6 = vld [vmem:[#allocation5 + $0xb8] sm:$0xff]  ;;  %v5316_v33 = vld [vmem:[%s9182_s21 + $0x28] sm:$0xff]  ;;  %v5394_v29 = vld [vmem:[#allocation5 + $0x1e0] sm:$0xff] }
 0xb1c   : > { %4993 = vst.msk [vmem:[#allocation5 + $0x118] sm:$0xff] %vm4677_vm8, %v7194_v41  ;;  %v4962_v43 = vpop.f32.mrb[107].mxu0  ;;  %6876 = vmatpush3.bf16.msra.mxu1 %v5407_v22  ;;  %v5355_v44 = vld [vmem:[#allocation5 + $0xa8] sm:$0xff]  ;;  %v5417_v47 = vpack.c.bf16 %v5357_v6, %v5356_v45 }
 0xb1d   : > { %4991 = vst.msk [vmem:[#allocation5 + $0x108] sm:$0xff] %vm4677_vm8, %v4962_v43  ;;  %v5416_v9 = vpack.c.bf16 %v5355_v44, %v5354_v1  ;;  %v5319_v22 = vld [vmem:[%s9182_s21 + $0x3c] sm:$0xff] }
 0xb1f   : > { %6877 = vmatprep.subr.bf16.mxu1 %v5416_v9  ;;  %v6483_v9 = vcombine.low %v5316_v33, %v5319_v22  ;;  %v5380_v33 = vld [vmem:[#allocation5 + $0x170] sm:$0xff] }
 0xb20   : > { %6878 = vmatpush3.bf16.msra.mxu1 %v5408_v36 }
 0xb21   : > { %v7197_v50 = vpop.f32.mrb[108].mxu0  ;;  %6879 = vmatprep.subr.bf16.mxu1 %v5417_v47  ;;  %v5368_v42 = vld [vmem:[#allocation5 + $0x110] sm:$0xff] }
 0xb22   : > { %4996 = vst.msk [vmem:[#allocation5 + $0x130] sm:$0xff] %vm4677_vm8, %v7197_v50  ;;  %v4975_v53 = vpop.f32.mrb[109].mxu0  ;;  %v5366_v14 = vld [vmem:[#allocation5 + $0x100] sm:$0xff] }
 0xb23   : > { %4994 = vst.msk [vmem:[#allocation5 + $0x120] sm:$0xff] %vm4677_vm8, %v4975_v53  ;;  %v7198_v5 = vpop.f32.mrb[110].mxu0  ;;  %v5369_v54 = vld [vmem:[#allocation5 + $0x118] sm:$0xff] }
 0xb24   : > { %4997 = vst.msk [vmem:[#allocation5 + $0x138] sm:$0xff] %vm4677_vm8, %v7198_v5  ;;  %v4978_v57 = vpop.f32.mrb[111].mxu0  ;;  %6880 = vmatpush3.bf16.msra.mxu1 %v5409_v55  ;;  %v5367_v37 = vld [vmem:[#allocation5 + $0x108] sm:$0xff]  ;;  %v5423_v1 = vpack.c.bf16 %v5369_v54, %v5368_v42  ;;  %v5381_v54 = vld [vmem:[#allocation5 + $0x178] sm:$0xff]  ;;  %v7510_v42 = vld [vmem:[%s9182_s21 + $0x38] ss:$20 sps:$4 sm:$0xff]  }
 0xb25   : > { %4995 = vst.msk [vmem:[#allocation5 + $0x128] sm:$0xff] %vm4677_vm8, %v4978_v57  ;;  %6881 = vmatprep.subr.bf16.mxu1 %v5418_v7  ;;  %v5422_v15 = vpack.c.bf16 %v5367_v37, %v5366_v14  ;;  %v5391_v5 = vld [vmem:[#allocation5 + $0x1c8] sm:$0xff]  ;;  %v7505_v37 = vld [vmem:[%s9182_s21 + $0x78] ss:$20 sps:$4 sm:$0xff]   ;;  %v5429_v22 = vpack.c.bf16 %v5381_v54, %v5380_v33 }
 0xb26   : > { %v5434_v17 = vpack.c.bf16 %v5391_v5, %v5390_v59 }
 0xb28   : > { %6882 = vmatpush3.bf16.msra.mxu1 %v5410_v19 }
 0xb29   : > { %v7213_v21 = vpop.f32.mrb[112].mxu0  ;;  %6883 = vmatprep.subr.bf16.mxu1 %v5419_v56  ;;  %v5372_v52 = vld [vmem:[#allocation5 + $0x130] sm:$0xff]  ;;  %v5375_v56 = vld [vmem:[#allocation5 + $0x148] sm:$0xff] }
 0xb2a   : > { %5148 = vst.msk [vmem:[#allocation5 + $0x190] sm:$0xff] %vm4677_vm8, %v7213_v21  ;;  %v5115_v2 = vpop.f32.mrb[113].mxu0  ;;  %v5370_v50 = vld [vmem:[#allocation5 + $0x120] sm:$0xff] }
 0xb2b   : > { %5146 = vst.msk [vmem:[#allocation5 + $0x180] sm:$0xff] %vm4677_vm8, %v5115_v2  ;;  %v7214_v4 = vpop.f32.mrb[114].mxu0  ;;  %v5373_v8 = vld [vmem:[#allocation5 + $0x138] sm:$0xff] }
 0xb2c   : > { %5149 = vst.msk [vmem:[#allocation5 + $0x198] sm:$0xff] %vm4677_vm8, %v7214_v4  ;;  %v5118_v32 = vpop.f32.mrb[115].mxu0  ;;  %6884 = vmatpush3.bf16.msra.mxu1 %v5411_v25  ;;  %v5371_v6 = vld [vmem:[#allocation5 + $0x128] sm:$0xff]  ;;  %v5425_v58 = vpack.c.bf16 %v5373_v8, %v5372_v52  ;;  %v5374_v4 = vld [vmem:[#allocation5 + $0x140] sm:$0xff] }
 0xb2d   : > { %5147 = vst.msk [vmem:[#allocation5 + $0x188] sm:$0xff] %vm4677_vm8, %v5118_v32  ;;  %6885 = vmatprep.subr.bf16.mxu1 %v5420_v10  ;;  %v5424_v51 = vpack.c.bf16 %v5371_v6, %v5370_v50  ;;  %v5426_v10 = vpack.c.bf16 %v5375_v56, %v5374_v4  ;;  %v7518_v6 = vld [vmem:[%s9182_s21 + $0x88] ss:$20 sps:$4 sm:$0xff]   ;;  %v5442_v4 = vld [vmem:[%s9183_s22] sm:$0xff] }
 0xb30   : > { %6886 = vmatpush3.bf16.msra.mxu1 %v5412_v62 }
 0xb31   : > { %v7217_v27 = vpop.f32.mrb[116].mxu0  ;;  %6887 = vmatprep.subr.bf16.mxu1 %v5421_v12  ;;  %v5384_v20 = vld [vmem:[#allocation5 + $0x190] sm:$0xff]  ;;  %v5395_v12 = vld [vmem:[#allocation5 + $0x1e8] sm:$0xff] }
 0xb32   : > { %5152 = vst.msk [vmem:[#allocation5 + $0x1b0] sm:$0xff] %vm4677_vm8, %v7217_v27  ;;  %v5131_v30 = vpop.f32.mrb[117].mxu0  ;;  %v5382_v49 = vld [vmem:[#allocation5 + $0x180] sm:$0xff]  ;;  %v5427_v27 = vpack.c.bf16 %v5377_v63, %v5376_v60 }
 0xb33   : > { %5150 = vst.msk [vmem:[#allocation5 + $0x1a0] sm:$0xff] %vm4677_vm8, %v5131_v30  ;;  %v7218_v35 = vpop.f32.mrb[118].mxu0  ;;  %v5385_v23 = vld [vmem:[#allocation5 + $0x198] sm:$0xff]  ;;  %v5436_v30 = vpack.c.bf16 %v5395_v12, %v5394_v29 }
 0xb34   : > { %5153 = vst.msk [vmem:[#allocation5 + $0x1b8] sm:$0xff] %vm4677_vm8, %v7218_v35  ;;  %v5134_v34 = vpop.f32.mrb[119].mxu0  ;;  %6888 = vmatpush3.bf16.msra.mxu1 %v5413_v31  ;;  %v5383_v16 = vld [vmem:[#allocation5 + $0x188] sm:$0xff]  ;;  %v5431_v40 = vpack.c.bf16 %v5385_v23, %v5384_v20  ;;  %v5397_v35 = vld [vmem:[#allocation5 + $0x1f8] sm:$0xff] }
 0xb35   : > { %5151 = vst.msk [vmem:[#allocation5 + $0x1a8] sm:$0xff] %vm4677_vm8, %v5134_v34  ;;  %v5430_v48 = vpack.c.bf16 %v5383_v16, %v5382_v49  ;;  %v5379_v31 = vld [vmem:[#allocation5 + $0x168] sm:$0xff]  ;;  %v5378_v16 = vld [vmem:[#allocation5 + $0x160] sm:$0xff] }
 0xb36   : > { %v5428_v23 = vpack.c.bf16 %v5379_v31, %v5378_v16 }
 0xb37   : > { %6913 = vmatprep.subr.bf16.mxu0 %v5430_v48  ;;  %5595 = vmatmul.mubr.bf16.vlgmr.msra.gmra.mrb[92].mxu1 %v7495_v46  ;;  %v5396_v48 = vld [vmem:[#allocation5 + $0x1f0] sm:$0xff] }
 0xb38   : > { %6914 = vmatpush3.bf16.msra.mxu0 %v5422_v15  ;;  %5602 = vmatprep.mubr.bf16.mxu1 %v7498_v13  ;;  %v7509_v15 = vld [vmem:[%s9182_s21 + $0x10] ss:$20 sps:$4 sm:$0xff]   ;;  %v5437_v20 = vpack.c.bf16 %v5397_v35, %v5396_v48  ;;  %v5445_v48 = vld [vmem:[%s9183_s22 + $0x18] sm:$0xff] }
 0xb39   : > { %v7233_v41 = vpop.f32.mrb[120].mxu0  ;;  %6915 = vmatprep.subr.bf16.mxu0 %v5431_v40  ;;  %v5388_v53 = vld [vmem:[#allocation5 + $0x1b0] sm:$0xff] }
 0xb3a   : > { %5304 = vst.msk [vmem:[#allocation5 + $0x210] sm:$0xff] %vm4677_vm8, %v7233_v41  ;;  %v5271_v43 = vpop.f32.mrb[121].mxu0  ;;  %v5386_v45 = vld [vmem:[#allocation5 + $0x1a0] sm:$0xff] }
 0xb3b   : > { %5302 = vst.msk [vmem:[#allocation5 + $0x200] sm:$0xff] %vm4677_vm8, %v5271_v43  ;;  %v7234_v44 = vpop.f32.mrb[122].mxu0  ;;  %v5389_v0 = vld [vmem:[#allocation5 + $0x1b8] sm:$0xff]  ;;  %v7506_v41 = vld [vmem:[%s9182_s21 + $0x8] ss:$20 sps:$4 sm:$0xff]  }
 0xb3c   : > { %5305 = vst.msk [vmem:[#allocation5 + $0x218] sm:$0xff] %vm4677_vm8, %v7234_v44  ;;  %v5274_v36 = vpop.f32.mrb[123].mxu0  ;;  %6916 = vmatpush3.bf16.msra.mxu0 %v5423_v1  ;;  %v5387_v47 = vld [vmem:[#allocation5 + $0x1a8] sm:$0xff]  ;;  %v5433_v55 = vpack.c.bf16 %v5389_v0, %v5388_v53  ;;  %v7511_v43 = vld [vmem:[%s9182_s21 + $0x34] ss:$20 sps:$4 sm:$0xff]  }
 0xb3d   : > { %5303 = vst.msk [vmem:[#allocation5 + $0x208] sm:$0xff] %vm4677_vm8, %v5274_v36  ;;  %v5432_v39 = vpack.c.bf16 %v5387_v47, %v5386_v45  ;;  %v7517_v1 = vld [vmem:[%s9182_s21 + $0x60] ss:$20 sps:$4 sm:$0xff]   ;;  %v7513_v44 = vld [vmem:[%s9182_s21 + $0x30] ss:$20 sps:$4 sm:$0xff]  }
 0xb3e   : > { %v7519_v36 = vld [vmem:[%s9182_s21 + $0x84] ss:$20 sps:$4 sm:$0xff]   ;;  %v7521_v45 = vld [vmem:[%s9182_s21 + $0x80] ss:$20 sps:$4 sm:$0xff]  }
 0xb3f   : > { %6917 = vmatprep.subr.bf16.mxu0 %v5432_v39  ;;  %5603 = vmatmul.mubr.bf16.gmra.mrb[96].mxu1 %v6483_v9  ;;  %v7514_v9 = vld [vmem:[%s9182_s21 + $0x5c] ss:$20 sps:$4 sm:$0xff]  }
 0xb40   : > { %6918 = vmatpush3.bf16.msra.mxu0 %v5424_v51  ;;  %5610 = vmatprep.mubr.bf16.mxu1 %v7500_v3  ;;  %v7516_v3 = vld [vmem:[%s9182_s21 + $0x58] ss:$20 sps:$4 sm:$0xff]  }
 0xb41   : > { %v7237_v7 = vpop.f32.mrb[124].mxu0  ;;  %6919 = vmatprep.subr.bf16.mxu0 %v5433_v55  ;;  %v5400_v32 = vld [vmem:[#allocation5 + $0x210] sm:$0xff] }
 0xb42   : > { %5308 = vst.msk [vmem:[#allocation5 + $0x230] sm:$0xff] %vm4677_vm8, %v7237_v7  ;;  %v5287_v57 = vpop.f32.mrb[125].mxu0  ;;  %v5398_v24 = vld [vmem:[#allocation5 + $0x200] sm:$0xff] }
 0xb43   : > { %5306 = vst.msk [vmem:[#allocation5 + $0x220] sm:$0xff] %vm4677_vm8, %v5287_v57  ;;  %v7238_v19 = vpop.f32.mrb[126].mxu0  ;;  %v5401_v25 = vld [vmem:[#allocation5 + $0x218] sm:$0xff] }
 0xb44   : > { %5309 = vst.msk [vmem:[#allocation5 + $0x238] sm:$0xff] %vm4677_vm8, %v7238_v19  ;;  %v5290_v21 = vpop.f32.mrb[127].mxu0  ;;  %6920 = vmatpush3.bf16.msra.mxu0 %v5425_v58  ;;  %v5399_v2 = vld [vmem:[#allocation5 + $0x208] sm:$0xff]  ;;  %v5439_v62 = vpack.c.bf16 %v5401_v25, %v5400_v32  ;;  %v5443_v32 = vld [vmem:[%s9183_s22 + $0x8] sm:$0xff] }
 0xb45   : > { %5307 = vst.msk [vmem:[#allocation5 + $0x228] sm:$0xff] %vm4677_vm8, %v5290_v21  ;;  %6921 = vmatprep.subr.bf16.mxu0 %v5434_v17  ;;  %v5438_v28 = vpack.c.bf16 %v5399_v2, %v5398_v24 }
 0xb47   : > { %7239 = vmatprep.subr.bf16.mxu1 %v5438_v28  ;;  %5611 = vmatmul.mubr.bf16.gmra.mrb[100].mxu1 %v7502_v18 }
 0xb48   : > { %6922 = vmatpush3.bf16.msra.mxu0 %v5426_v10  ;;  %7240 = vmatpush3.bf16.msra.mxu1 %v5438_v28 }
 0xb49   : > { %6923 = vmatprep.subr.bf16.mxu0 %v5435_v38  ;;  %7241 = vmatprep.subr.bf16.mxu1 %v5439_v62  ;;  %v5404_v14 = vld [vmem:[#allocation5 + $0x230] sm:$0xff] }
 0xb4a   : > { %5618 = vmatprep.mubr.bf16.mxu1 %v7503_v26  ;;  %v5402_v46 = vld [vmem:[#allocation5 + $0x220] sm:$0xff] }
 0xb4b   : > { %v5405_v34 = vld [vmem:[#allocation5 + $0x238] sm:$0xff] }
 0xb4c   : > { %6924 = vmatpush3.bf16.msra.mxu0 %v5427_v27  ;;  %7242 = vmatpush3.bf16.msra.mxu1 %v5439_v62  ;;  %v5403_v13 = vld [vmem:[#allocation5 + $0x228] sm:$0xff]  ;;  %v5441_v40 = vpack.c.bf16 %v5405_v34, %v5404_v14 }
 0xb4d   : > { %6925 = vmatprep.subr.bf16.mxu0 %v5436_v30  ;;  %v5440_v49 = vpack.c.bf16 %v5403_v13, %v5402_v46  ;;  %v5444_v13 = vld [vmem:[%s9183_s22 + $0x10] sm:$0xff] }
 0xb4f   : > { %7243 = vmatprep.subr.bf16.mxu1 %v5440_v49  ;;  %5619 = vmatmul.mubr.bf16.gmra.mrb[104].mxu1 %v7505_v37 }
 0xb50   : > { %6926 = vmatpush3.bf16.msra.mxu0 %v5428_v23  ;;  %7244 = vmatpush3.bf16.msra.mxu1 %v5440_v49 }
 0xb51   : > { %6927 = vmatprep.subr.bf16.mxu0 %v5437_v20  ;;  %7245 = vmatprep.subr.bf16.mxu1 %v5441_v40 }
 0xb52   : > { %7247 = vmatprep.mubr.msk.bf16.mxu1 %vm997_vm1, %v7509_v15 }
 0xb54   : > { %6928 = vmatpush3.bf16.msra.mxu0 %v5429_v22  ;;  %7246 = vmatpush3.bf16.msra.mxu1 %v5441_v40 }
 0xb57   : > { %5660 = vmatmul.mubr.bf16.vlgmr.msra.gmra.mrb[128].mxu0 %v7506_v41  ;;  %7248 = vmatmul.mubr.msk.bf16.vlgmr.msra.gmra.mrb[108].mxu1 %vm997_vm1, %v7510_v42 }
 0xb58   : > { %5667 = vmatprep.mubr.bf16.mxu0 %v7511_v43  ;;  %7251 = vmatprep.mubr.msk.bf16.mxu1 %vm997_vm1, %v7517_v1 }
 0xb5f   : > { %5668 = vmatmul.mubr.bf16.gmra.mrb[132].mxu0 %v7513_v44  ;;  %7252 = vmatmul.mubr.msk.bf16.gmra.mrb[112].mxu1 %vm997_vm1, %v7518_v6 }
 0xb60   : > { %5675 = vmatprep.mubr.bf16.mxu0 %v7514_v9 }
 0xb67   : > { %5676 = vmatmul.mubr.bf16.gmra.mrb[136].mxu0 %v7516_v3 }
 0xb68   : > { %5683 = vmatprep.mubr.bf16.mxu0 %v7519_v36 }
 0xb6f   : > { %5684 = vmatmul.mubr.bf16.gmra.mrb[140].mxu0 %v7521_v45  ;;  %v5446_v45 = vld [vmem:[%s9183_s22 + $0x20] sm:$0xff] }
 0xc0a   : > { %v6889_v47 = vpop.f32.mrb[92].mxu1 }
 0xc0b   : > { %v6890_v0 = vpop.f32.mrb[93].mxu1 }
 0xc0c   : > { %v6891_v39 = vadd.f32 %v6890_v0, %v6889_v47  ;;  %v6892_v50 = vpop.f32.mrb[94].mxu1 }
 0xc0d   : > { %v6893_v51 = vpop.f32.mrb[95].mxu1 }
 0xc0e   : > { %v6894_v53 = vadd.f32 %v6893_v51, %v6892_v50  ;;  %v5597_v62 = vadd.f32 %v6891_v39, %v5442_v4  ;;  %v5447_v50 = vld [vmem:[%s9183_s22 + $0x28] sm:$0xff] }
 0xc10   : > { %v5600_v30 = vadd.f32 %v6894_v53, %v5443_v32 }
 0xc12   : > { %v6895_v55 = vpop.f32.mrb[96].mxu1 }
 0xc13   : > { %v6896_v8 = vpop.f32.mrb[97].mxu1 }
 0xc14   : > { %v6897_v5 = vadd.f32 %v6896_v8, %v6895_v55  ;;  %v6898_v7 = vpop.f32.mrb[98].mxu1 }
 0xc15   : > { %v6899_v52 = vpop.f32.mrb[99].mxu1 }
 0xc16   : > { %v6900_v57 = vadd.f32 %v6899_v52, %v6898_v7  ;;  %v5605_v20 = vadd.f32 %v6897_v5, %v5444_v13 }
 0xc18   : > { %v5608_v1 = vadd.f32 %v6900_v57, %v5445_v48 }
 0xc1a   : > { %v6901_v58 = vpop.f32.mrb[100].mxu1 }
 0xc1b   : > { %v6902_v59 = vpop.f32.mrb[101].mxu1 }
 0xc1c   : > { %v6903_v19 = vadd.f32 %v6902_v59, %v6901_v58  ;;  %v6904_v17 = vpop.f32.mrb[102].mxu1 }
 0xc1d   : > { %v6905_v56 = vpop.f32.mrb[103].mxu1 }
 0xc1e   : > { %v6906_v61 = vadd.f32 %v6905_v56, %v6904_v17  ;;  %v5613_v53 = vadd.f32 %v6903_v19, %v5446_v45  ;;  %v5448_v19 = vld [vmem:[%s9183_s22 + $0x30] sm:$0xff] }
 0xc20   : > { %v5616_v57 = vadd.f32 %v6906_v61, %v5447_v50  ;;  %v5449_v61 = vld [vmem:[%s9183_s22 + $0x38] sm:$0xff] }
 0xc22   : > { %v6907_v18 = vpop.f32.mrb[104].mxu1 }
 0xc23   : > { %v6908_v21 = vpop.f32.mrb[105].mxu1 }
 0xc24   : > { %v9106_v24 = vadd.f32 %v6908_v21, %v6907_v18  ;;  %v6910_v2 = vpop.f32.mrb[106].mxu1 }
 0xc25   : > { %v6911_v25 = vpop.f32.mrb[107].mxu1 }
 0xc26   : > { %v9108_v28 = vadd.f32 %v6911_v25, %v6910_v2 }
 0xc2a   : > { %v6929_v10 = vpop.f32.mrb[128].mxu0  ;;  %v7249_v11 = vpop.f32.mrb[108].mxu1 }
 0xc2b   : > { %v6930_v26 = vpop.f32.mrb[129].mxu0  ;;  %v5726_v38 = vpop.f32.mrb[109].mxu1 }
 0xc2c   : > { %v6931_v63 = vadd.f32 %v6930_v26, %v6929_v10  ;;  %v6932_v12 = vpop.f32.mrb[130].mxu0  ;;  %v7250_v60 = vpop.f32.mrb[110].mxu1  ;;  %v5621_v10 = vadd.f32 %v9106_v24, %v5448_v19 }
 0xc2d   : > { %v6933_v27 = vpop.f32.mrb[131].mxu0  ;;  %v5729_v29 = vpop.f32.mrb[111].mxu1 }
 0xc2e   : > { %v6934_v31 = vadd.f32 %v6933_v27, %v6932_v12  ;;  %v5662_v35 = vadd.f32 %v6931_v63, %v5597_v62  ;;  %v5624_v63 = vadd.f32 %v9108_v28, %v5449_v61 }
 0xc30   : > { %v5727_v37 = vadd.f32 %v5726_v38, %v5662_v35  ;;  %v5665_v46 = vadd.f32 %v6934_v31, %v5600_v30 }
 0xc32   : > { %v5757_v34 = vmul.f32 0.2, %v5727_v37  ;;  %v5730_v49 = vadd.f32 %v5729_v29, %v5665_v46  ;;  %v6935_v16 = vpop.f32.mrb[132].mxu0  ;;  %v7253_v23 = vpop.f32.mrb[112].mxu1 }
 0xc33   : > { %v6936_v14 = vpop.f32.mrb[133].mxu0  ;;  %v5742_v15 = vpop.f32.mrb[113].mxu1 }
 0xc34   : > { %v5765_v40 = vmax.f32 %v5727_v37, %v5757_v34  ;;  %v5758_v54 = vmul.f32 0.2, %v5730_v49  ;;  %v6937_v33 = vadd.f32 %v6936_v14, %v6935_v16  ;;  %v6938_v22 = vpop.f32.mrb[134].mxu0  ;;  %v7254_v41 = vpop.f32.mrb[114].mxu1 }
 0xc35   : > { %v6939_v42 = vpop.f32.mrb[135].mxu0  ;;  %v5745_v43 = vpop.f32.mrb[115].mxu1 }
 0xc36   : > { %5781 = vst.msk [vmem:[%s9123_s7] sm:$0xff] %vm4677_vm8, %v5765_v40  ;;  %v5766_v44 = vmax.f32 %v5730_v49, %v5758_v54  ;;  %v5670_v6 = vadd.f32 %v6937_v33, %v5605_v20  ;;  %v6940_v9 = vadd.f32 %v6939_v42, %v6938_v22 }
 0xc38   : > { %5782 = vst.msk [vmem:[%s9123_s7 + $0x8] sm:$0xff] %vm4677_vm8, %v5766_v44  ;;  %v5735_v3 = vadd.f32 %v7249_v11, %v5670_v6  ;;  %v5673_v36 = vadd.f32 %v6940_v9, %v5608_v1 }
 0xc3a   : > { %v5759_v47 = vmul.f32 0.2, %v5735_v3  ;;  %v5738_v0 = vadd.f32 %v7250_v60, %v5673_v36  ;;  %v6941_v39 = vpop.f32.mrb[136].mxu0 }
 0xc3b   : > { %v6942_v51 = vpop.f32.mrb[137].mxu0 }
 0xc3c   : > { %v5767_v55 = vmax.f32 %v5735_v3, %v5759_v47  ;;  %v5760_v8 = vmul.f32 0.2, %v5738_v0  ;;  %v6943_v5 = vadd.f32 %v6942_v51, %v6941_v39  ;;  %v6944_v7 = vpop.f32.mrb[138].mxu0 }
 0xc3d   : > { %v6945_v52 = vpop.f32.mrb[139].mxu0 }
 0xc3e   : > { %5783 = vst.msk [vmem:[%s9123_s7 + $0x10] sm:$0xff] %vm4677_vm8, %v5767_v55  ;;  %v5768_v58 = vmax.f32 %v5738_v0, %v5760_v8  ;;  %v6946_v59 = vadd.f32 %v6945_v52, %v6944_v7  ;;  %v5678_v17 = vadd.f32 %v6943_v5, %v5613_v53 }
 0xc40   : > { %5784 = vst.msk [vmem:[%s9123_s7 + $0x18] sm:$0xff] %vm4677_vm8, %v5768_v58  ;;  %v5743_v56 = vadd.f32 %v5742_v15, %v5678_v17  ;;  %v5681_v18 = vadd.f32 %v6946_v59, %v5616_v57 }
 0xc42   : > { %v5761_v21 = vmul.f32 0.2, %v5743_v56  ;;  %v5746_v2 = vadd.f32 %v5745_v43, %v5681_v18  ;;  %v6947_v25 = vpop.f32.mrb[140].mxu0 }
 0xc43   : > { %v6948_v4 = vpop.f32.mrb[141].mxu0 }
 0xc44   : > { %v5769_v11 = vmax.f32 %v5743_v56, %v5761_v21  ;;  %v5762_v32 = vmul.f32 0.2, %v5746_v2  ;;  %v6949_v26 = vadd.f32 %v6948_v4, %v6947_v25  ;;  %v6950_v38 = vpop.f32.mrb[142].mxu0 }
 0xc45   : > { %v6951_v62 = vpop.f32.mrb[143].mxu0 }
 0xc46   : > { %5785 = vst.msk [vmem:[%s9123_s7 + $0x20] sm:$0xff] %vm4677_vm8, %v5769_v11  ;;  %v5770_v12 = vmax.f32 %v5746_v2, %v5762_v32  ;;  %v5686_v60 = vadd.f32 %v6949_v26, %v5621_v10  ;;  %v6952_v27 = vadd.f32 %v6951_v62, %v6950_v38 }
 0xc48   : > { %5786 = vst.msk [vmem:[%s9123_s7 + $0x28] sm:$0xff] %vm4677_vm8, %v5770_v12  ;;  %v5751_v29 = vadd.f32 %v7253_v23, %v5686_v60  ;;  %v5689_v30 = vadd.f32 %v6952_v27, %v5624_v63 }
 0xc4a   : > { %v5763_v31 = vmul.f32 0.2, %v5751_v29  ;;  %v5754_v24 = vadd.f32 %v7254_v41, %v5689_v30 }
 0xc4c   : > { %v5771_v35 = vmax.f32 %v5751_v29, %v5763_v31  ;;  %v5764_v37 = vmul.f32 0.2, %v5754_v24 }
 0xc4e   : > { %5787 = vst.msk [vmem:[%s9123_s7 + $0x30] sm:$0xff] %vm4677_vm8, %v5771_v35  ;;  %v5772_v46 = vmax.f32 %v5754_v24, %v5764_v37 }
 0xc50   : > { %5788 = vst.msk [vmem:[%s9123_s7 + $0x38] sm:$0xff] %vm4677_vm8, %v5772_v46 }
 0xc51 PF: > { %s33_s4 = sadd.s32 1, %s7558_s4  }
 0xc52   : > { %p30_p4 = scmp.ge.s32.totalorder %s33_s4, 4  }
 0xc54   :  { %32 = sbr.rel (!%p30_p4) target bundleno = 9 (0x9), region = 174 }

</bundles_post_ra>
